<compile_context>
chip_gen: v5e
topology: v5e:2x2
jax: 0.10.0
libtpu: 0.0.40
codegen_flags: <defaults>
</compile_context>

<pallas_src>
import jax
import jax.numpy as jnp
import numpy as np
from jax import lax
from jax.experimental import pallas as pl
from jax.experimental.pallas import tpu as pltpu

# ----------------------------- vocab / config -------------------------------
CHARS = list("abcdefghijkl")              # 12 source characters
PHONEMES = [f"p{i}" for i in range(10)]   # 10 phonemes
PHONEME_BOS = len(PHONEMES)               # 10
PHONEME_EOS = len(PHONEMES) - 1
PHONEME_PAD = len(PHONEMES) + 1

E_SRC = 16                                # source_embedding_dim
E_TGT = 16                                # target_embedding_dim
H = 32                                    # hidden_dim
D = 2                                     # bidirectional -> 2
V_SRC = len(CHARS) + 1                    # emb_x vocab (padding_idx=-1 -> last row)
V_TGT = len(PHONEMES) + 2                 # emb_y vocab (padding_idx=-1 -> last row)
V_OUT = len(PHONEMES) + 1                 # Linear output size (= 11)
V_PAD = 128                               # lane-dense padded logits width


# ------------------------------- fused kernel --------------------------------
def seq2seq_kernel(exs_ref, eys_ref, mask_ref,
                   wihf_ref, whhf_ref, bf_ref,
                   wihb_ref, whhb_ref, bb_ref,
                   wihd_ref, whhd_ref, bd_ref,
                   wout_ref, bout_ref,
                   logits_ref,
                   h_slab):
    """Fused bi-LSTM encoder + LSTM decoder + output Linear (teacher forcing).

    exs_ref : (Tx*B, E_SRC)  source embeddings, flattened time-major
    eys_ref : (Ty*B, E_TGT)  target embeddings, flattened time-major
    mask_ref: (Tx, B, 1)     1.0 while t < xls[b] (emulates pack_padded_sequence)
    weights : pre-transposed (in, 4H); biases = b_ih + b_hh as (1, 4H)
    wout_ref: (2H, 128) zero-padded output Linear; bout_ref: (1, 128)
    logits  : (Ty*B, 128) lane-dense padded logits
    h_slab  : VMEM scratch (Ty*B, 2H) staging decoder hiddens
    """
    Tx = mask_ref.shape[0]
    B = mask_ref.shape[1]
    Hh = whhf_ref.shape[0]            # encoder hidden (32)
    Hd = whhd_ref.shape[0]            # decoder hidden (64 = 2H)
    Ty = eys_ref.shape[0] // B
    f32 = jnp.float32

    # ---- hoist input projections off the recurrence (one big matmul each) ----
    xf = jnp.dot(exs_ref[...], wihf_ref[...], preferred_element_type=f32) + bf_ref[...]
    xb = jnp.dot(exs_ref[...], wihb_ref[...], preferred_element_type=f32) + bb_ref[...]
    yd = jnp.dot(eys_ref[...], wihd_ref[...], preferred_element_type=f32) + bd_ref[...]

    whhf = whhf_ref[...]
    whhb = whhb_ref[...]
    whhd = whhd_ref[...]

    # full-width gate activation: tanh on the g block, sigmoid elsewhere
    lane_e = lax.broadcasted_iota(jnp.int32, (1, 4 * Hh), 1)
    is_g_e = (lane_e >= 2 * Hh) & (lane_e < 3 * Hh)
    lane_d = lax.broadcasted_iota(jnp.int32, (1, 4 * Hd), 1)
    is_g_d = (lane_d >= 2 * Hd) & (lane_d < 3 * Hd)

    def cell(x_proj, h, c, whh, Hn, is_g):
        gates = jnp.dot(h, whh, preferred_element_type=f32) + x_proj
        act = jnp.where(is_g, jnp.tanh(gates), jax.nn.sigmoid(gates))
        i = act[:, 0 * Hn:1 * Hn]
        f = act[:, 1 * Hn:2 * Hn]
        g = act[:, 2 * Hn:3 * Hn]
        o = act[:, 3 * Hn:4 * Hn]
        c_new = f * c + i * g
        h_new = o * jnp.tanh(c_new)
        return h_new, c_new

    # ---- encoder: fwd and bwd directions interleaved, fully unrolled ----
    zero = jnp.zeros((B, Hh), f32)
    hf, cf = zero, zero
    hb, cb = zero, zero
    for t in range(Tx):
        tb = Tx - 1 - t
        mf = mask_ref[t] > 0.0        # (B, 1) bool
        mb = mask_ref[tb] > 0.0
        hfn, cfn = cell(xf[t * B:(t + 1) * B, :], hf, cf, whhf, Hh, is_g_e)
        hbn, cbn = cell(xb[tb * B:(tb + 1) * B, :], hb, cb, whhb, Hh, is_g_e)
        hf = jnp.where(mf, hfn, hf)
        cf = jnp.where(mf, cfn, cf)
        hb = jnp.where(mb, hbn, hb)
        cb = jnp.where(mb, cbn, cb)

    # concatenated bidirectional final state -> decoder initial state
    hd = jnp.concatenate([hf, hb], axis=-1)   # (B, 2H)
    cd = jnp.concatenate([cf, cb], axis=-1)

    # ---- decoder: unrolled recurrence, hiddens staged for deferred Linear ----
    for t in range(Ty):
        hd, cd = cell(yd[t * B:(t + 1) * B, :], hd, cd, whhd, Hd, is_g_d)
        h_slab[t * B:(t + 1) * B, :] = hd

    # ---- deferred output Linear: one lane-dense matmul + store ----
    logits_ref[...] = (jnp.dot(h_slab[...], wout_ref[...],
                               preferred_element_type=f32)
                       + bout_ref[...])


# ------------------------------ wrapper -------------------------------------
def _full_spec(shape):
    nd = len(shape)
    return pl.BlockSpec(shape, lambda i, _nd=nd: (0,) * _nd)


@jax.jit
def seq2seq_forward(p, xs, xls, ys_in, yls):
    """Teacher-forcing forward (the ys_in is not None branch of the module)."""
    Tx, B = xs.shape
    Ty = ys_in.shape[0]

    exs = p['emb_x'][xs].reshape(Tx * B, E_SRC)           # (Tx*B, E_SRC)
    eys = p['emb_y'][ys_in].reshape(Ty * B, E_TGT)        # (Ty*B, E_TGT)
    mask = (jnp.arange(Tx)[:, None] < xls[None, :]).astype(jnp.float32)[:, :, None]

    wout_pad = jnp.zeros((D * H, V_PAD), jnp.float32).at[:, :V_OUT].set(p['out_w'])
    bout_pad = jnp.zeros((1, V_PAD), jnp.float32).at[:, :V_OUT].set(p['out_b'])

    args = (exs, eys, mask,
            p['enc_wih_f'], p['enc_whh_f'], p['enc_b_f'],
            p['enc_wih_b'], p['enc_whh_b'], p['enc_b_b'],
            p['dec_wih'], p['dec_whh'], p['dec_b'],
            wout_pad, bout_pad)

    logits_pad = pl.pallas_call(
        seq2seq_kernel,
        out_shape=jax.ShapeDtypeStruct((Ty * B, V_PAD), jnp.float32),
        grid=(1,),
        in_specs=[_full_spec(a.shape) for a in args],
        out_specs=_full_spec((Ty * B, V_PAD)),
        scratch_shapes=[pltpu.VMEM((Ty * B, D * H), jnp.float32)],
        compiler_params=pltpu.CompilerParams(
            dimension_semantics=("arbitrary",)),
    )(*args)

    # NOTE: positions t >= yls[b] are padding (not part of the torch PackedSequence)
    return logits_pad.reshape(Ty, B, V_PAD)[:, :, :V_OUT]


# TODO(synk): the ys_in=None greedy-decoding branch (data-dependent early stop on
# PHONEME_EOS and PackedSequence output) has no clean static-shape Pallas
# equivalent; only the teacher-forcing path is implemented.


# ---------------------------- reference (pure JAX) ---------------------------
def reference_forward(p, xs, xls, ys_in, yls):
    Tx, B = xs.shape
    exs = p['emb_x'][xs]
    mask = (jnp.arange(Tx)[:, None] < xls[None, :]).astype(jnp.float32)[:, :, None]

    def cell(x, h, c, wih, whh, b, Hh):
        gates = x @ wih + h @ whh + b
        i = jax.nn.sigmoid(gates[:, 0 * Hh:1 * Hh])
        f = jax.nn.sigmoid(gates[:, 1 * Hh:2 * Hh])
        g = jnp.tanh(gates[:, 2 * Hh:3 * Hh])
        o = jax.nn.sigmoid(gates[:, 3 * Hh:4 * Hh])
        c_new = f * c + i * g
        h_new = o * jnp.tanh(c_new)
        return h_new, c_new

    h = jnp.zeros((B, H)); c = jnp.zeros((B, H))
    for t in range(Tx):
        hn, cn = cell(exs[t], h, c, p['enc_wih_f'], p['enc_whh_f'], p['enc_b_f'], H)
        m = mask[t]
        h = m * hn + (1 - m) * h
        c = m * cn + (1 - m) * c
    hf, cf = h, c

    h = jnp.zeros((B, H)); c = jnp.zeros((B, H))
    for t in range(Tx - 1, -1, -1):
        hn, cn = cell(exs[t], h, c, p['enc_wih_b'], p['enc_whh_b'], p['enc_b_b'], H)
        m = mask[t]
        h = m * hn + (1 - m) * h
        c = m * cn + (1 - m) * c
    hb, cb = h, c

    h = jnp.concatenate([hf, hb], axis=-1)
    c = jnp.concatenate([cf, cb], axis=-1)

    eys = p['emb_y'][ys_in]
    Ty = ys_in.shape[0]
    outs = []
    for t in range(Ty):
        h, c = cell(eys[t], h, c, p['dec_wih'], p['dec_whh'], p['dec_b'], D * H)
        outs.append(jnp.dot(h, p['out_w']) + p['out_b'])
    return jnp.stack(outs, axis=0)


# ------------------------------- params --------------------------------------
def init_params(key):
    ks = jax.random.split(key, 13)
    s_enc = 1.0 / float(np.sqrt(H))
    s_dec = 1.0 / float(np.sqrt(D * H))

    def u(k, shape, s):
        return jax.random.uniform(k, shape, jnp.float32, -s, s)

    p = {}
    p['emb_x'] = jax.random.normal(ks[0], (V_SRC, E_SRC), jnp.float32)
    p['emb_x'] = p['emb_x'].at[V_SRC - 1].set(0.0)     # padding_idx=-1
    p['emb_y'] = jax.random.normal(ks[1], (V_TGT, E_TGT), jnp.float32)
    p['emb_y'] = p['emb_y'].at[V_TGT - 1].set(0.0)     # padding_idx=-1
    # encoder (bidirectional): weights pre-transposed to (in, 4H); bias = b_ih + b_hh
    p['enc_wih_f'] = u(ks[2], (E_SRC, 4 * H), s_enc)
    p['enc_whh_f'] = u(ks[3], (H, 4 * H), s_enc)
    p['enc_b_f']   = u(ks[4], (1, 4 * H), s_enc)
    p['enc_wih_b'] = u(ks[5], (E_SRC, 4 * H), s_enc)
    p['enc_whh_b'] = u(ks[6], (H, 4 * H), s_enc)
    p['enc_b_b']   = u(ks[7], (1, 4 * H), s_enc)
    # decoder: hidden = D*H
    p['dec_wih'] = u(ks[8], (E_TGT, 4 * D * H), s_dec)
    p['dec_whh'] = u(ks[9], (D * H, 4 * D * H), s_dec)
    p['dec_b']   = u(ks[10], (1, 4 * D * H), s_dec)
    # output Linear(D*H, V_OUT), pre-transposed
    p['out_w'] = u(ks[11], (D * H, V_OUT), s_dec)
    p['out_b'] = u(ks[12], (1, V_OUT), s_dec)
    return p


# --------------------------------- main ---------------------------------------
if __name__ == "__main__":
    key = jax.random.PRNGKey(0)
    pkey, xkey, ykey = jax.random.split(key, 3)
    params = init_params(pkey)

    B, Tx, Ty = 2, 8, 6
    xls = jnp.array([8, 5], dtype=jnp.int32)
    yls = jnp.array([6, 4], dtype=jnp.int32)

    # source tokens, padded with the padding index (V_SRC - 1 == torch padding_idx=-1)
    xs = jax.random.randint(xkey, (Tx, B), 0, len(CHARS)).astype(jnp.int32)
    t_idx = jnp.arange(Tx)[:, None]
    xs = jnp.where(t_idx < xls[None, :], xs, V_SRC - 1)

    # target-in tokens: BOS first, then random phonemes, padded with V_TGT - 1
    ys_body = jax.random.randint(ykey, (Ty, B), 0, len(PHONEMES)).astype(jnp.int32)
    ys_in = ys_body.at[0, :].set(PHONEME_BOS)
    ty_idx = jnp.arange(Ty)[:, None]
    ys_in = jnp.where(ty_idx < yls[None, :], ys_in, V_TGT - 1)

    logits = seq2seq_forward(params, xs, xls, ys_in, yls)
    logits = jax.block_until_ready(logits)

    ref = reference_forward(params, xs, xls, ys_in, yls)
    np.testing.assert_allclose(np.asarray(logits), np.asarray(ref),
                               rtol=1e-4, atol=1e-4)
    assert logits.shape == (Ty, B, V_OUT)
    print("KERNEL_OK")
</pallas_src>

<mosaic_0001>
module attributes {stable_mosaic.version = 11 : i64} {
  func.func @seq2seq_kernel(%arg0: i32, %arg1: memref<16x16xf32, #tpu.memory_space<vmem>>, %arg2: memref<12x16xf32, #tpu.memory_space<vmem>>, %arg3: memref<8x2x1xf32, #tpu.memory_space<vmem>>, %arg4: memref<16x128xf32, #tpu.memory_space<vmem>>, %arg5: memref<32x128xf32, #tpu.memory_space<vmem>>, %arg6: memref<1x128xf32, #tpu.memory_space<vmem>>, %arg7: memref<16x128xf32, #tpu.memory_space<vmem>>, %arg8: memref<32x128xf32, #tpu.memory_space<vmem>>, %arg9: memref<1x128xf32, #tpu.memory_space<vmem>>, %arg10: memref<16x256xf32, #tpu.memory_space<vmem>>, %arg11: memref<64x256xf32, #tpu.memory_space<vmem>>, %arg12: memref<1x256xf32, #tpu.memory_space<vmem>>, %arg13: memref<64x128xf32, #tpu.memory_space<vmem>>, %arg14: memref<1x128xf32, #tpu.memory_space<vmem>>, %arg15: memref<12x128xf32, #tpu.memory_space<vmem>>, %arg16: memref<12x64xf32, #tpu.memory_space<vmem>>) attributes {dimension_semantics = [#tpu.dimension_semantics<arbitrary>], iteration_bounds = array<i64: 1>, scalar_prefetch = 0 : i64, scratch_operands = 1 : i64, tpu.core_type = #tpu.core_type<tc>, window_params = [{pipeline_mode = #tpu.pipeline_mode<synchronous>, transform_indices = @transform_0, window_bounds = array<i64: 16, 16>}, {pipeline_mode = #tpu.pipeline_mode<synchronous>, transform_indices = @transform_1, window_bounds = array<i64: 12, 16>}, {pipeline_mode = #tpu.pipeline_mode<synchronous>, transform_indices = @transform_2, window_bounds = array<i64: 8, 2, 1>}, {pipeline_mode = #tpu.pipeline_mode<synchronous>, transform_indices = @transform_3, window_bounds = array<i64: 16, 128>}, {pipeline_mode = #tpu.pipeline_mode<synchronous>, transform_indices = @transform_4, window_bounds = array<i64: 32, 128>}, {pipeline_mode = #tpu.pipeline_mode<synchronous>, transform_indices = @transform_5, window_bounds = array<i64: 1, 128>}, {pipeline_mode = #tpu.pipeline_mode<synchronous>, transform_indices = @transform_6, window_bounds = array<i64: 16, 128>}, {pipeline_mode = #tpu.pipeline_mode<synchronous>, transform_indices = @transform_7, window_bounds = array<i64: 32, 128>}, {pipeline_mode = #tpu.pipeline_mode<synchronous>, transform_indices = @transform_8, window_bounds = array<i64: 1, 128>}, {pipeline_mode = #tpu.pipeline_mode<synchronous>, transform_indices = @transform_9, window_bounds = array<i64: 16, 256>}, {pipeline_mode = #tpu.pipeline_mode<synchronous>, transform_indices = @transform_10, window_bounds = array<i64: 64, 256>}, {pipeline_mode = #tpu.pipeline_mode<synchronous>, transform_indices = @transform_11, window_bounds = array<i64: 1, 256>}, {pipeline_mode = #tpu.pipeline_mode<synchronous>, transform_indices = @transform_12, window_bounds = array<i64: 64, 128>}, {pipeline_mode = #tpu.pipeline_mode<synchronous>, transform_indices = @transform_13, window_bounds = array<i64: 1, 128>}, {pipeline_mode = #tpu.pipeline_mode<synchronous>, transform_indices = @transform_14, window_bounds = array<i64: 12, 128>}]} {
    %c0 = arith.constant 0 : index
    %c0_0 = arith.constant 0 : index
    %0 = vector.load %arg1[%c0, %c0_0] : memref<16x16xf32, #tpu.memory_space<vmem>>, vector<16x16xf32>
    %c0_1 = arith.constant 0 : index
    %c0_2 = arith.constant 0 : index
    %1 = vector.load %arg4[%c0_1, %c0_2] : memref<16x128xf32, #tpu.memory_space<vmem>>, vector<16x128xf32>
    %cst = arith.constant dense<0.000000e+00> : vector<16x128xf32>
    %2 = tpu.matmul %0, %1, %cst {dimension_numbers = #tpu.dot_dimension_numbers<[1], [0], [0], [1], [0, 0, 1, 1], [], []>} : vector<16x16xf32>, vector<16x128xf32>, vector<16x128xf32> -> vector<16x128xf32>
    %c0_3 = arith.constant 0 : index
    %c0_4 = arith.constant 0 : index
    %3 = vector.load %arg6[%c0_3, %c0_4] : memref<1x128xf32, #tpu.memory_space<vmem>>, vector<1x128xf32>
    %4 = vector.broadcast %3 : vector<1x128xf32> to vector<16x128xf32>
    %5 = arith.addf %2, %4 : vector<16x128xf32>
    %c0_5 = arith.constant 0 : index
    %c0_6 = arith.constant 0 : index
    %6 = vector.load %arg1[%c0_5, %c0_6] : memref<16x16xf32, #tpu.memory_space<vmem>>, vector<16x16xf32>
    %c0_7 = arith.constant 0 : index
    %c0_8 = arith.constant 0 : index
    %7 = vector.load %arg7[%c0_7, %c0_8] : memref<16x128xf32, #tpu.memory_space<vmem>>, vector<16x128xf32>
    %cst_9 = arith.constant dense<0.000000e+00> : vector<16x128xf32>
    %8 = tpu.matmul %6, %7, %cst_9 {dimension_numbers = #tpu.dot_dimension_numbers<[1], [0], [0], [1], [0, 0, 1, 1], [], []>} : vector<16x16xf32>, vector<16x128xf32>, vector<16x128xf32> -> vector<16x128xf32>
    %c0_10 = arith.constant 0 : index
    %c0_11 = arith.constant 0 : index
    %9 = vector.load %arg9[%c0_10, %c0_11] : memref<1x128xf32, #tpu.memory_space<vmem>>, vector<1x128xf32>
    %10 = vector.broadcast %9 : vector<1x128xf32> to vector<16x128xf32>
    %11 = arith.addf %8, %10 : vector<16x128xf32>
    %c0_12 = arith.constant 0 : index
    %c0_13 = arith.constant 0 : index
    %12 = vector.load %arg2[%c0_12, %c0_13] : memref<12x16xf32, #tpu.memory_space<vmem>>, vector<12x16xf32>
    %c0_14 = arith.constant 0 : index
    %c0_15 = arith.constant 0 : index
    %13 = vector.load %arg10[%c0_14, %c0_15] : memref<16x256xf32, #tpu.memory_space<vmem>>, vector<16x256xf32>
    %cst_16 = arith.constant dense<0.000000e+00> : vector<12x256xf32>
    %14 = tpu.matmul %12, %13, %cst_16 {dimension_numbers = #tpu.dot_dimension_numbers<[1], [0], [0], [1], [0, 0, 1, 1], [], []>} : vector<12x16xf32>, vector<16x256xf32>, vector<12x256xf32> -> vector<12x256xf32>
    %c0_17 = arith.constant 0 : index
    %c0_18 = arith.constant 0 : index
    %15 = vector.load %arg12[%c0_17, %c0_18] : memref<1x256xf32, #tpu.memory_space<vmem>>, vector<1x256xf32>
    %16 = vector.broadcast %15 : vector<1x256xf32> to vector<12x256xf32>
    %17 = arith.addf %14, %16 : vector<12x256xf32>
    %c0_19 = arith.constant 0 : index
    %c0_20 = arith.constant 0 : index
    %18 = vector.load %arg5[%c0_19, %c0_20] : memref<32x128xf32, #tpu.memory_space<vmem>>, vector<32x128xf32>
    %c0_21 = arith.constant 0 : index
    %c0_22 = arith.constant 0 : index
    %19 = vector.load %arg8[%c0_21, %c0_22] : memref<32x128xf32, #tpu.memory_space<vmem>>, vector<32x128xf32>
    %c0_23 = arith.constant 0 : index
    %c0_24 = arith.constant 0 : index
    %20 = vector.load %arg11[%c0_23, %c0_24] : memref<64x256xf32, #tpu.memory_space<vmem>>, vector<64x256xf32>
    %21 = tpu.iota {dimensions = array<i32: 1>} : vector<1x128xi32>
    %c64_i32 = arith.constant 64 : i32
    %22 = vector.broadcast %c64_i32 : i32 to vector<1x128xi32>
    %23 = arith.cmpi sge, %21, %22 : vector<1x128xi32>
    %c96_i32 = arith.constant 96 : i32
    %24 = vector.broadcast %c96_i32 : i32 to vector<1x128xi32>
    %25 = arith.cmpi slt, %21, %24 : vector<1x128xi32>
    %26 = arith.andi %23, %25 : vector<1x128xi1>
    %27 = tpu.iota {dimensions = array<i32: 1>} : vector<1x256xi32>
    %c128_i32 = arith.constant 128 : i32
    %28 = vector.broadcast %c128_i32 : i32 to vector<1x256xi32>
    %29 = arith.cmpi sge, %27, %28 : vector<1x256xi32>
    %c192_i32 = arith.constant 192 : i32
    %30 = vector.broadcast %c192_i32 : i32 to vector<1x256xi32>
    %31 = arith.cmpi slt, %27, %30 : vector<1x256xi32>
    %32 = arith.andi %29, %31 : vector<1x256xi1>
    %cst_25 = arith.constant 0.000000e+00 : f32
    %33 = vector.broadcast %cst_25 : f32 to vector<2x32xf32>
    %c0_26 = arith.constant 0 : index
    %c0_27 = arith.constant 0 : index
    %c0_28 = arith.constant 0 : index
    %34 = vector.load %arg3[%c0_26, %c0_27, %c0_28] : memref<8x2x1xf32, #tpu.memory_space<vmem>>, vector<1x2x1xf32>
    %35 = vector.shape_cast %34 : vector<1x2x1xf32> to vector<2x1xf32>
    %cst_29 = arith.constant 0.000000e+00 : f32
    %36 = vector.broadcast %cst_29 : f32 to vector<2x1xf32>
    %37 = arith.cmpf ogt, %35, %36 : vector<2x1xf32>
    %c7 = arith.constant 7 : index
    %c0_30 = arith.constant 0 : index
    %c0_31 = arith.constant 0 : index
    %38 = vector.load %arg3[%c7, %c0_30, %c0_31] : memref<8x2x1xf32, #tpu.memory_space<vmem>>, vector<1x2x1xf32>
    %39 = vector.shape_cast %38 : vector<1x2x1xf32> to vector<2x1xf32>
    %cst_32 = arith.constant 0.000000e+00 : f32
    %40 = vector.broadcast %cst_32 : f32 to vector<2x1xf32>
    %41 = arith.cmpf ogt, %39, %40 : vector<2x1xf32>
    %42 = vector.extract_strided_slice %5 {offsets = [0, 0], sizes = [2, 128], strides = [1, 1]} : vector<16x128xf32> to vector<2x128xf32>
    %cst_33 = arith.constant dense<0.000000e+00> : vector<2x128xf32>
    %43 = tpu.matmul %33, %18, %cst_33 {dimension_numbers = #tpu.dot_dimension_numbers<[1], [0], [0], [1], [0, 0, 1, 1], [], []>} : vector<2x32xf32>, vector<32x128xf32>, vector<2x128xf32> -> vector<2x128xf32>
    %44 = arith.addf %43, %42 : vector<2x128xf32>
    %45 = math.tanh %44 : vector<2x128xf32>
    %46 = arith.negf %44 : vector<2x128xf32>
    %47 = math.exp %46 : vector<2x128xf32>
    %cst_34 = arith.constant 1.000000e+00 : f32
    %48 = vector.broadcast %cst_34 : f32 to vector<2x128xf32>
    %49 = arith.addf %48, %47 : vector<2x128xf32>
    %50 = arith.divf %48, %49 : vector<2x128xf32>
    %51 = vector.shape_cast %26 : vector<1x128xi1> to vector<1x128xi1>
    %52 = vector.broadcast %51 : vector<1x128xi1> to vector<2x128xi1>
    %53 = arith.select %52, %45, %50 : vector<2x128xi1>, vector<2x128xf32>
    %54 = vector.extract_strided_slice %53 {offsets = [0, 0], sizes = [2, 32], strides = [1, 1]} : vector<2x128xf32> to vector<2x32xf32>
    %55 = vector.extract_strided_slice %53 {offsets = [0, 32], sizes = [2, 32], strides = [1, 1]} : vector<2x128xf32> to vector<2x32xf32>
    %56 = vector.extract_strided_slice %53 {offsets = [0, 64], sizes = [2, 32], strides = [1, 1]} : vector<2x128xf32> to vector<2x32xf32>
    %57 = vector.extract_strided_slice %53 {offsets = [0, 96], sizes = [2, 32], strides = [1, 1]} : vector<2x128xf32> to vector<2x32xf32>
    %58 = arith.mulf %55, %33 : vector<2x32xf32>
    %59 = arith.mulf %54, %56 : vector<2x32xf32>
    %60 = arith.addf %58, %59 : vector<2x32xf32>
    %61 = math.tanh %60 : vector<2x32xf32>
    %62 = arith.mulf %57, %61 : vector<2x32xf32>
    %63 = vector.extract_strided_slice %11 {offsets = [14, 0], sizes = [2, 128], strides = [1, 1]} : vector<16x128xf32> to vector<2x128xf32>
    %cst_35 = arith.constant dense<0.000000e+00> : vector<2x128xf32>
    %64 = tpu.matmul %33, %19, %cst_35 {dimension_numbers = #tpu.dot_dimension_numbers<[1], [0], [0], [1], [0, 0, 1, 1], [], []>} : vector<2x32xf32>, vector<32x128xf32>, vector<2x128xf32> -> vector<2x128xf32>
    %65 = arith.addf %64, %63 : vector<2x128xf32>
    %66 = math.tanh %65 : vector<2x128xf32>
    %67 = arith.negf %65 : vector<2x128xf32>
    %68 = math.exp %67 : vector<2x128xf32>
    %cst_36 = arith.constant 1.000000e+00 : f32
    %69 = vector.broadcast %cst_36 : f32 to vector<2x128xf32>
    %70 = arith.addf %69, %68 : vector<2x128xf32>
    %71 = arith.divf %69, %70 : vector<2x128xf32>
    %72 = vector.shape_cast %26 : vector<1x128xi1> to vector<1x128xi1>
    %73 = vector.broadcast %72 : vector<1x128xi1> to vector<2x128xi1>
    %74 = arith.select %73, %66, %71 : vector<2x128xi1>, vector<2x128xf32>
    %75 = vector.extract_strided_slice %74 {offsets = [0, 0], sizes = [2, 32], strides = [1, 1]} : vector<2x128xf32> to vector<2x32xf32>
    %76 = vector.extract_strided_slice %74 {offsets = [0, 32], sizes = [2, 32], strides = [1, 1]} : vector<2x128xf32> to vector<2x32xf32>
    %77 = vector.extract_strided_slice %74 {offsets = [0, 64], sizes = [2, 32], strides = [1, 1]} : vector<2x128xf32> to vector<2x32xf32>
    %78 = vector.extract_strided_slice %74 {offsets = [0, 96], sizes = [2, 32], strides = [1, 1]} : vector<2x128xf32> to vector<2x32xf32>
    %79 = arith.mulf %76, %33 : vector<2x32xf32>
    %80 = arith.mulf %75, %77 : vector<2x32xf32>
    %81 = arith.addf %79, %80 : vector<2x32xf32>
    %82 = math.tanh %81 : vector<2x32xf32>
    %83 = arith.mulf %78, %82 : vector<2x32xf32>
    %84 = vector.shape_cast %37 : vector<2x1xi1> to vector<2x1xi1>
    %85 = vector.broadcast %84 : vector<2x1xi1> to vector<2x32xi1>
    %86 = arith.select %85, %62, %33 : vector<2x32xi1>, vector<2x32xf32>
    %87 = vector.shape_cast %37 : vector<2x1xi1> to vector<2x1xi1>
    %88 = vector.broadcast %87 : vector<2x1xi1> to vector<2x32xi1>
    %89 = arith.select %88, %60, %33 : vector<2x32xi1>, vector<2x32xf32>
    %90 = vector.shape_cast %41 : vector<2x1xi1> to vector<2x1xi1>
    %91 = vector.broadcast %90 : vector<2x1xi1> to vector<2x32xi1>
    %92 = arith.select %91, %83, %33 : vector<2x32xi1>, vector<2x32xf32>
    %93 = vector.shape_cast %41 : vector<2x1xi1> to vector<2x1xi1>
    %94 = vector.broadcast %93 : vector<2x1xi1> to vector<2x32xi1>
    %95 = arith.select %94, %81, %33 : vector<2x32xi1>, vector<2x32xf32>
    %c1 = arith.constant 1 : index
    %c0_37 = arith.constant 0 : index
    %c0_38 = arith.constant 0 : index
    %96 = vector.load %arg3[%c1, %c0_37, %c0_38] : memref<8x2x1xf32, #tpu.memory_space<vmem>>, vector<1x2x1xf32>
    %97 = vector.shape_cast %96 : vector<1x2x1xf32> to vector<2x1xf32>
    %cst_39 = arith.constant 0.000000e+00 : f32
    %98 = vector.broadcast %cst_39 : f32 to vector<2x1xf32>
    %99 = arith.cmpf ogt, %97, %98 : vector<2x1xf32>
    %c6 = arith.constant 6 : index
    %c0_40 = arith.constant 0 : index
    %c0_41 = arith.constant 0 : index
    %100 = vector.load %arg3[%c6, %c0_40, %c0_41] : memref<8x2x1xf32, #tpu.memory_space<vmem>>, vector<1x2x1xf32>
    %101 = vector.shape_cast %100 : vector<1x2x1xf32> to vector<2x1xf32>
    %cst_42 = arith.constant 0.000000e+00 : f32
    %102 = vector.broadcast %cst_42 : f32 to vector<2x1xf32>
    %103 = arith.cmpf ogt, %101, %102 : vector<2x1xf32>
    %104 = vector.extract_strided_slice %5 {offsets = [2, 0], sizes = [2, 128], strides = [1, 1]} : vector<16x128xf32> to vector<2x128xf32>
    %cst_43 = arith.constant dense<0.000000e+00> : vector<2x128xf32>
    %105 = tpu.matmul %86, %18, %cst_43 {dimension_numbers = #tpu.dot_dimension_numbers<[1], [0], [0], [1], [0, 0, 1, 1], [], []>} : vector<2x32xf32>, vector<32x128xf32>, vector<2x128xf32> -> vector<2x128xf32>
    %106 = arith.addf %105, %104 : vector<2x128xf32>
    %107 = math.tanh %106 : vector<2x128xf32>
    %108 = arith.negf %106 : vector<2x128xf32>
    %109 = math.exp %108 : vector<2x128xf32>
    %cst_44 = arith.constant 1.000000e+00 : f32
    %110 = vector.broadcast %cst_44 : f32 to vector<2x128xf32>
    %111 = arith.addf %110, %109 : vector<2x128xf32>
    %112 = arith.divf %110, %111 : vector<2x128xf32>
    %113 = vector.shape_cast %26 : vector<1x128xi1> to vector<1x128xi1>
    %114 = vector.broadcast %113 : vector<1x128xi1> to vector<2x128xi1>
    %115 = arith.select %114, %107, %112 : vector<2x128xi1>, vector<2x128xf32>
    %116 = vector.extract_strided_slice %115 {offsets = [0, 0], sizes = [2, 32], strides = [1, 1]} : vector<2x128xf32> to vector<2x32xf32>
    %117 = vector.extract_strided_slice %115 {offsets = [0, 32], sizes = [2, 32], strides = [1, 1]} : vector<2x128xf32> to vector<2x32xf32>
    %118 = vector.extract_strided_slice %115 {offsets = [0, 64], sizes = [2, 32], strides = [1, 1]} : vector<2x128xf32> to vector<2x32xf32>
    %119 = vector.extract_strided_slice %115 {offsets = [0, 96], sizes = [2, 32], strides = [1, 1]} : vector<2x128xf32> to vector<2x32xf32>
    %120 = arith.mulf %117, %89 : vector<2x32xf32>
    %121 = arith.mulf %116, %118 : vector<2x32xf32>
    %122 = arith.addf %120, %121 : vector<2x32xf32>
    %123 = math.tanh %122 : vector<2x32xf32>
    %124 = arith.mulf %119, %123 : vector<2x32xf32>
    %125 = vector.extract_strided_slice %11 {offsets = [12, 0], sizes = [2, 128], strides = [1, 1]} : vector<16x128xf32> to vector<2x128xf32>
    %cst_45 = arith.constant dense<0.000000e+00> : vector<2x128xf32>
    %126 = tpu.matmul %92, %19, %cst_45 {dimension_numbers = #tpu.dot_dimension_numbers<[1], [0], [0], [1], [0, 0, 1, 1], [], []>} : vector<2x32xf32>, vector<32x128xf32>, vector<2x128xf32> -> vector<2x128xf32>
    %127 = arith.addf %126, %125 : vector<2x128xf32>
    %128 = math.tanh %127 : vector<2x128xf32>
    %129 = arith.negf %127 : vector<2x128xf32>
    %130 = math.exp %129 : vector<2x128xf32>
    %cst_46 = arith.constant 1.000000e+00 : f32
    %131 = vector.broadcast %cst_46 : f32 to vector<2x128xf32>
    %132 = arith.addf %131, %130 : vector<2x128xf32>
    %133 = arith.divf %131, %132 : vector<2x128xf32>
    %134 = vector.shape_cast %26 : vector<1x128xi1> to vector<1x128xi1>
    %135 = vector.broadcast %134 : vector<1x128xi1> to vector<2x128xi1>
    %136 = arith.select %135, %128, %133 : vector<2x128xi1>, vector<2x128xf32>
    %137 = vector.extract_strided_slice %136 {offsets = [0, 0], sizes = [2, 32], strides = [1, 1]} : vector<2x128xf32> to vector<2x32xf32>
    %138 = vector.extract_strided_slice %136 {offsets = [0, 32], sizes = [2, 32], strides = [1, 1]} : vector<2x128xf32> to vector<2x32xf32>
    %139 = vector.extract_strided_slice %136 {offsets = [0, 64], sizes = [2, 32], strides = [1, 1]} : vector<2x128xf32> to vector<2x32xf32>
    %140 = vector.extract_strided_slice %136 {offsets = [0, 96], sizes = [2, 32], strides = [1, 1]} : vector<2x128xf32> to vector<2x32xf32>
    %141 = arith.mulf %138, %95 : vector<2x32xf32>
    %142 = arith.mulf %137, %139 : vector<2x32xf32>
    %143 = arith.addf %141, %142 : vector<2x32xf32>
    %144 = math.tanh %143 : vector<2x32xf32>
    %145 = arith.mulf %140, %144 : vector<2x32xf32>
    %146 = vector.shape_cast %99 : vector<2x1xi1> to vector<2x1xi1>
    %147 = vector.broadcast %146 : vector<2x1xi1> to vector<2x32xi1>
    %148 = arith.select %147, %124, %86 : vector<2x32xi1>, vector<2x32xf32>
    %149 = vector.shape_cast %99 : vector<2x1xi1> to vector<2x1xi1>
    %150 = vector.broadcast %149 : vector<2x1xi1> to vector<2x32xi1>
    %151 = arith.select %150, %122, %89 : vector<2x32xi1>, vector<2x32xf32>
    %152 = vector.shape_cast %103 : vector<2x1xi1> to vector<2x1xi1>
    %153 = vector.broadcast %152 : vector<2x1xi1> to vector<2x32xi1>
    %154 = arith.select %153, %145, %92 : vector<2x32xi1>, vector<2x32xf32>
    %155 = vector.shape_cast %103 : vector<2x1xi1> to vector<2x1xi1>
    %156 = vector.broadcast %155 : vector<2x1xi1> to vector<2x32xi1>
    %157 = arith.select %156, %143, %95 : vector<2x32xi1>, vector<2x32xf32>
    %c2 = arith.constant 2 : index
    %c0_47 = arith.constant 0 : index
    %c0_48 = arith.constant 0 : index
    %158 = vector.load %arg3[%c2, %c0_47, %c0_48] : memref<8x2x1xf32, #tpu.memory_space<vmem>>, vector<1x2x1xf32>
    %159 = vector.shape_cast %158 : vector<1x2x1xf32> to vector<2x1xf32>
    %cst_49 = arith.constant 0.000000e+00 : f32
    %160 = vector.broadcast %cst_49 : f32 to vector<2x1xf32>
    %161 = arith.cmpf ogt, %159, %160 : vector<2x1xf32>
    %c5 = arith.constant 5 : index
    %c0_50 = arith.constant 0 : index
    %c0_51 = arith.constant 0 : index
    %162 = vector.load %arg3[%c5, %c0_50, %c0_51] : memref<8x2x1xf32, #tpu.memory_space<vmem>>, vector<1x2x1xf32>
    %163 = vector.shape_cast %162 : vector<1x2x1xf32> to vector<2x1xf32>
    %cst_52 = arith.constant 0.000000e+00 : f32
    %164 = vector.broadcast %cst_52 : f32 to vector<2x1xf32>
    %165 = arith.cmpf ogt, %163, %164 : vector<2x1xf32>
    %166 = vector.extract_strided_slice %5 {offsets = [4, 0], sizes = [2, 128], strides = [1, 1]} : vector<16x128xf32> to vector<2x128xf32>
    %cst_53 = arith.constant dense<0.000000e+00> : vector<2x128xf32>
    %167 = tpu.matmul %148, %18, %cst_53 {dimension_numbers = #tpu.dot_dimension_numbers<[1], [0], [0], [1], [0, 0, 1, 1], [], []>} : vector<2x32xf32>, vector<32x128xf32>, vector<2x128xf32> -> vector<2x128xf32>
    %168 = arith.addf %167, %166 : vector<2x128xf32>
    %169 = math.tanh %168 : vector<2x128xf32>
    %170 = arith.negf %168 : vector<2x128xf32>
    %171 = math.exp %170 : vector<2x128xf32>
    %cst_54 = arith.constant 1.000000e+00 : f32
    %172 = vector.broadcast %cst_54 : f32 to vector<2x128xf32>
    %173 = arith.addf %172, %171 : vector<2x128xf32>
    %174 = arith.divf %172, %173 : vector<2x128xf32>
    %175 = vector.shape_cast %26 : vector<1x128xi1> to vector<1x128xi1>
    %176 = vector.broadcast %175 : vector<1x128xi1> to vector<2x128xi1>
    %177 = arith.select %176, %169, %174 : vector<2x128xi1>, vector<2x128xf32>
    %178 = vector.extract_strided_slice %177 {offsets = [0, 0], sizes = [2, 32], strides = [1, 1]} : vector<2x128xf32> to vector<2x32xf32>
    %179 = vector.extract_strided_slice %177 {offsets = [0, 32], sizes = [2, 32], strides = [1, 1]} : vector<2x128xf32> to vector<2x32xf32>
    %180 = vector.extract_strided_slice %177 {offsets = [0, 64], sizes = [2, 32], strides = [1, 1]} : vector<2x128xf32> to vector<2x32xf32>
    %181 = vector.extract_strided_slice %177 {offsets = [0, 96], sizes = [2, 32], strides = [1, 1]} : vector<2x128xf32> to vector<2x32xf32>
    %182 = arith.mulf %179, %151 : vector<2x32xf32>
    %183 = arith.mulf %178, %180 : vector<2x32xf32>
    %184 = arith.addf %182, %183 : vector<2x32xf32>
    %185 = math.tanh %184 : vector<2x32xf32>
    %186 = arith.mulf %181, %185 : vector<2x32xf32>
    %187 = vector.extract_strided_slice %11 {offsets = [10, 0], sizes = [2, 128], strides = [1, 1]} : vector<16x128xf32> to vector<2x128xf32>
    %cst_55 = arith.constant dense<0.000000e+00> : vector<2x128xf32>
    %188 = tpu.matmul %154, %19, %cst_55 {dimension_numbers = #tpu.dot_dimension_numbers<[1], [0], [0], [1], [0, 0, 1, 1], [], []>} : vector<2x32xf32>, vector<32x128xf32>, vector<2x128xf32> -> vector<2x128xf32>
    %189 = arith.addf %188, %187 : vector<2x128xf32>
    %190 = math.tanh %189 : vector<2x128xf32>
    %191 = arith.negf %189 : vector<2x128xf32>
    %192 = math.exp %191 : vector<2x128xf32>
    %cst_56 = arith.constant 1.000000e+00 : f32
    %193 = vector.broadcast %cst_56 : f32 to vector<2x128xf32>
    %194 = arith.addf %193, %192 : vector<2x128xf32>
    %195 = arith.divf %193, %194 : vector<2x128xf32>
    %196 = vector.shape_cast %26 : vector<1x128xi1> to vector<1x128xi1>
    %197 = vector.broadcast %196 : vector<1x128xi1> to vector<2x128xi1>
    %198 = arith.select %197, %190, %195 : vector<2x128xi1>, vector<2x128xf32>
    %199 = vector.extract_strided_slice %198 {offsets = [0, 0], sizes = [2, 32], strides = [1, 1]} : vector<2x128xf32> to vector<2x32xf32>
    %200 = vector.extract_strided_slice %198 {offsets = [0, 32], sizes = [2, 32], strides = [1, 1]} : vector<2x128xf32> to vector<2x32xf32>
    %201 = vector.extract_strided_slice %198 {offsets = [0, 64], sizes = [2, 32], strides = [1, 1]} : vector<2x128xf32> to vector<2x32xf32>
    %202 = vector.extract_strided_slice %198 {offsets = [0, 96], sizes = [2, 32], strides = [1, 1]} : vector<2x128xf32> to vector<2x32xf32>
    %203 = arith.mulf %200, %157 : vector<2x32xf32>
    %204 = arith.mulf %199, %201 : vector<2x32xf32>
    %205 = arith.addf %203, %204 : vector<2x32xf32>
    %206 = math.tanh %205 : vector<2x32xf32>
    %207 = arith.mulf %202, %206 : vector<2x32xf32>
    %208 = vector.shape_cast %161 : vector<2x1xi1> to vector<2x1xi1>
    %209 = vector.broadcast %208 : vector<2x1xi1> to vector<2x32xi1>
    %210 = arith.select %209, %186, %148 : vector<2x32xi1>, vector<2x32xf32>
    %211 = vector.shape_cast %161 : vector<2x1xi1> to vector<2x1xi1>
    %212 = vector.broadcast %211 : vector<2x1xi1> to vector<2x32xi1>
    %213 = arith.select %212, %184, %151 : vector<2x32xi1>, vector<2x32xf32>
    %214 = vector.shape_cast %165 : vector<2x1xi1> to vector<2x1xi1>
    %215 = vector.broadcast %214 : vector<2x1xi1> to vector<2x32xi1>
    %216 = arith.select %215, %207, %154 : vector<2x32xi1>, vector<2x32xf32>
    %217 = vector.shape_cast %165 : vector<2x1xi1> to vector<2x1xi1>
    %218 = vector.broadcast %217 : vector<2x1xi1> to vector<2x32xi1>
    %219 = arith.select %218, %205, %157 : vector<2x32xi1>, vector<2x32xf32>
    %c3 = arith.constant 3 : index
    %c0_57 = arith.constant 0 : index
    %c0_58 = arith.constant 0 : index
    %220 = vector.load %arg3[%c3, %c0_57, %c0_58] : memref<8x2x1xf32, #tpu.memory_space<vmem>>, vector<1x2x1xf32>
    %221 = vector.shape_cast %220 : vector<1x2x1xf32> to vector<2x1xf32>
    %cst_59 = arith.constant 0.000000e+00 : f32
    %222 = vector.broadcast %cst_59 : f32 to vector<2x1xf32>
    %223 = arith.cmpf ogt, %221, %222 : vector<2x1xf32>
    %c4 = arith.constant 4 : index
    %c0_60 = arith.constant 0 : index
    %c0_61 = arith.constant 0 : index
    %224 = vector.load %arg3[%c4, %c0_60, %c0_61] : memref<8x2x1xf32, #tpu.memory_space<vmem>>, vector<1x2x1xf32>
    %225 = vector.shape_cast %224 : vector<1x2x1xf32> to vector<2x1xf32>
    %cst_62 = arith.constant 0.000000e+00 : f32
    %226 = vector.broadcast %cst_62 : f32 to vector<2x1xf32>
    %227 = arith.cmpf ogt, %225, %226 : vector<2x1xf32>
    %228 = vector.extract_strided_slice %5 {offsets = [6, 0], sizes = [2, 128], strides = [1, 1]} : vector<16x128xf32> to vector<2x128xf32>
    %cst_63 = arith.constant dense<0.000000e+00> : vector<2x128xf32>
    %229 = tpu.matmul %210, %18, %cst_63 {dimension_numbers = #tpu.dot_dimension_numbers<[1], [0], [0], [1], [0, 0, 1, 1], [], []>} : vector<2x32xf32>, vector<32x128xf32>, vector<2x128xf32> -> vector<2x128xf32>
    %230 = arith.addf %229, %228 : vector<2x128xf32>
    %231 = math.tanh %230 : vector<2x128xf32>
    %232 = arith.negf %230 : vector<2x128xf32>
    %233 = math.exp %232 : vector<2x128xf32>
    %cst_64 = arith.constant 1.000000e+00 : f32
    %234 = vector.broadcast %cst_64 : f32 to vector<2x128xf32>
    %235 = arith.addf %234, %233 : vector<2x128xf32>
    %236 = arith.divf %234, %235 : vector<2x128xf32>
    %237 = vector.shape_cast %26 : vector<1x128xi1> to vector<1x128xi1>
    %238 = vector.broadcast %237 : vector<1x128xi1> to vector<2x128xi1>
    %239 = arith.select %238, %231, %236 : vector<2x128xi1>, vector<2x128xf32>
    %240 = vector.extract_strided_slice %239 {offsets = [0, 0], sizes = [2, 32], strides = [1, 1]} : vector<2x128xf32> to vector<2x32xf32>
    %241 = vector.extract_strided_slice %239 {offsets = [0, 32], sizes = [2, 32], strides = [1, 1]} : vector<2x128xf32> to vector<2x32xf32>
    %242 = vector.extract_strided_slice %239 {offsets = [0, 64], sizes = [2, 32], strides = [1, 1]} : vector<2x128xf32> to vector<2x32xf32>
    %243 = vector.extract_strided_slice %239 {offsets = [0, 96], sizes = [2, 32], strides = [1, 1]} : vector<2x128xf32> to vector<2x32xf32>
    %244 = arith.mulf %241, %213 : vector<2x32xf32>
    %245 = arith.mulf %240, %242 : vector<2x32xf32>
    %246 = arith.addf %244, %245 : vector<2x32xf32>
    %247 = math.tanh %246 : vector<2x32xf32>
    %248 = arith.mulf %243, %247 : vector<2x32xf32>
    %249 = vector.extract_strided_slice %11 {offsets = [8, 0], sizes = [2, 128], strides = [1, 1]} : vector<16x128xf32> to vector<2x128xf32>
    %cst_65 = arith.constant dense<0.000000e+00> : vector<2x128xf32>
    %250 = tpu.matmul %216, %19, %cst_65 {dimension_numbers = #tpu.dot_dimension_numbers<[1], [0], [0], [1], [0, 0, 1, 1], [], []>} : vector<2x32xf32>, vector<32x128xf32>, vector<2x128xf32> -> vector<2x128xf32>
    %251 = arith.addf %250, %249 : vector<2x128xf32>
    %252 = math.tanh %251 : vector<2x128xf32>
    %253 = arith.negf %251 : vector<2x128xf32>
    %254 = math.exp %253 : vector<2x128xf32>
    %cst_66 = arith.constant 1.000000e+00 : f32
    %255 = vector.broadcast %cst_66 : f32 to vector<2x128xf32>
    %256 = arith.addf %255, %254 : vector<2x128xf32>
    %257 = arith.divf %255, %256 : vector<2x128xf32>
    %258 = vector.shape_cast %26 : vector<1x128xi1> to vector<1x128xi1>
    %259 = vector.broadcast %258 : vector<1x128xi1> to vector<2x128xi1>
    %260 = arith.select %259, %252, %257 : vector<2x128xi1>, vector<2x128xf32>
    %261 = vector.extract_strided_slice %260 {offsets = [0, 0], sizes = [2, 32], strides = [1, 1]} : vector<2x128xf32> to vector<2x32xf32>
    %262 = vector.extract_strided_slice %260 {offsets = [0, 32], sizes = [2, 32], strides = [1, 1]} : vector<2x128xf32> to vector<2x32xf32>
    %263 = vector.extract_strided_slice %260 {offsets = [0, 64], sizes = [2, 32], strides = [1, 1]} : vector<2x128xf32> to vector<2x32xf32>
    %264 = vector.extract_strided_slice %260 {offsets = [0, 96], sizes = [2, 32], strides = [1, 1]} : vector<2x128xf32> to vector<2x32xf32>
    %265 = arith.mulf %262, %219 : vector<2x32xf32>
    %266 = arith.mulf %261, %263 : vector<2x32xf32>
    %267 = arith.addf %265, %266 : vector<2x32xf32>
    %268 = math.tanh %267 : vector<2x32xf32>
    %269 = arith.mulf %264, %268 : vector<2x32xf32>
    %270 = vector.shape_cast %223 : vector<2x1xi1> to vector<2x1xi1>
    %271 = vector.broadcast %270 : vector<2x1xi1> to vector<2x32xi1>
    %272 = arith.select %271, %248, %210 : vector<2x32xi1>, vector<2x32xf32>
    %273 = vector.shape_cast %223 : vector<2x1xi1> to vector<2x1xi1>
    %274 = vector.broadcast %273 : vector<2x1xi1> to vector<2x32xi1>
    %275 = arith.select %274, %246, %213 : vector<2x32xi1>, vector<2x32xf32>
    %276 = vector.shape_cast %227 : vector<2x1xi1> to vector<2x1xi1>
    %277 = vector.broadcast %276 : vector<2x1xi1> to vector<2x32xi1>
    %278 = arith.select %277, %269, %216 : vector<2x32xi1>, vector<2x32xf32>
    %279 = vector.shape_cast %227 : vector<2x1xi1> to vector<2x1xi1>
    %280 = vector.broadcast %279 : vector<2x1xi1> to vector<2x32xi1>
    %281 = arith.select %280, %267, %219 : vector<2x32xi1>, vector<2x32xf32>
    %c4_67 = arith.constant 4 : index
    %c0_68 = arith.constant 0 : index
    %c0_69 = arith.constant 0 : index
    %282 = vector.load %arg3[%c4_67, %c0_68, %c0_69] : memref<8x2x1xf32, #tpu.memory_space<vmem>>, vector<1x2x1xf32>
    %283 = vector.shape_cast %282 : vector<1x2x1xf32> to vector<2x1xf32>
    %cst_70 = arith.constant 0.000000e+00 : f32
    %284 = vector.broadcast %cst_70 : f32 to vector<2x1xf32>
    %285 = arith.cmpf ogt, %283, %284 : vector<2x1xf32>
    %c3_71 = arith.constant 3 : index
    %c0_72 = arith.constant 0 : index
    %c0_73 = arith.constant 0 : index
    %286 = vector.load %arg3[%c3_71, %c0_72, %c0_73] : memref<8x2x1xf32, #tpu.memory_space<vmem>>, vector<1x2x1xf32>
    %287 = vector.shape_cast %286 : vector<1x2x1xf32> to vector<2x1xf32>
    %cst_74 = arith.constant 0.000000e+00 : f32
    %288 = vector.broadcast %cst_74 : f32 to vector<2x1xf32>
    %289 = arith.cmpf ogt, %287, %288 : vector<2x1xf32>
    %290 = vector.extract_strided_slice %5 {offsets = [8, 0], sizes = [2, 128], strides = [1, 1]} : vector<16x128xf32> to vector<2x128xf32>
    %cst_75 = arith.constant dense<0.000000e+00> : vector<2x128xf32>
    %291 = tpu.matmul %272, %18, %cst_75 {dimension_numbers = #tpu.dot_dimension_numbers<[1], [0], [0], [1], [0, 0, 1, 1], [], []>} : vector<2x32xf32>, vector<32x128xf32>, vector<2x128xf32> -> vector<2x128xf32>
    %292 = arith.addf %291, %290 : vector<2x128xf32>
    %293 = math.tanh %292 : vector<2x128xf32>
    %294 = arith.negf %292 : vector<2x128xf32>
    %295 = math.exp %294 : vector<2x128xf32>
    %cst_76 = arith.constant 1.000000e+00 : f32
    %296 = vector.broadcast %cst_76 : f32 to vector<2x128xf32>
    %297 = arith.addf %296, %295 : vector<2x128xf32>
    %298 = arith.divf %296, %297 : vector<2x128xf32>
    %299 = vector.shape_cast %26 : vector<1x128xi1> to vector<1x128xi1>
    %300 = vector.broadcast %299 : vector<1x128xi1> to vector<2x128xi1>
    %301 = arith.select %300, %293, %298 : vector<2x128xi1>, vector<2x128xf32>
    %302 = vector.extract_strided_slice %301 {offsets = [0, 0], sizes = [2, 32], strides = [1, 1]} : vector<2x128xf32> to vector<2x32xf32>
    %303 = vector.extract_strided_slice %301 {offsets = [0, 32], sizes = [2, 32], strides = [1, 1]} : vector<2x128xf32> to vector<2x32xf32>
    %304 = vector.extract_strided_slice %301 {offsets = [0, 64], sizes = [2, 32], strides = [1, 1]} : vector<2x128xf32> to vector<2x32xf32>
    %305 = vector.extract_strided_slice %301 {offsets = [0, 96], sizes = [2, 32], strides = [1, 1]} : vector<2x128xf32> to vector<2x32xf32>
    %306 = arith.mulf %303, %275 : vector<2x32xf32>
    %307 = arith.mulf %302, %304 : vector<2x32xf32>
    %308 = arith.addf %306, %307 : vector<2x32xf32>
    %309 = math.tanh %308 : vector<2x32xf32>
    %310 = arith.mulf %305, %309 : vector<2x32xf32>
    %311 = vector.extract_strided_slice %11 {offsets = [6, 0], sizes = [2, 128], strides = [1, 1]} : vector<16x128xf32> to vector<2x128xf32>
    %cst_77 = arith.constant dense<0.000000e+00> : vector<2x128xf32>
    %312 = tpu.matmul %278, %19, %cst_77 {dimension_numbers = #tpu.dot_dimension_numbers<[1], [0], [0], [1], [0, 0, 1, 1], [], []>} : vector<2x32xf32>, vector<32x128xf32>, vector<2x128xf32> -> vector<2x128xf32>
    %313 = arith.addf %312, %311 : vector<2x128xf32>
    %314 = math.tanh %313 : vector<2x128xf32>
    %315 = arith.negf %313 : vector<2x128xf32>
    %316 = math.exp %315 : vector<2x128xf32>
    %cst_78 = arith.constant 1.000000e+00 : f32
    %317 = vector.broadcast %cst_78 : f32 to vector<2x128xf32>
    %318 = arith.addf %317, %316 : vector<2x128xf32>
    %319 = arith.divf %317, %318 : vector<2x128xf32>
    %320 = vector.shape_cast %26 : vector<1x128xi1> to vector<1x128xi1>
    %321 = vector.broadcast %320 : vector<1x128xi1> to vector<2x128xi1>
    %322 = arith.select %321, %314, %319 : vector<2x128xi1>, vector<2x128xf32>
    %323 = vector.extract_strided_slice %322 {offsets = [0, 0], sizes = [2, 32], strides = [1, 1]} : vector<2x128xf32> to vector<2x32xf32>
    %324 = vector.extract_strided_slice %322 {offsets = [0, 32], sizes = [2, 32], strides = [1, 1]} : vector<2x128xf32> to vector<2x32xf32>
    %325 = vector.extract_strided_slice %322 {offsets = [0, 64], sizes = [2, 32], strides = [1, 1]} : vector<2x128xf32> to vector<2x32xf32>
    %326 = vector.extract_strided_slice %322 {offsets = [0, 96], sizes = [2, 32], strides = [1, 1]} : vector<2x128xf32> to vector<2x32xf32>
    %327 = arith.mulf %324, %281 : vector<2x32xf32>
    %328 = arith.mulf %323, %325 : vector<2x32xf32>
    %329 = arith.addf %327, %328 : vector<2x32xf32>
    %330 = math.tanh %329 : vector<2x32xf32>
    %331 = arith.mulf %326, %330 : vector<2x32xf32>
    %332 = vector.shape_cast %285 : vector<2x1xi1> to vector<2x1xi1>
    %333 = vector.broadcast %332 : vector<2x1xi1> to vector<2x32xi1>
    %334 = arith.select %333, %310, %272 : vector<2x32xi1>, vector<2x32xf32>
    %335 = vector.shape_cast %285 : vector<2x1xi1> to vector<2x1xi1>
    %336 = vector.broadcast %335 : vector<2x1xi1> to vector<2x32xi1>
    %337 = arith.select %336, %308, %275 : vector<2x32xi1>, vector<2x32xf32>
    %338 = vector.shape_cast %289 : vector<2x1xi1> to vector<2x1xi1>
    %339 = vector.broadcast %338 : vector<2x1xi1> to vector<2x32xi1>
    %340 = arith.select %339, %331, %278 : vector<2x32xi1>, vector<2x32xf32>
    %341 = vector.shape_cast %289 : vector<2x1xi1> to vector<2x1xi1>
    %342 = vector.broadcast %341 : vector<2x1xi1> to vector<2x32xi1>
    %343 = arith.select %342, %329, %281 : vector<2x32xi1>, vector<2x32xf32>
    %c5_79 = arith.constant 5 : index
    %c0_80 = arith.constant 0 : index
    %c0_81 = arith.constant 0 : index
    %344 = vector.load %arg3[%c5_79, %c0_80, %c0_81] : memref<8x2x1xf32, #tpu.memory_space<vmem>>, vector<1x2x1xf32>
    %345 = vector.shape_cast %344 : vector<1x2x1xf32> to vector<2x1xf32>
    %cst_82 = arith.constant 0.000000e+00 : f32
    %346 = vector.broadcast %cst_82 : f32 to vector<2x1xf32>
    %347 = arith.cmpf ogt, %345, %346 : vector<2x1xf32>
    %c2_83 = arith.constant 2 : index
    %c0_84 = arith.constant 0 : index
    %c0_85 = arith.constant 0 : index
    %348 = vector.load %arg3[%c2_83, %c0_84, %c0_85] : memref<8x2x1xf32, #tpu.memory_space<vmem>>, vector<1x2x1xf32>
    %349 = vector.shape_cast %348 : vector<1x2x1xf32> to vector<2x1xf32>
    %cst_86 = arith.constant 0.000000e+00 : f32
    %350 = vector.broadcast %cst_86 : f32 to vector<2x1xf32>
    %351 = arith.cmpf ogt, %349, %350 : vector<2x1xf32>
    %352 = vector.extract_strided_slice %5 {offsets = [10, 0], sizes = [2, 128], strides = [1, 1]} : vector<16x128xf32> to vector<2x128xf32>
    %cst_87 = arith.constant dense<0.000000e+00> : vector<2x128xf32>
    %353 = tpu.matmul %334, %18, %cst_87 {dimension_numbers = #tpu.dot_dimension_numbers<[1], [0], [0], [1], [0, 0, 1, 1], [], []>} : vector<2x32xf32>, vector<32x128xf32>, vector<2x128xf32> -> vector<2x128xf32>
    %354 = arith.addf %353, %352 : vector<2x128xf32>
    %355 = math.tanh %354 : vector<2x128xf32>
    %356 = arith.negf %354 : vector<2x128xf32>
    %357 = math.exp %356 : vector<2x128xf32>
    %cst_88 = arith.constant 1.000000e+00 : f32
    %358 = vector.broadcast %cst_88 : f32 to vector<2x128xf32>
    %359 = arith.addf %358, %357 : vector<2x128xf32>
    %360 = arith.divf %358, %359 : vector<2x128xf32>
    %361 = vector.shape_cast %26 : vector<1x128xi1> to vector<1x128xi1>
    %362 = vector.broadcast %361 : vector<1x128xi1> to vector<2x128xi1>
    %363 = arith.select %362, %355, %360 : vector<2x128xi1>, vector<2x128xf32>
    %364 = vector.extract_strided_slice %363 {offsets = [0, 0], sizes = [2, 32], strides = [1, 1]} : vector<2x128xf32> to vector<2x32xf32>
    %365 = vector.extract_strided_slice %363 {offsets = [0, 32], sizes = [2, 32], strides = [1, 1]} : vector<2x128xf32> to vector<2x32xf32>
    %366 = vector.extract_strided_slice %363 {offsets = [0, 64], sizes = [2, 32], strides = [1, 1]} : vector<2x128xf32> to vector<2x32xf32>
    %367 = vector.extract_strided_slice %363 {offsets = [0, 96], sizes = [2, 32], strides = [1, 1]} : vector<2x128xf32> to vector<2x32xf32>
    %368 = arith.mulf %365, %337 : vector<2x32xf32>
    %369 = arith.mulf %364, %366 : vector<2x32xf32>
    %370 = arith.addf %368, %369 : vector<2x32xf32>
    %371 = math.tanh %370 : vector<2x32xf32>
    %372 = arith.mulf %367, %371 : vector<2x32xf32>
    %373 = vector.extract_strided_slice %11 {offsets = [4, 0], sizes = [2, 128], strides = [1, 1]} : vector<16x128xf32> to vector<2x128xf32>
    %cst_89 = arith.constant dense<0.000000e+00> : vector<2x128xf32>
    %374 = tpu.matmul %340, %19, %cst_89 {dimension_numbers = #tpu.dot_dimension_numbers<[1], [0], [0], [1], [0, 0, 1, 1], [], []>} : vector<2x32xf32>, vector<32x128xf32>, vector<2x128xf32> -> vector<2x128xf32>
    %375 = arith.addf %374, %373 : vector<2x128xf32>
    %376 = math.tanh %375 : vector<2x128xf32>
    %377 = arith.negf %375 : vector<2x128xf32>
    %378 = math.exp %377 : vector<2x128xf32>
    %cst_90 = arith.constant 1.000000e+00 : f32
    %379 = vector.broadcast %cst_90 : f32 to vector<2x128xf32>
    %380 = arith.addf %379, %378 : vector<2x128xf32>
    %381 = arith.divf %379, %380 : vector<2x128xf32>
    %382 = vector.shape_cast %26 : vector<1x128xi1> to vector<1x128xi1>
    %383 = vector.broadcast %382 : vector<1x128xi1> to vector<2x128xi1>
    %384 = arith.select %383, %376, %381 : vector<2x128xi1>, vector<2x128xf32>
    %385 = vector.extract_strided_slice %384 {offsets = [0, 0], sizes = [2, 32], strides = [1, 1]} : vector<2x128xf32> to vector<2x32xf32>
    %386 = vector.extract_strided_slice %384 {offsets = [0, 32], sizes = [2, 32], strides = [1, 1]} : vector<2x128xf32> to vector<2x32xf32>
    %387 = vector.extract_strided_slice %384 {offsets = [0, 64], sizes = [2, 32], strides = [1, 1]} : vector<2x128xf32> to vector<2x32xf32>
    %388 = vector.extract_strided_slice %384 {offsets = [0, 96], sizes = [2, 32], strides = [1, 1]} : vector<2x128xf32> to vector<2x32xf32>
    %389 = arith.mulf %386, %343 : vector<2x32xf32>
    %390 = arith.mulf %385, %387 : vector<2x32xf32>
    %391 = arith.addf %389, %390 : vector<2x32xf32>
    %392 = math.tanh %391 : vector<2x32xf32>
    %393 = arith.mulf %388, %392 : vector<2x32xf32>
    %394 = vector.shape_cast %347 : vector<2x1xi1> to vector<2x1xi1>
    %395 = vector.broadcast %394 : vector<2x1xi1> to vector<2x32xi1>
    %396 = arith.select %395, %372, %334 : vector<2x32xi1>, vector<2x32xf32>
    %397 = vector.shape_cast %347 : vector<2x1xi1> to vector<2x1xi1>
    %398 = vector.broadcast %397 : vector<2x1xi1> to vector<2x32xi1>
    %399 = arith.select %398, %370, %337 : vector<2x32xi1>, vector<2x32xf32>
    %400 = vector.shape_cast %351 : vector<2x1xi1> to vector<2x1xi1>
    %401 = vector.broadcast %400 : vector<2x1xi1> to vector<2x32xi1>
    %402 = arith.select %401, %393, %340 : vector<2x32xi1>, vector<2x32xf32>
    %403 = vector.shape_cast %351 : vector<2x1xi1> to vector<2x1xi1>
    %404 = vector.broadcast %403 : vector<2x1xi1> to vector<2x32xi1>
    %405 = arith.select %404, %391, %343 : vector<2x32xi1>, vector<2x32xf32>
    %c6_91 = arith.constant 6 : index
    %c0_92 = arith.constant 0 : index
    %c0_93 = arith.constant 0 : index
    %406 = vector.load %arg3[%c6_91, %c0_92, %c0_93] : memref<8x2x1xf32, #tpu.memory_space<vmem>>, vector<1x2x1xf32>
    %407 = vector.shape_cast %406 : vector<1x2x1xf32> to vector<2x1xf32>
    %cst_94 = arith.constant 0.000000e+00 : f32
    %408 = vector.broadcast %cst_94 : f32 to vector<2x1xf32>
    %409 = arith.cmpf ogt, %407, %408 : vector<2x1xf32>
    %c1_95 = arith.constant 1 : index
    %c0_96 = arith.constant 0 : index
    %c0_97 = arith.constant 0 : index
    %410 = vector.load %arg3[%c1_95, %c0_96, %c0_97] : memref<8x2x1xf32, #tpu.memory_space<vmem>>, vector<1x2x1xf32>
    %411 = vector.shape_cast %410 : vector<1x2x1xf32> to vector<2x1xf32>
    %cst_98 = arith.constant 0.000000e+00 : f32
    %412 = vector.broadcast %cst_98 : f32 to vector<2x1xf32>
    %413 = arith.cmpf ogt, %411, %412 : vector<2x1xf32>
    %414 = vector.extract_strided_slice %5 {offsets = [12, 0], sizes = [2, 128], strides = [1, 1]} : vector<16x128xf32> to vector<2x128xf32>
    %cst_99 = arith.constant dense<0.000000e+00> : vector<2x128xf32>
    %415 = tpu.matmul %396, %18, %cst_99 {dimension_numbers = #tpu.dot_dimension_numbers<[1], [0], [0], [1], [0, 0, 1, 1], [], []>} : vector<2x32xf32>, vector<32x128xf32>, vector<2x128xf32> -> vector<2x128xf32>
    %416 = arith.addf %415, %414 : vector<2x128xf32>
    %417 = math.tanh %416 : vector<2x128xf32>
    %418 = arith.negf %416 : vector<2x128xf32>
    %419 = math.exp %418 : vector<2x128xf32>
    %cst_100 = arith.constant 1.000000e+00 : f32
    %420 = vector.broadcast %cst_100 : f32 to vector<2x128xf32>
    %421 = arith.addf %420, %419 : vector<2x128xf32>
    %422 = arith.divf %420, %421 : vector<2x128xf32>
    %423 = vector.shape_cast %26 : vector<1x128xi1> to vector<1x128xi1>
    %424 = vector.broadcast %423 : vector<1x128xi1> to vector<2x128xi1>
    %425 = arith.select %424, %417, %422 : vector<2x128xi1>, vector<2x128xf32>
    %426 = vector.extract_strided_slice %425 {offsets = [0, 0], sizes = [2, 32], strides = [1, 1]} : vector<2x128xf32> to vector<2x32xf32>
    %427 = vector.extract_strided_slice %425 {offsets = [0, 32], sizes = [2, 32], strides = [1, 1]} : vector<2x128xf32> to vector<2x32xf32>
    %428 = vector.extract_strided_slice %425 {offsets = [0, 64], sizes = [2, 32], strides = [1, 1]} : vector<2x128xf32> to vector<2x32xf32>
    %429 = vector.extract_strided_slice %425 {offsets = [0, 96], sizes = [2, 32], strides = [1, 1]} : vector<2x128xf32> to vector<2x32xf32>
    %430 = arith.mulf %427, %399 : vector<2x32xf32>
    %431 = arith.mulf %426, %428 : vector<2x32xf32>
    %432 = arith.addf %430, %431 : vector<2x32xf32>
    %433 = math.tanh %432 : vector<2x32xf32>
    %434 = arith.mulf %429, %433 : vector<2x32xf32>
    %435 = vector.extract_strided_slice %11 {offsets = [2, 0], sizes = [2, 128], strides = [1, 1]} : vector<16x128xf32> to vector<2x128xf32>
    %cst_101 = arith.constant dense<0.000000e+00> : vector<2x128xf32>
    %436 = tpu.matmul %402, %19, %cst_101 {dimension_numbers = #tpu.dot_dimension_numbers<[1], [0], [0], [1], [0, 0, 1, 1], [], []>} : vector<2x32xf32>, vector<32x128xf32>, vector<2x128xf32> -> vector<2x128xf32>
    %437 = arith.addf %436, %435 : vector<2x128xf32>
    %438 = math.tanh %437 : vector<2x128xf32>
    %439 = arith.negf %437 : vector<2x128xf32>
    %440 = math.exp %439 : vector<2x128xf32>
    %cst_102 = arith.constant 1.000000e+00 : f32
    %441 = vector.broadcast %cst_102 : f32 to vector<2x128xf32>
    %442 = arith.addf %441, %440 : vector<2x128xf32>
    %443 = arith.divf %441, %442 : vector<2x128xf32>
    %444 = vector.shape_cast %26 : vector<1x128xi1> to vector<1x128xi1>
    %445 = vector.broadcast %444 : vector<1x128xi1> to vector<2x128xi1>
    %446 = arith.select %445, %438, %443 : vector<2x128xi1>, vector<2x128xf32>
    %447 = vector.extract_strided_slice %446 {offsets = [0, 0], sizes = [2, 32], strides = [1, 1]} : vector<2x128xf32> to vector<2x32xf32>
    %448 = vector.extract_strided_slice %446 {offsets = [0, 32], sizes = [2, 32], strides = [1, 1]} : vector<2x128xf32> to vector<2x32xf32>
    %449 = vector.extract_strided_slice %446 {offsets = [0, 64], sizes = [2, 32], strides = [1, 1]} : vector<2x128xf32> to vector<2x32xf32>
    %450 = vector.extract_strided_slice %446 {offsets = [0, 96], sizes = [2, 32], strides = [1, 1]} : vector<2x128xf32> to vector<2x32xf32>
    %451 = arith.mulf %448, %405 : vector<2x32xf32>
    %452 = arith.mulf %447, %449 : vector<2x32xf32>
    %453 = arith.addf %451, %452 : vector<2x32xf32>
    %454 = math.tanh %453 : vector<2x32xf32>
    %455 = arith.mulf %450, %454 : vector<2x32xf32>
    %456 = vector.shape_cast %409 : vector<2x1xi1> to vector<2x1xi1>
    %457 = vector.broadcast %456 : vector<2x1xi1> to vector<2x32xi1>
    %458 = arith.select %457, %434, %396 : vector<2x32xi1>, vector<2x32xf32>
    %459 = vector.shape_cast %409 : vector<2x1xi1> to vector<2x1xi1>
    %460 = vector.broadcast %459 : vector<2x1xi1> to vector<2x32xi1>
    %461 = arith.select %460, %432, %399 : vector<2x32xi1>, vector<2x32xf32>
    %462 = vector.shape_cast %413 : vector<2x1xi1> to vector<2x1xi1>
    %463 = vector.broadcast %462 : vector<2x1xi1> to vector<2x32xi1>
    %464 = arith.select %463, %455, %402 : vector<2x32xi1>, vector<2x32xf32>
    %465 = vector.shape_cast %413 : vector<2x1xi1> to vector<2x1xi1>
    %466 = vector.broadcast %465 : vector<2x1xi1> to vector<2x32xi1>
    %467 = arith.select %466, %453, %405 : vector<2x32xi1>, vector<2x32xf32>
    %c7_103 = arith.constant 7 : index
    %c0_104 = arith.constant 0 : index
    %c0_105 = arith.constant 0 : index
    %468 = vector.load %arg3[%c7_103, %c0_104, %c0_105] : memref<8x2x1xf32, #tpu.memory_space<vmem>>, vector<1x2x1xf32>
    %469 = vector.shape_cast %468 : vector<1x2x1xf32> to vector<2x1xf32>
    %cst_106 = arith.constant 0.000000e+00 : f32
    %470 = vector.broadcast %cst_106 : f32 to vector<2x1xf32>
    %471 = arith.cmpf ogt, %469, %470 : vector<2x1xf32>
    %c0_107 = arith.constant 0 : index
    %c0_108 = arith.constant 0 : index
    %c0_109 = arith.constant 0 : index
    %472 = vector.load %arg3[%c0_107, %c0_108, %c0_109] : memref<8x2x1xf32, #tpu.memory_space<vmem>>, vector<1x2x1xf32>
    %473 = vector.shape_cast %472 : vector<1x2x1xf32> to vector<2x1xf32>
    %cst_110 = arith.constant 0.000000e+00 : f32
    %474 = vector.broadcast %cst_110 : f32 to vector<2x1xf32>
    %475 = arith.cmpf ogt, %473, %474 : vector<2x1xf32>
    %476 = vector.extract_strided_slice %5 {offsets = [14, 0], sizes = [2, 128], strides = [1, 1]} : vector<16x128xf32> to vector<2x128xf32>
    %cst_111 = arith.constant dense<0.000000e+00> : vector<2x128xf32>
    %477 = tpu.matmul %458, %18, %cst_111 {dimension_numbers = #tpu.dot_dimension_numbers<[1], [0], [0], [1], [0, 0, 1, 1], [], []>} : vector<2x32xf32>, vector<32x128xf32>, vector<2x128xf32> -> vector<2x128xf32>
    %478 = arith.addf %477, %476 : vector<2x128xf32>
    %479 = math.tanh %478 : vector<2x128xf32>
    %480 = arith.negf %478 : vector<2x128xf32>
    %481 = math.exp %480 : vector<2x128xf32>
    %cst_112 = arith.constant 1.000000e+00 : f32
    %482 = vector.broadcast %cst_112 : f32 to vector<2x128xf32>
    %483 = arith.addf %482, %481 : vector<2x128xf32>
    %484 = arith.divf %482, %483 : vector<2x128xf32>
    %485 = vector.shape_cast %26 : vector<1x128xi1> to vector<1x128xi1>
    %486 = vector.broadcast %485 : vector<1x128xi1> to vector<2x128xi1>
    %487 = arith.select %486, %479, %484 : vector<2x128xi1>, vector<2x128xf32>
    %488 = vector.extract_strided_slice %487 {offsets = [0, 0], sizes = [2, 32], strides = [1, 1]} : vector<2x128xf32> to vector<2x32xf32>
    %489 = vector.extract_strided_slice %487 {offsets = [0, 32], sizes = [2, 32], strides = [1, 1]} : vector<2x128xf32> to vector<2x32xf32>
    %490 = vector.extract_strided_slice %487 {offsets = [0, 64], sizes = [2, 32], strides = [1, 1]} : vector<2x128xf32> to vector<2x32xf32>
    %491 = vector.extract_strided_slice %487 {offsets = [0, 96], sizes = [2, 32], strides = [1, 1]} : vector<2x128xf32> to vector<2x32xf32>
    %492 = arith.mulf %489, %461 : vector<2x32xf32>
    %493 = arith.mulf %488, %490 : vector<2x32xf32>
    %494 = arith.addf %492, %493 : vector<2x32xf32>
    %495 = math.tanh %494 : vector<2x32xf32>
    %496 = arith.mulf %491, %495 : vector<2x32xf32>
    %497 = vector.extract_strided_slice %11 {offsets = [0, 0], sizes = [2, 128], strides = [1, 1]} : vector<16x128xf32> to vector<2x128xf32>
    %cst_113 = arith.constant dense<0.000000e+00> : vector<2x128xf32>
    %498 = tpu.matmul %464, %19, %cst_113 {dimension_numbers = #tpu.dot_dimension_numbers<[1], [0], [0], [1], [0, 0, 1, 1], [], []>} : vector<2x32xf32>, vector<32x128xf32>, vector<2x128xf32> -> vector<2x128xf32>
    %499 = arith.addf %498, %497 : vector<2x128xf32>
    %500 = math.tanh %499 : vector<2x128xf32>
    %501 = arith.negf %499 : vector<2x128xf32>
    %502 = math.exp %501 : vector<2x128xf32>
    %cst_114 = arith.constant 1.000000e+00 : f32
    %503 = vector.broadcast %cst_114 : f32 to vector<2x128xf32>
    %504 = arith.addf %503, %502 : vector<2x128xf32>
    %505 = arith.divf %503, %504 : vector<2x128xf32>
    %506 = vector.shape_cast %26 : vector<1x128xi1> to vector<1x128xi1>
    %507 = vector.broadcast %506 : vector<1x128xi1> to vector<2x128xi1>
    %508 = arith.select %507, %500, %505 : vector<2x128xi1>, vector<2x128xf32>
    %509 = vector.extract_strided_slice %508 {offsets = [0, 0], sizes = [2, 32], strides = [1, 1]} : vector<2x128xf32> to vector<2x32xf32>
    %510 = vector.extract_strided_slice %508 {offsets = [0, 32], sizes = [2, 32], strides = [1, 1]} : vector<2x128xf32> to vector<2x32xf32>
    %511 = vector.extract_strided_slice %508 {offsets = [0, 64], sizes = [2, 32], strides = [1, 1]} : vector<2x128xf32> to vector<2x32xf32>
    %512 = vector.extract_strided_slice %508 {offsets = [0, 96], sizes = [2, 32], strides = [1, 1]} : vector<2x128xf32> to vector<2x32xf32>
    %513 = arith.mulf %510, %467 : vector<2x32xf32>
    %514 = arith.mulf %509, %511 : vector<2x32xf32>
    %515 = arith.addf %513, %514 : vector<2x32xf32>
    %516 = math.tanh %515 : vector<2x32xf32>
    %517 = arith.mulf %512, %516 : vector<2x32xf32>
    %518 = vector.shape_cast %471 : vector<2x1xi1> to vector<2x1xi1>
    %519 = vector.broadcast %518 : vector<2x1xi1> to vector<2x32xi1>
    %520 = arith.select %519, %496, %458 : vector<2x32xi1>, vector<2x32xf32>
    %521 = vector.shape_cast %471 : vector<2x1xi1> to vector<2x1xi1>
    %522 = vector.broadcast %521 : vector<2x1xi1> to vector<2x32xi1>
    %523 = arith.select %522, %494, %461 : vector<2x32xi1>, vector<2x32xf32>
    %524 = vector.shape_cast %475 : vector<2x1xi1> to vector<2x1xi1>
    %525 = vector.broadcast %524 : vector<2x1xi1> to vector<2x32xi1>
    %526 = arith.select %525, %517, %464 : vector<2x32xi1>, vector<2x32xf32>
    %527 = vector.shape_cast %475 : vector<2x1xi1> to vector<2x1xi1>
    %528 = vector.broadcast %527 : vector<2x1xi1> to vector<2x32xi1>
    %529 = arith.select %528, %515, %467 : vector<2x32xi1>, vector<2x32xf32>
    %530 = tpu.concatenate %520, %526 in 1 : vector<2x32xf32>, vector<2x32xf32> -> vector<2x64xf32>
    %531 = tpu.concatenate %523, %529 in 1 : vector<2x32xf32>, vector<2x32xf32> -> vector<2x64xf32>
    %532 = vector.extract_strided_slice %17 {offsets = [0, 0], sizes = [2, 256], strides = [1, 1]} : vector<12x256xf32> to vector<2x256xf32>
    %cst_115 = arith.constant dense<0.000000e+00> : vector<2x256xf32>
    %533 = tpu.matmul %530, %20, %cst_115 {dimension_numbers = #tpu.dot_dimension_numbers<[1], [0], [0], [1], [0, 0, 1, 1], [], []>} : vector<2x64xf32>, vector<64x256xf32>, vector<2x256xf32> -> vector<2x256xf32>
    %534 = arith.addf %533, %532 : vector<2x256xf32>
    %535 = math.tanh %534 : vector<2x256xf32>
    %536 = arith.negf %534 : vector<2x256xf32>
    %537 = math.exp %536 : vector<2x256xf32>
    %cst_116 = arith.constant 1.000000e+00 : f32
    %538 = vector.broadcast %cst_116 : f32 to vector<2x256xf32>
    %539 = arith.addf %538, %537 : vector<2x256xf32>
    %540 = arith.divf %538, %539 : vector<2x256xf32>
    %541 = vector.shape_cast %32 : vector<1x256xi1> to vector<1x256xi1>
    %542 = vector.broadcast %541 : vector<1x256xi1> to vector<2x256xi1>
    %543 = arith.select %542, %535, %540 : vector<2x256xi1>, vector<2x256xf32>
    %544 = vector.extract_strided_slice %543 {offsets = [0, 0], sizes = [2, 64], strides = [1, 1]} : vector<2x256xf32> to vector<2x64xf32>
    %545 = vector.extract_strided_slice %543 {offsets = [0, 64], sizes = [2, 64], strides = [1, 1]} : vector<2x256xf32> to vector<2x64xf32>
    %546 = vector.extract_strided_slice %543 {offsets = [0, 128], sizes = [2, 64], strides = [1, 1]} : vector<2x256xf32> to vector<2x64xf32>
    %547 = vector.extract_strided_slice %543 {offsets = [0, 192], sizes = [2, 64], strides = [1, 1]} : vector<2x256xf32> to vector<2x64xf32>
    %548 = arith.mulf %545, %531 : vector<2x64xf32>
    %549 = arith.mulf %544, %546 : vector<2x64xf32>
    %550 = arith.addf %548, %549 : vector<2x64xf32>
    %551 = math.tanh %550 : vector<2x64xf32>
    %552 = arith.mulf %547, %551 : vector<2x64xf32>
    %c0_117 = arith.constant 0 : index
    %c0_118 = arith.constant 0 : index
    %553 = vector.load %arg16[%c0_117, %c0_118] : memref<12x64xf32, #tpu.memory_space<vmem>>, vector<2x64xf32>
    tpu.vector_store %arg16[%c0_117, %c0_118], %552 {strides = array<i32>} : memref<12x64xf32, #tpu.memory_space<vmem>>, vector<2x64xf32>,
    %554 = vector.extract_strided_slice %17 {offsets = [2, 0], sizes = [2, 256], strides = [1, 1]} : vector<12x256xf32> to vector<2x256xf32>
    %cst_119 = arith.constant dense<0.000000e+00> : vector<2x256xf32>
    %555 = tpu.matmul %552, %20, %cst_119 {dimension_numbers = #tpu.dot_dimension_numbers<[1], [0], [0], [1], [0, 0, 1, 1], [], []>} : vector<2x64xf32>, vector<64x256xf32>, vector<2x256xf32> -> vector<2x256xf32>
    %556 = arith.addf %555, %554 : vector<2x256xf32>
    %557 = math.tanh %556 : vector<2x256xf32>
    %558 = arith.negf %556 : vector<2x256xf32>
    %559 = math.exp %558 : vector<2x256xf32>
    %cst_120 = arith.constant 1.000000e+00 : f32
    %560 = vector.broadcast %cst_120 : f32 to vector<2x256xf32>
    %561 = arith.addf %560, %559 : vector<2x256xf32>
    %562 = arith.divf %560, %561 : vector<2x256xf32>
    %563 = vector.shape_cast %32 : vector<1x256xi1> to vector<1x256xi1>
    %564 = vector.broadcast %563 : vector<1x256xi1> to vector<2x256xi1>
    %565 = arith.select %564, %557, %562 : vector<2x256xi1>, vector<2x256xf32>
    %566 = vector.extract_strided_slice %565 {offsets = [0, 0], sizes = [2, 64], strides = [1, 1]} : vector<2x256xf32> to vector<2x64xf32>
    %567 = vector.extract_strided_slice %565 {offsets = [0, 64], sizes = [2, 64], strides = [1, 1]} : vector<2x256xf32> to vector<2x64xf32>
    %568 = vector.extract_strided_slice %565 {offsets = [0, 128], sizes = [2, 64], strides = [1, 1]} : vector<2x256xf32> to vector<2x64xf32>
    %569 = vector.extract_strided_slice %565 {offsets = [0, 192], sizes = [2, 64], strides = [1, 1]} : vector<2x256xf32> to vector<2x64xf32>
    %570 = arith.mulf %567, %550 : vector<2x64xf32>
    %571 = arith.mulf %566, %568 : vector<2x64xf32>
    %572 = arith.addf %570, %571 : vector<2x64xf32>
    %573 = math.tanh %572 : vector<2x64xf32>
    %574 = arith.mulf %569, %573 : vector<2x64xf32>
    %c2_121 = arith.constant 2 : index
    %c0_122 = arith.constant 0 : index
    %575 = vector.load %arg16[%c2_121, %c0_122] : memref<12x64xf32, #tpu.memory_space<vmem>>, vector<2x64xf32>
    tpu.vector_store %arg16[%c2_121, %c0_122], %574 {strides = array<i32>} : memref<12x64xf32, #tpu.memory_space<vmem>>, vector<2x64xf32>,
    %576 = vector.extract_strided_slice %17 {offsets = [4, 0], sizes = [2, 256], strides = [1, 1]} : vector<12x256xf32> to vector<2x256xf32>
    %cst_123 = arith.constant dense<0.000000e+00> : vector<2x256xf32>
    %577 = tpu.matmul %574, %20, %cst_123 {dimension_numbers = #tpu.dot_dimension_numbers<[1], [0], [0], [1], [0, 0, 1, 1], [], []>} : vector<2x64xf32>, vector<64x256xf32>, vector<2x256xf32> -> vector<2x256xf32>
    %578 = arith.addf %577, %576 : vector<2x256xf32>
    %579 = math.tanh %578 : vector<2x256xf32>
    %580 = arith.negf %578 : vector<2x256xf32>
    %581 = math.exp %580 : vector<2x256xf32>
    %cst_124 = arith.constant 1.000000e+00 : f32
    %582 = vector.broadcast %cst_124 : f32 to vector<2x256xf32>
    %583 = arith.addf %582, %581 : vector<2x256xf32>
    %584 = arith.divf %582, %583 : vector<2x256xf32>
    %585 = vector.shape_cast %32 : vector<1x256xi1> to vector<1x256xi1>
    %586 = vector.broadcast %585 : vector<1x256xi1> to vector<2x256xi1>
    %587 = arith.select %586, %579, %584 : vector<2x256xi1>, vector<2x256xf32>
    %588 = vector.extract_strided_slice %587 {offsets = [0, 0], sizes = [2, 64], strides = [1, 1]} : vector<2x256xf32> to vector<2x64xf32>
    %589 = vector.extract_strided_slice %587 {offsets = [0, 64], sizes = [2, 64], strides = [1, 1]} : vector<2x256xf32> to vector<2x64xf32>
    %590 = vector.extract_strided_slice %587 {offsets = [0, 128], sizes = [2, 64], strides = [1, 1]} : vector<2x256xf32> to vector<2x64xf32>
    %591 = vector.extract_strided_slice %587 {offsets = [0, 192], sizes = [2, 64], strides = [1, 1]} : vector<2x256xf32> to vector<2x64xf32>
    %592 = arith.mulf %589, %572 : vector<2x64xf32>
    %593 = arith.mulf %588, %590 : vector<2x64xf32>
    %594 = arith.addf %592, %593 : vector<2x64xf32>
    %595 = math.tanh %594 : vector<2x64xf32>
    %596 = arith.mulf %591, %595 : vector<2x64xf32>
    %c4_125 = arith.constant 4 : index
    %c0_126 = arith.constant 0 : index
    %597 = vector.load %arg16[%c4_125, %c0_126] : memref<12x64xf32, #tpu.memory_space<vmem>>, vector<2x64xf32>
    tpu.vector_store %arg16[%c4_125, %c0_126], %596 {strides = array<i32>} : memref<12x64xf32, #tpu.memory_space<vmem>>, vector<2x64xf32>,
    %598 = vector.extract_strided_slice %17 {offsets = [6, 0], sizes = [2, 256], strides = [1, 1]} : vector<12x256xf32> to vector<2x256xf32>
    %cst_127 = arith.constant dense<0.000000e+00> : vector<2x256xf32>
    %599 = tpu.matmul %596, %20, %cst_127 {dimension_numbers = #tpu.dot_dimension_numbers<[1], [0], [0], [1], [0, 0, 1, 1], [], []>} : vector<2x64xf32>, vector<64x256xf32>, vector<2x256xf32> -> vector<2x256xf32>
    %600 = arith.addf %599, %598 : vector<2x256xf32>
    %601 = math.tanh %600 : vector<2x256xf32>
    %602 = arith.negf %600 : vector<2x256xf32>
    %603 = math.exp %602 : vector<2x256xf32>
    %cst_128 = arith.constant 1.000000e+00 : f32
    %604 = vector.broadcast %cst_128 : f32 to vector<2x256xf32>
    %605 = arith.addf %604, %603 : vector<2x256xf32>
    %606 = arith.divf %604, %605 : vector<2x256xf32>
    %607 = vector.shape_cast %32 : vector<1x256xi1> to vector<1x256xi1>
    %608 = vector.broadcast %607 : vector<1x256xi1> to vector<2x256xi1>
    %609 = arith.select %608, %601, %606 : vector<2x256xi1>, vector<2x256xf32>
    %610 = vector.extract_strided_slice %609 {offsets = [0, 0], sizes = [2, 64], strides = [1, 1]} : vector<2x256xf32> to vector<2x64xf32>
    %611 = vector.extract_strided_slice %609 {offsets = [0, 64], sizes = [2, 64], strides = [1, 1]} : vector<2x256xf32> to vector<2x64xf32>
    %612 = vector.extract_strided_slice %609 {offsets = [0, 128], sizes = [2, 64], strides = [1, 1]} : vector<2x256xf32> to vector<2x64xf32>
    %613 = vector.extract_strided_slice %609 {offsets = [0, 192], sizes = [2, 64], strides = [1, 1]} : vector<2x256xf32> to vector<2x64xf32>
    %614 = arith.mulf %611, %594 : vector<2x64xf32>
    %615 = arith.mulf %610, %612 : vector<2x64xf32>
    %616 = arith.addf %614, %615 : vector<2x64xf32>
    %617 = math.tanh %616 : vector<2x64xf32>
    %618 = arith.mulf %613, %617 : vector<2x64xf32>
    %c6_129 = arith.constant 6 : index
    %c0_130 = arith.constant 0 : index
    %619 = vector.load %arg16[%c6_129, %c0_130] : memref<12x64xf32, #tpu.memory_space<vmem>>, vector<2x64xf32>
    tpu.vector_store %arg16[%c6_129, %c0_130], %618 {strides = array<i32>} : memref<12x64xf32, #tpu.memory_space<vmem>>, vector<2x64xf32>,
    %620 = vector.extract_strided_slice %17 {offsets = [8, 0], sizes = [2, 256], strides = [1, 1]} : vector<12x256xf32> to vector<2x256xf32>
    %cst_131 = arith.constant dense<0.000000e+00> : vector<2x256xf32>
    %621 = tpu.matmul %618, %20, %cst_131 {dimension_numbers = #tpu.dot_dimension_numbers<[1], [0], [0], [1], [0, 0, 1, 1], [], []>} : vector<2x64xf32>, vector<64x256xf32>, vector<2x256xf32> -> vector<2x256xf32>
    %622 = arith.addf %621, %620 : vector<2x256xf32>
    %623 = math.tanh %622 : vector<2x256xf32>
    %624 = arith.negf %622 : vector<2x256xf32>
    %625 = math.exp %624 : vector<2x256xf32>
    %cst_132 = arith.constant 1.000000e+00 : f32
    %626 = vector.broadcast %cst_132 : f32 to vector<2x256xf32>
    %627 = arith.addf %626, %625 : vector<2x256xf32>
    %628 = arith.divf %626, %627 : vector<2x256xf32>
    %629 = vector.shape_cast %32 : vector<1x256xi1> to vector<1x256xi1>
    %630 = vector.broadcast %629 : vector<1x256xi1> to vector<2x256xi1>
    %631 = arith.select %630, %623, %628 : vector<2x256xi1>, vector<2x256xf32>
    %632 = vector.extract_strided_slice %631 {offsets = [0, 0], sizes = [2, 64], strides = [1, 1]} : vector<2x256xf32> to vector<2x64xf32>
    %633 = vector.extract_strided_slice %631 {offsets = [0, 64], sizes = [2, 64], strides = [1, 1]} : vector<2x256xf32> to vector<2x64xf32>
    %634 = vector.extract_strided_slice %631 {offsets = [0, 128], sizes = [2, 64], strides = [1, 1]} : vector<2x256xf32> to vector<2x64xf32>
    %635 = vector.extract_strided_slice %631 {offsets = [0, 192], sizes = [2, 64], strides = [1, 1]} : vector<2x256xf32> to vector<2x64xf32>
    %636 = arith.mulf %633, %616 : vector<2x64xf32>
    %637 = arith.mulf %632, %634 : vector<2x64xf32>
    %638 = arith.addf %636, %637 : vector<2x64xf32>
    %639 = math.tanh %638 : vector<2x64xf32>
    %640 = arith.mulf %635, %639 : vector<2x64xf32>
    %c8 = arith.constant 8 : index
    %c0_133 = arith.constant 0 : index
    %641 = vector.load %arg16[%c8, %c0_133] : memref<12x64xf32, #tpu.memory_space<vmem>>, vector<2x64xf32>
    tpu.vector_store %arg16[%c8, %c0_133], %640 {strides = array<i32>} : memref<12x64xf32, #tpu.memory_space<vmem>>, vector<2x64xf32>,
    %642 = vector.extract_strided_slice %17 {offsets = [10, 0], sizes = [2, 256], strides = [1, 1]} : vector<12x256xf32> to vector<2x256xf32>
    %cst_134 = arith.constant dense<0.000000e+00> : vector<2x256xf32>
    %643 = tpu.matmul %640, %20, %cst_134 {dimension_numbers = #tpu.dot_dimension_numbers<[1], [0], [0], [1], [0, 0, 1, 1], [], []>} : vector<2x64xf32>, vector<64x256xf32>, vector<2x256xf32> -> vector<2x256xf32>
    %644 = arith.addf %643, %642 : vector<2x256xf32>
    %645 = math.tanh %644 : vector<2x256xf32>
    %646 = arith.negf %644 : vector<2x256xf32>
    %647 = math.exp %646 : vector<2x256xf32>
    %cst_135 = arith.constant 1.000000e+00 : f32
    %648 = vector.broadcast %cst_135 : f32 to vector<2x256xf32>
    %649 = arith.addf %648, %647 : vector<2x256xf32>
    %650 = arith.divf %648, %649 : vector<2x256xf32>
    %651 = vector.shape_cast %32 : vector<1x256xi1> to vector<1x256xi1>
    %652 = vector.broadcast %651 : vector<1x256xi1> to vector<2x256xi1>
    %653 = arith.select %652, %645, %650 : vector<2x256xi1>, vector<2x256xf32>
    %654 = vector.extract_strided_slice %653 {offsets = [0, 0], sizes = [2, 64], strides = [1, 1]} : vector<2x256xf32> to vector<2x64xf32>
    %655 = vector.extract_strided_slice %653 {offsets = [0, 64], sizes = [2, 64], strides = [1, 1]} : vector<2x256xf32> to vector<2x64xf32>
    %656 = vector.extract_strided_slice %653 {offsets = [0, 128], sizes = [2, 64], strides = [1, 1]} : vector<2x256xf32> to vector<2x64xf32>
    %657 = vector.extract_strided_slice %653 {offsets = [0, 192], sizes = [2, 64], strides = [1, 1]} : vector<2x256xf32> to vector<2x64xf32>
    %658 = arith.mulf %655, %638 : vector<2x64xf32>
    %659 = arith.mulf %654, %656 : vector<2x64xf32>
    %660 = arith.addf %658, %659 : vector<2x64xf32>
    %661 = math.tanh %660 : vector<2x64xf32>
    %662 = arith.mulf %657, %661 : vector<2x64xf32>
    %c10 = arith.constant 10 : index
    %c0_136 = arith.constant 0 : index
    %663 = vector.load %arg16[%c10, %c0_136] : memref<12x64xf32, #tpu.memory_space<vmem>>, vector<2x64xf32>
    tpu.vector_store %arg16[%c10, %c0_136], %662 {strides = array<i32>} : memref<12x64xf32, #tpu.memory_space<vmem>>, vector<2x64xf32>,
    %c0_137 = arith.constant 0 : index
    %c0_138 = arith.constant 0 : index
    %664 = vector.load %arg16[%c0_137, %c0_138] : memref<12x64xf32, #tpu.memory_space<vmem>>, vector<12x64xf32>
    %c0_139 = arith.constant 0 : index
    %c0_140 = arith.constant 0 : index
    %665 = vector.load %arg13[%c0_139, %c0_140] : memref<64x128xf32, #tpu.memory_space<vmem>>, vector<64x128xf32>
    %cst_141 = arith.constant dense<0.000000e+00> : vector<12x128xf32>
    %666 = tpu.matmul %664, %665, %cst_141 {dimension_numbers = #tpu.dot_dimension_numbers<[1], [0], [0], [1], [0, 0, 1, 1], [], []>} : vector<12x64xf32>, vector<64x128xf32>, vector<12x128xf32> -> vector<12x128xf32>
    %c0_142 = arith.constant 0 : index
    %c0_143 = arith.constant 0 : index
    %667 = vector.load %arg14[%c0_142, %c0_143] : memref<1x128xf32, #tpu.memory_space<vmem>>, vector<1x128xf32>
    %668 = vector.broadcast %667 : vector<1x128xf32> to vector<12x128xf32>
    %669 = arith.addf %666, %668 : vector<12x128xf32>
    %c0_144 = arith.constant 0 : index
    %c0_145 = arith.constant 0 : index
    %670 = vector.load %arg15[%c0_144, %c0_145] : memref<12x128xf32, #tpu.memory_space<vmem>>, vector<12x128xf32>
    tpu.vector_store %arg15[%c0_144, %c0_145], %669 {strides = array<i32>} : memref<12x128xf32, #tpu.memory_space<vmem>>, vector<12x128xf32>,
    return
  }
  func.func @transform_0(%arg0: i32) -> (i32, i32) {
    %c0_i32 = arith.constant 0 : i32
    %c0_i32_0 = arith.constant 0 : i32
    %c0_i32_1 = arith.constant 0 : i32
    return %c0_i32, %c0_i32_0 : i32, i32
  }
  func.func @transform_1(%arg0: i32) -> (i32, i32) {
    %c0_i32 = arith.constant 0 : i32
    %c0_i32_0 = arith.constant 0 : i32
    %c0_i32_1 = arith.constant 0 : i32
    return %c0_i32, %c0_i32_0 : i32, i32
  }
  func.func @transform_2(%arg0: i32) -> (i32, i32, i32) {
    %c0_i32 = arith.constant 0 : i32
    %c0_i32_0 = arith.constant 0 : i32
    %c0_i32_1 = arith.constant 0 : i32
    %c0_i32_2 = arith.constant 0 : i32
    return %c0_i32, %c0_i32_0, %c0_i32_1 : i32, i32, i32
  }
  func.func @transform_3(%arg0: i32) -> (i32, i32) {
    %c0_i32 = arith.constant 0 : i32
    %c0_i32_0 = arith.constant 0 : i32
    %c0_i32_1 = arith.constant 0 : i32
    return %c0_i32, %c0_i32_0 : i32, i32
  }
  func.func @transform_4(%arg0: i32) -> (i32, i32) {
    %c0_i32 = arith.constant 0 : i32
    %c0_i32_0 = arith.constant 0 : i32
    %c0_i32_1 = arith.constant 0 : i32
    return %c0_i32, %c0_i32_0 : i32, i32
  }
  func.func @transform_5(%arg0: i32) -> (i32, i32) {
    %c0_i32 = arith.constant 0 : i32
    %c0_i32_0 = arith.constant 0 : i32
    %c0_i32_1 = arith.constant 0 : i32
    return %c0_i32, %c0_i32_0 : i32, i32
  }
  func.func @transform_6(%arg0: i32) -> (i32, i32) {
    %c0_i32 = arith.constant 0 : i32
    %c0_i32_0 = arith.constant 0 : i32
    %c0_i32_1 = arith.constant 0 : i32
    return %c0_i32, %c0_i32_0 : i32, i32
  }
  func.func @transform_7(%arg0: i32) -> (i32, i32) {
    %c0_i32 = arith.constant 0 : i32
    %c0_i32_0 = arith.constant 0 : i32
    %c0_i32_1 = arith.constant 0 : i32
    return %c0_i32, %c0_i32_0 : i32, i32
  }
  func.func @transform_8(%arg0: i32) -> (i32, i32) {
    %c0_i32 = arith.constant 0 : i32
    %c0_i32_0 = arith.constant 0 : i32
    %c0_i32_1 = arith.constant 0 : i32
    return %c0_i32, %c0_i32_0 : i32, i32
  }
  func.func @transform_9(%arg0: i32) -> (i32, i32) {
    %c0_i32 = arith.constant 0 : i32
    %c0_i32_0 = arith.constant 0 : i32
    %c0_i32_1 = arith.constant 0 : i32
    return %c0_i32, %c0_i32_0 : i32, i32
  }
  func.func @transform_10(%arg0: i32) -> (i32, i32) {
    %c0_i32 = arith.constant 0 : i32
    %c0_i32_0 = arith.constant 0 : i32
    %c0_i32_1 = arith.constant 0 : i32
    return %c0_i32, %c0_i32_0 : i32, i32
  }
  func.func @transform_11(%arg0: i32) -> (i32, i32) {
    %c0_i32 = arith.constant 0 : i32
    %c0_i32_0 = arith.constant 0 : i32
    %c0_i32_1 = arith.constant 0 : i32
    return %c0_i32, %c0_i32_0 : i32, i32
  }
  func.func @transform_12(%arg0: i32) -> (i32, i32) {
    %c0_i32 = arith.constant 0 : i32
    %c0_i32_0 = arith.constant 0 : i32
    %c0_i32_1 = arith.constant 0 : i32
    return %c0_i32, %c0_i32_0 : i32, i32
  }
  func.func @transform_13(%arg0: i32) -> (i32, i32) {
    %c0_i32 = arith.constant 0 : i32
    %c0_i32_0 = arith.constant 0 : i32
    %c0_i32_1 = arith.constant 0 : i32
    return %c0_i32, %c0_i32_0 : i32, i32
  }
  func.func @transform_14(%arg0: i32) -> (i32, i32) {
    %c0_i32 = arith.constant 0 : i32
    %c0_i32_0 = arith.constant 0 : i32
    %c0_i32_1 = arith.constant 0 : i32
    return %c0_i32, %c0_i32_0 : i32, i32
  }
}

</mosaic_0001>

<bundles_post_ra>
// kernel: seq2seq_forward.1
= control target key start
LH: loop header
LB: loop body
LE: loop exit
PB: predicated region body
PF: predicated region fallthrough
CT: control target
= control target key end

     0   :  { %vm55_vm0 = vcmask 130048   ;;  %v2308_v18 = vmov 0.0   ;;  %v202_v43 = vlaneseq  ;;  %s2311_s17 = smov 32   ;;  %s3307_s3 = inlined_call_operand.vmem [shape: f32[16,128], index: 3, kind: input, shape index: {}]   ;;  %s3308_s9 = inlined_call_operand.vmem [shape: f32[16,256], index: 9, kind: input, shape index: {}]   ;;  %s3309_s0 = inlined_call_operand.vmem [shape: f32[16,16], index: 0, kind: input, shape index: {}]   ;;  %s3310_s1 = inlined_call_operand.vmem [shape: f32[12,16], index: 1, kind: input, shape index: {}]   ;;  %s3311_s4 = inlined_call_operand.vmem [shape: f32[32,128], index: 4, kind: input, shape index: {}]   ;;  %s3312_s6 = inlined_call_operand.vmem [shape: f32[16,128], index: 6, kind: input, shape index: {}]   ;;  %s3313_s7 = inlined_call_operand.vmem [shape: f32[32,128], index: 7, kind: input, shape index: {}]   ;;  %s3314_s5 = inlined_call_operand.vmem [shape: f32[1,128], index: 5, kind: input, shape index: {}]   ;;  %s3315_s8 = inlined_call_operand.vmem [shape: f32[1,128], index: 8, kind: input, shape index: {}]   ;;  %s3316_s11 = inlined_call_operand.vmem [shape: f32[1,256], index: 11, kind: input, shape index: {}]   ;;  %s3317_s2 = inlined_call_operand.vmem [shape: f32[8,2,1], index: 2, kind: input, shape index: {}]   ;;  %s3318_s10 = inlined_call_operand.vmem [shape: f32[64,256], index: 10, kind: input, shape index: {}]   ;;  %s3319_s12 = inlined_call_operand.vmem [shape: f32[64,128], index: 12, kind: input, shape index: {}]   ;;  %s3320_s13 = inlined_call_operand.vmem [shape: f32[1,128], index: 13, kind: input, shape index: {}]   ;;  %s3321_s14 = inlined_call_operand.vmem [shape: f32[12,128], index: 14, kind: output, shape index: {}]  }
   0x1   :  { %v50_v0 = vld [vmem:[%s3307_s3 + $0x8] sm:$0xff]  ;;  %v119_v1 = vld [vmem:[%s3308_s9 + $0x18] sm:$0xff]  ;;  %v49_v2 = vld [vmem:[%s3307_s3] sm:$0xff] }
   0x2   :  { %76 = vmatpush.msra.mxu1 %v50_v0  ;;  %169 = vmatpush.msra.mxu3 %v119_v1  ;;  %v117_v3 = vld [vmem:[%s3308_s9 + $0x8] sm:$0xff]  ;;  %v47_v4 = vld [vmem:[%s3309_s0] sm:$0xff]  ;;  %v2411_v6 = vld [vmem:[%s3311_s4 + $0x18] sm:$0xff]  ;;  %v2531_v45 = vand.u32 127, %v202_v43 }
   0x3   :  { %v2406_v5 = vld [vmem:[%s3310_s1] sm:$0xff]  ;;  %v86_v7 = vld [vmem:[%s3312_s6 + $0x8] sm:$0xff]  ;;  %2094 = vmatpush.msra.mxu2 %v50_v0  ;;  %v2422_v8 = vld [vmem:[%s3311_s4 + $0x10] sm:$0xff]  ;;  %534 = vmatpush.msra.mxu0 %v2411_v6 }
   0x4   :  { %77 = vmatpush.msra.mxu1 %v49_v2  ;;  %170 = vmatpush.msra.mxu3 %v117_v3  ;;  %v85_v9 = vld [vmem:[%s3312_s6] sm:$0xff]  ;;  %v2431_v10 = vld [vmem:[%s3313_s7 + $0x18] sm:$0xff]  ;;  %v2436_v11 = vld [vmem:[%s3311_s4 + $0x8] sm:$0xff]  ;;  %vm204_vm1 = vcmp.ge.s32.totalorder %v2531_v45, 64  ;;  %vm205_vm2 = vcmp.lt.s32.totalorder %v2531_v45, 96 }
   0x5   :  { %2023 = vmatmul.msk.f32.vlgmr.msra.gmra.mxu1 %vm55_vm0, %v47_v4  ;;  %2029 = vmatmul.msk.f32.vlgmr.msra.gmra.mxu3 %vm55_vm0, %v2406_v5  ;;  %v48_v12 = vld [vmem:[%s3309_s0 + $0x8] sm:$0xff]  ;;  %v2446_v13 = vld [vmem:[%s3313_s7 + $0x10] sm:$0xff]  ;;  %v2451_v14 = vld [vmem:[%s3311_s4] sm:$0xff] }
   0x6   :  { %235 = vmatpush.msrb.mxu3 %v2411_v6  ;;  %105 = vmatpush.msrb.mxu1 %v86_v7  ;;  %v2458_v15 = vld [vmem:[%s3310_s1 + $0x8] sm:$0xf]  ;;  %v2476_v17 = vld [vmem:[%s3313_s7] sm:$0xff]  ;;  %vm2535_vm4 = vmand %vm204_vm1, %vm205_vm2 }
   0x7   :  { %2095 = vmatpush.msra.mxu2 %v49_v2  ;;  %535 = vmatpush.msra.mxu0 %v2422_v8  ;;  %v2466_v16 = vld [vmem:[%s3313_s7 + $0x8] sm:$0xff]  ;;  %v2105_v20 = vld [vmem:[%s3315_s8] ss:$0 sm:$0xff] }
   0x8   :  { %236 = vmatpush.msrb.mxu3 %v2422_v8  ;;  %106 = vmatpush.msrb.mxu1 %v85_v9  ;;  %v2512_v24 = vld [vmem:[%s3316_s11] sm:$0x3]  ;;  %v2310_v9 = vmov 0  }
   0x9   :  { %2024 = vmatmul.msk.f32.vlgmr.msra.gmra.mxu2 %vm55_vm0, %v48_v12  ;;  %536 = vmatpush.msra.mxu0 %v2436_v11  ;;  %v123_v25 = vperm.slane %v2512_v24, 1  ;;  %v2522_v29 = vld [vmem:[%s3314_s5] ss:$0 sm:$0xff]  ;;  %s2309_s5 = smov 64  }
   0xa   :  { %298 = vmatpush.msra.mxu1 %v2431_v10  ;;  %237 = vmatpush.msrb.mxu3 %v2436_v11 }
   0xb   :  { %537 = vmatpush.msra.mxu0 %v2451_v14  ;;  %2101 = vset.pattern.permute.xlu0 %v2310_v9 }
   0xc   :  { %299 = vmatpush.msra.mxu1 %v2446_v13  ;;  %238 = vmatpush.msrb.mxu3 %v2451_v14 }
   0xd   :  { %2025 = vmatmul.msk.f32.vlgmr.msrb.gmra.mxu1 %vm55_vm0, %v47_v4  ;;  %2030 = vmatmul.msk.f32.gmra.mxu3 %vm55_vm0, %v2458_v15 }
   0xe   :  { %300 = vmatpush.msra.mxu1 %v2466_v16  ;;  %449 = vmatpush.msra.mxu3 %v2431_v10 }
   0xf   :  { %824 = vmatpush.msrb.mxu0 %v2411_v6  ;;  %2102 = vset.pattern.permute.xlu1 %v2310_v9 }
  0x10   :  { %301 = vmatpush.msra.mxu1 %v2476_v17  ;;  %450 = vmatpush.msra.mxu3 %v2446_v13 }
  0x11   :  { %825 = vmatpush.msrb.mxu0 %v2422_v8  ;;  %2103 = vset.pattern.permute.xlu2 %v2310_v9 }
  0x12   :  { %599 = vmatpush.msrb.mxu1 %v2431_v10  ;;  %451 = vmatpush.msra.mxu3 %v2466_v16 }
  0x13   :  { %826 = vmatpush.msrb.mxu0 %v2436_v11 }
  0x14   :  { %600 = vmatpush.msrb.mxu1 %v2446_v13  ;;  %452 = vmatpush.msra.mxu3 %v2476_v17 }
  0x15   :  { %2026 = vmatmul.msk.f32.gmra.mxu1 %vm55_vm0, %v48_v12  ;;  %239 = vmatmul.f32.vlgmr.msrb.gmra.mxu3 %v2308_v18  ;;  %v214_v12 = vld [vmem:[%s3317_s2] sm:$0x3] }
  0x16   :  { %601 = vmatpush.msrb.mxu1 %v2466_v16  ;;  %747 = vmatpush.msrb.mxu3 %v2431_v10  ;;  %vm215_vm12 = vcmp.gt.f32.partialorder %v214_v12, 0.0 }
  0x17   :  { %827 = vmatpush.msrb.mxu0 %v2451_v14 }
  0x18   :  { %602 = vmatpush.msrb.mxu1 %v2476_v17  ;;  %748 = vmatpush.msrb.mxu3 %v2446_v13 }
  0x1a   :  { %749 = vmatpush.msrb.mxu3 %v2466_v16 }
  0x1c   :  { %750 = vmatpush.msrb.mxu3 %v2476_v17 }
  0x1d   :  { %302 = vmatmul.f32.vlgmr.msra.gmra.mxu1 %v2308_v18  ;;  %v344_v18 = vsel %vm215_vm12, 1, %v2310_v9 }
  0x1e   :  { %890 = vmatpush.msra.mxu1 %v2431_v10 }
  0x20   :  { %891 = vmatpush.msra.mxu1 %v2446_v13 }
  0x22   :  { %892 = vmatpush.msra.mxu1 %v2466_v16 }
  0x24   :  { %893 = vmatpush.msra.mxu1 %v2476_v17 }
  0x82   :  { %v79_v19 = vpop.f32.mrf.mxu1 }
  0x83   :  { %v2527_v31 = vadd.f32 %v2522_v29, %v79_v19 }
  0x88   :  { %v2505_v21 = vpop.f32.mrf.mxu3 }
  0x8a   :  { %v108_v22 = vpop.f32.mrf.mxu1 }
  0x8b   :  { %v2507_v23 = vadd.f32 %v2105_v20, %v108_v22 }
  0x90   :  { %v175_v26 = vpop.f32.mrf.mxu3 }
  0x91   :  { %v2517_v27 = vadd.f32 %v175_v26, %v123_v25 }
  0x92   :  { %v111_v28 = vpop.f32.mrf.mxu1 }
  0x93   :  { %v2524_v30 = vadd.f32 %v2105_v20, %v111_v28  ;;  %v2031_v28 = vld [vmem:[%s3317_s2 + $0xe] sm:$0x3] }
  0x94   :  { %vm218_vm13 = vcmp.gt.f32.partialorder %v2031_v28, 0.0 }
  0x95   :  { %v284_v32 = vrot.slane %v2524_v30, 6 }
  0x98   :  { %v240_v33 = vpop.f32.mrf.mxu3 }
  0x99   :  { %v241_v34 = vadd.f32 %v240_v33, %v2527_v31 }
  0x9a   :  { %v303_v35 = vpop.f32.mrf.mxu1 }
  0x9b   :  { %v2032_v36 = vmul.f32 -1.442695, %v241_v34  ;;  %v304_v37 = vadd.f32 %v303_v35, %v284_v32  ;;  %v351_v32 = vsel %vm218_vm13, 1, %v2310_v9 }
  0x9d   :  { %2107 = vpow2.f32 %v2032_v36  ;;  %v2033_v38 = vmul.f32 -1.442695, %v304_v37 }
  0x9f   :  { %2109 = vpow2.f32 %v2033_v38 }
  0xa3   :  { %v2108_v39 = vpop.eup %2107 }
  0xa4   :  { %v247_v40 = vadd.f32 1.0, %v2108_v39 }
  0xa5   :  { %v2110_v41 = vpop.eup %2109 }
  0xa6   :  { %2111 = vrcp.f32 %v247_v40  ;;  %v310_v42 = vadd.f32 1.0, %v2110_v41  ;;  %v259_v50 = vand.u32 2147483648, %v247_v40  ;;  %v257_v52 = vand.u32 2147483647, %v247_v40  ;;  %v118_v41 = vld [vmem:[%s3308_s9 + $0x10] sm:$0xff] }
  0xa7   :  { %vm253_vm5 = vweird.f32 %v247_v40  ;;  %146 = vmatpush.msrb.mxu2 %v118_v41 }
  0xa8   :  { %2113 = vrcp.f32 %v310_v42  ;;  %v260_v57 = vor.u32 1.1754944e-38, %v259_v50  ;;  %vm258_vm7 = vcmp.eq.f32.partialorder %v257_v52, 8.507059e+37  ;;  %v322_v62 = vand.u32 2147483648, %v310_v42  ;;  %v2612_v52 = vpop.f32.mrf.mxu2 }
  0xa9   :  { %2115 = vtanh.f32 %v241_v34  ;;  %vm316_vm9 = vweird.f32 %v310_v42  ;;  %v320_v0 = vand.u32 2147483647, %v310_v42 }
  0xaa   :  { %2117 = vtanh.f32 %v304_v37  ;;  %v323_v2 = vor.u32 1.1754944e-38, %v322_v62 }
  0xab   :  { %vm321_vm11 = vcmp.eq.f32.partialorder %v320_v0, 8.507059e+37 }
  0xac   :  { %v2112_v44 = vpop.eup %2111 }
  0xad   :  { %v249_v46 = vmul.f32 %v2112_v44, %v247_v40  ;;  %vm254_vm3 = vweird.f32 %v2112_v44 }
  0xae   :  { %v2114_v47 = vpop.eup %2113  ;;  %vm255_vm6 = vmor %vm253_vm5, %vm254_vm3 }
  0xaf   :  { %v250_v48 = vsub.f32 1.0, %v249_v46  ;;  %v312_v49 = vmul.f32 %v2114_v47, %v310_v42  ;;  %vm317_vm8 = vweird.f32 %v2114_v47  ;;  %v2116_v60 = vpop.eup %2115  ;;  %v116_v42 = vld [vmem:[%s3308_s9] sm:$0xff] }
  0xb0   :  { %vm318_vm10 = vmor %vm316_vm9, %vm317_vm8  ;;  %v2118_v4 = vpop.eup %2117  ;;  %147 = vmatpush.msrb.mxu2 %v116_v42 }
  0xb1   :  { %v251_v51 = vmul.f32 %v2112_v44, %v250_v48  ;;  %v313_v53 = vsub.f32 1.0, %v312_v49  ;;  %2027 = vmatmul.msk.f32.vlgmr.msrb.gmra.mxu2 %vm55_vm0, %v2406_v5 }
  0xb2   :  { %384 = vmatpush.msra.mxu2 %v2411_v6 }
  0xb3   :  { %v252_v55 = vadd.f32 %v2112_v44, %v251_v51  ;;  %v314_v56 = vmul.f32 %v2114_v47, %v313_v53 }
  0xb4   :  { %385 = vmatpush.msra.mxu2 %v2422_v8 }
  0xb5   :  { %v256_v58 = vsel %vm255_vm6, %v2112_v44, %v252_v55  ;;  %v315_v59 = vadd.f32 %v2114_v47, %v314_v56  ;;  %v368_v56 = vrot.slane %v2527_v31, 2 }
  0xb6   :  { %v261_v61 = vsel %vm258_vm7, %v260_v57, %v256_v58  ;;  %386 = vmatpush.msra.mxu2 %v2436_v11 }
  0xb7   :  { %v265_v63 = vsel %vm2535_vm4, %v2116_v60, %v261_v61  ;;  %v319_v1 = vsel %vm318_vm10, %v2114_v47, %v315_v59 }
  0xb8   :  { %268 = vrot.lane.b32.xlu0 %v265_v63, %s2309_s5  ;;  %v324_v3 = vsel %vm321_vm11, %v323_v2, %v319_v1  ;;  %v266_v33 = vmul.f32 0.0, %v265_v63  ;;  %387 = vmatpush.msra.mxu2 %v2451_v14 }
  0xb9   :  { %v326_v7 = vsel %vm2535_vm4, %v2118_v4, %v324_v3  ;;  %2028 = vmatmul.msk.f32.gmra.mxu2 %vm55_vm0, %v2458_v15  ;;  %vm219_vm0 = vcmask 261120  }
  0xba   :  { %v327_v36 = vmul.f32 0.0, %v326_v7  ;;  %684 = vmatpush.msrb.mxu2 %v2411_v6 }
  0xbc   :  { %685 = vmatpush.msrb.mxu2 %v2422_v8 }
  0xbe   :  { %686 = vmatpush.msrb.mxu2 %v2436_v11 }
  0xc0   :  { %329 = vrot.lane.b32.xlu0 %v326_v7, %s2309_s5  ;;  %687 = vmatpush.msrb.mxu2 %v2451_v14 }
  0xc8   :  { %346 = vperm.xlu0 %2101, %v344_v18  }
 0x12a   :  { %v269_v19 = vpop.permute.xlu0 %268 }
 0x12b   :  { %v271_v20 = vmul.f32 %v269_v19, %v265_v63 }
 0x12d   :  { %273 = vrot.lane.b32.xlu1 %v271_v20, %s2311_s17  ;;  %v433_v20 = vrot.slane %v2524_v30, 4 }
 0x132   :  { %v330_v22 = vpop.permute.xlu0 %329 }
 0x133   :  { %v332_v26 = vmul.f32 %v330_v22, %v326_v7 }
 0x134   :  { %v2614_v53 = vpop.f32.mrf.mxu2 }
 0x135   :  { %334 = vrot.lane.b32.xlu1 %v332_v26, %s2311_s17 }
 0x13a   :  { %v2583_v43 = vpop.permute.xlu0 %346 }
 0x13b   :  { %vm348_vm14 = vcmp.eq.s32.totalorder %v2583_v43, 1  ;;  %v3020_v43 = vld [vmem:[%s3318_s10 + $0x68] sm:$0xff] }
 0x13c   :  { %v2616_v55 = vpop.f32.mrf.mxu2 }
 0x13d   :  { %353 = vperm.xlu1 %2102, %v351_v32  }
 0x19f   :  { %v274_v34 = vpop.permute.xlu1 %273 }
 0x1a0   :  { %v2558_v35 = vadd.f32 %v274_v34, %v266_v33 }
 0x1a2   :  { %2119 = vtanh.f32 %v2558_v35 }
 0x1a7   :  { %v335_v37 = vpop.permute.xlu1 %334 }
 0x1a8   :  { %v2120_v38 = vpop.eup %2119  ;;  %v2561_v39 = vadd.f32 %v335_v37, %v327_v36 }
 0x1a9   :  { %279 = vrot.lane.b32.xlu2 %v2120_v38, %s2309_s5 }
 0x1aa   :  { %2121 = vtanh.f32 %v2561_v39 }
 0x1af   :  { %v2593_v15 = vpop.permute.xlu1 %353 }
 0x1b0   :  { %v2122_v40 = vpop.eup %2121  ;;  %vm355_vm15 = vcmp.eq.s32.totalorder %v2593_v15, 1  ;;  %v3003_v15 = vld [vmem:[%s3318_s10 + $0x70] sm:$0xff] }
 0x1b1   :  { %340 = vrot.lane.b32.xlu2 %v2122_v40, %s2309_s5 }
 0x203   :  { %v280_v5 = vpop.permute.xlu2 %279 }
 0x204   :  { %v282_v44 = vmul.f32 %v280_v5, %v265_v63 }
 0x206   :  { %v2589_v46 = vsel %vm348_vm14, %v282_v44, 0.0 }
 0x207   :  { %365 = vrot.lane.b32.xlu2 %v2589_v46, %s2311_s17 }
 0x20b   :  { %v341_v47 = vpop.permute.xlu2 %340 }
 0x20c   :  { %v343_v48 = vmul.f32 %v341_v47, %v326_v7 }
 0x20e   :  { %v2598_v49 = vsel %vm355_vm15, %v343_v48, 0.0 }
 0x20f   :  { %431 = vrot.lane.b32.xlu1 %v2598_v49, %s2311_s17 }
 0x261   :  { %v366_v50 = vpop.permute.xlu2 %365 }
 0x262   :  { %2036 = vmatmul.msk.f32.vlgmr.msra.gmra.mxu2 %vm219_vm0, %v366_v50 }
 0x263   :  { %960 = vmatpush.msra.mxu2 %v2411_v6 }
 0x265   :  { %961 = vmatpush.msra.mxu2 %v2422_v8 }
 0x267   :  { %962 = vmatpush.msra.mxu2 %v2436_v11 }
 0x269   :  { %963 = vmatpush.msra.mxu2 %v2451_v14 }
 0x281   :  { %v432_v51 = vpop.permute.xlu1 %431 }
 0x282   :  { %2038 = vmatmul.msk.f32.vlgmr.msra.gmra.mxu3 %vm219_vm0, %v432_v51 }
 0x283   :  { %1025 = vmatpush.msra.mxu3 %v2431_v10 }
 0x285   :  { %1026 = vmatpush.msra.mxu3 %v2446_v13 }
 0x287   :  { %1027 = vmatpush.msra.mxu3 %v2466_v16 }
 0x289   :  { %1028 = vmatpush.msra.mxu3 %v2476_v17 }
 0x2e5   :  { %v389_v57 = vpop.f32.mrf.mxu2 }
 0x2e6   :  { %v390_v58 = vadd.f32 %v389_v57, %v368_v56 }
 0x2e8   :  { %v2037_v59 = vmul.f32 -1.442695, %v390_v58 }
 0x2ea   :  { %2123 = vpow2.f32 %v2037_v59 }
 0x2f0   :  { %v2124_v60 = vpop.eup %2123 }
 0x2f1   :  { %v396_v61 = vadd.f32 1.0, %v2124_v60  ;;  %v2034_v60 = vld [vmem:[%s3317_s2 + $0x2] sm:$0x3] }
 0x2f2   :  { %vm360_vm10 = vcmp.gt.f32.partialorder %v2034_v60, 0.0 }
 0x2f3   :  { %2125 = vrcp.f32 %v396_v61  ;;  %v408_v1 = vand.u32 2147483648, %v396_v61  ;;  %v406_v3 = vand.u32 2147483647, %v396_v61  ;;  %vm402_vm2 = vweird.f32 %v396_v61 }
 0x2f4   :  { %2127 = vtanh.f32 %v390_v58 }
 0x2f5   :  { %v409_v7 = vor.u32 1.1754944e-38, %v408_v1  ;;  %vm407_vm5 = vcmp.eq.f32.partialorder %v406_v3, 8.507059e+37  ;;  %v2035_v3 = vld [vmem:[%s3317_s2 + $0xc] sm:$0x3] }
 0x2f6   :  { %vm363_vm11 = vcmp.gt.f32.partialorder %v2035_v3, 0.0 }
 0x2f9   :  { %v2126_v62 = vpop.eup %2125 }
 0x2fa   :  { %v398_v63 = vmul.f32 %v2126_v62, %v396_v61  ;;  %vm403_vm1 = vweird.f32 %v2126_v62  ;;  %v2128_v18 = vpop.eup %2127  ;;  %v495_v61 = vsel %vm360_vm10, 1, %v2310_v9 }
 0x2fb   :  { %vm404_vm3 = vmor %vm402_vm2, %vm403_vm1 }
 0x2fc   :  { %v399_v0 = vsub.f32 1.0, %v398_v63 }
 0x2fe   :  { %v400_v2 = vmul.f32 %v2126_v62, %v399_v0 }
 0x300   :  { %v401_v4 = vadd.f32 %v2126_v62, %v400_v2 }
 0x302   :  { %v405_v12 = vsel %vm404_vm3, %v2126_v62, %v401_v4  ;;  %v2635_v62 = vsel %vm348_vm14, %v2558_v35, 0.0  ;;  %v502_v4 = vsel %vm363_vm11, 1, %v2310_v9  ;;  %v2649_v35 = vsel %vm355_vm15, %v2561_v39, 0.0 }
 0x303   :  { %v410_v19 = vsel %vm407_vm5, %v409_v7, %v405_v12 }
 0x304   :  { %v412_v22 = vsel %vm2535_vm4, %v2128_v18, %v410_v19 }
 0x305   :  { %v454_v26 = vpop.f32.mrf.mxu3  ;;  %415 = vrot.lane.b32.xlu2 %v412_v22, %s2309_s5  ;;  %v413_v63 = vmul.f32 %v412_v22, %v2635_v62 }
 0x306   :  { %v455_v28 = vadd.f32 %v454_v26, %v433_v20 }
 0x308   :  { %v2039_v32 = vmul.f32 -1.442695, %v455_v28 }
 0x30a   :  { %2129 = vpow2.f32 %v2039_v32 }
 0x310   :  { %v2130_v33 = vpop.eup %2129 }
 0x311   :  { %v461_v34 = vadd.f32 1.0, %v2130_v33 }
 0x313   :  { %2131 = vrcp.f32 %v461_v34  ;;  %v473_v40 = vand.u32 2147483648, %v461_v34  ;;  %v471_v42 = vand.u32 2147483647, %v461_v34  ;;  %vm467_vm7 = vweird.f32 %v461_v34 }
 0x314   :  { %2133 = vtanh.f32 %v455_v28 }
 0x315   :  { %v474_v44 = vor.u32 1.1754944e-38, %v473_v40  ;;  %vm472_vm9 = vcmp.eq.f32.partialorder %v471_v42, 8.507059e+37 }
 0x319   :  { %v2132_v36 = vpop.eup %2131 }
 0x31a   :  { %v463_v37 = vmul.f32 %v2132_v36, %v461_v34  ;;  %vm468_vm6 = vweird.f32 %v2132_v36  ;;  %v2134_v48 = vpop.eup %2133 }
 0x31b   :  { %vm469_vm8 = vmor %vm467_vm7, %vm468_vm6 }
 0x31c   :  { %v464_v38 = vsub.f32 1.0, %v463_v37 }
 0x31e   :  { %v465_v41 = vmul.f32 %v2132_v36, %v464_v38 }
 0x320   :  { %v466_v5 = vadd.f32 %v2132_v36, %v465_v41  ;;  %v583_v41 = vrot.slane %v2524_v30, 2 }
 0x322   :  { %v470_v47 = vsel %vm469_vm8, %v2132_v36, %v466_v5 }
 0x323   :  { %v475_v50 = vsel %vm472_vm9, %v474_v44, %v470_v47 }
 0x324   :  { %v477_v51 = vsel %vm2535_vm4, %v2134_v48, %v475_v50 }
 0x325   :  { %480 = vrot.lane.b32.xlu0 %v477_v51, %s2309_s5  ;;  %v478_v7 = vmul.f32 %v477_v51, %v2649_v35 }
 0x35f   :  { %v416_v56 = vpop.permute.xlu2 %415 }
 0x360   :  { %v418_v57 = vmul.f32 %v416_v56, %v412_v22 }
 0x362   :  { %420 = vrot.lane.b32.xlu1 %v418_v57, %s2311_s17 }
 0x397   :  { %v481_v58 = vpop.permute.xlu0 %480 }
 0x398   :  { %v483_v59 = vmul.f32 %v481_v58, %v477_v51 }
 0x39a   :  { %485 = vrot.lane.b32.xlu2 %v483_v59, %s2311_s17 }
 0x3a2   :  { %497 = vperm.xlu2 %2103, %v495_v61  }
 0x3d4   :  { %v421_v0 = vpop.permute.xlu1 %420 }
 0x3d5   :  { %v2638_v1 = vadd.f32 %v421_v0, %v413_v63 }
 0x3d7   :  { %2135 = vtanh.f32 %v2638_v1 }
 0x3dd   :  { %v2136_v2 = vpop.eup %2135 }
 0x3de   :  { %426 = vrot.lane.b32.xlu0 %v2136_v2, %s2309_s5 }
 0x3e6   :  { %504 = vperm.xlu0 %2101, %v502_v4  }
 0x3f4   :  { %v486_v12 = vpop.permute.xlu2 %485 }
 0x3f5   :  { %v2652_v18 = vadd.f32 %v486_v12, %v478_v7 }
 0x3f7   :  { %2137 = vtanh.f32 %v2652_v18 }
 0x3fc   :  { %v2656_v20 = vpop.permute.xlu2 %497 }
 0x3fd   :  { %v2138_v19 = vpop.eup %2137  ;;  %vm499_vm12 = vcmp.eq.s32.totalorder %v2656_v20, 1 }
 0x3fe   :  { %491 = vrot.lane.b32.xlu1 %v2138_v19, %s2309_s5 }
 0x450   :  { %v427_v26 = vpop.permute.xlu0 %426 }
 0x451   :  { %v429_v28 = vmul.f32 %v427_v26, %v412_v22 }
 0x453   :  { %v2662_v39 = vsel %vm499_vm12, %v429_v28, %v2589_v46 }
 0x454   :  { %516 = vrot.lane.b32.xlu1 %v2662_v39, %s2311_s17 }
 0x458   :  { %v2666_v32 = vpop.permute.xlu0 %504 }
 0x459   :  { %vm506_vm13 = vcmp.eq.s32.totalorder %v2666_v32, 1 }
 0x470   :  { %v492_v33 = vpop.permute.xlu1 %491 }
 0x471   :  { %v494_v34 = vmul.f32 %v492_v33, %v477_v51 }
 0x473   :  { %v2672_v22 = vsel %vm506_vm13, %v494_v34, %v2598_v49  ;;  %v518_v49 = vrot.slane %v2527_v31, 4 }
 0x474   :  { %581 = vrot.lane.b32.xlu2 %v2672_v22, %s2311_s17 }
 0x4c6   :  { %v517_v36 = vpop.permute.xlu1 %516 }
 0x4c7   :  { %2042 = vmatmul.msk.f32.vlgmr.msra.gmra.mxu0 %vm219_vm0, %v517_v36 }
 0x4c8   :  { %1094 = vmatpush.msra.mxu0 %v2411_v6 }
 0x4ca   :  { %1095 = vmatpush.msra.mxu0 %v2422_v8 }
 0x4cc   :  { %1096 = vmatpush.msra.mxu0 %v2436_v11 }
 0x4ce   :  { %v582_v46 = vpop.permute.xlu2 %581  ;;  %1097 = vmatpush.msra.mxu0 %v2451_v14 }
 0x4cf   :  { %2044 = vmatmul.msk.f32.vlgmr.msrb.gmra.mxu1 %vm219_vm0, %v582_v46 }
 0x4d0   :  { %1159 = vmatpush.msrb.mxu1 %v2431_v10 }
 0x4d2   :  { %1160 = vmatpush.msrb.mxu1 %v2446_v13 }
 0x4d4   :  { %1161 = vmatpush.msrb.mxu1 %v2466_v16 }
 0x4d6   :  { %1162 = vmatpush.msrb.mxu1 %v2476_v17 }
 0x544   :  { %v539_v37 = vpop.f32.mrf.mxu0 }
 0x545   :  { %v540_v38 = vadd.f32 %v539_v37, %v518_v49 }
 0x547   :  { %v2043_v40 = vmul.f32 -1.442695, %v540_v38 }
 0x549   :  { %2139 = vpow2.f32 %v2043_v40 }
 0x54c   :  { %v604_v42 = vpop.f32.mrf.mxu1 }
 0x54d   :  { %v605_v5 = vadd.f32 %v604_v42, %v583_v41 }
 0x54f   :  { %v2140_v44 = vpop.eup %2139  ;;  %v2045_v47 = vmul.f32 -1.442695, %v605_v5 }
 0x550   :  { %v546_v48 = vadd.f32 1.0, %v2140_v44 }
 0x551   :  { %2141 = vpow2.f32 %v2045_v47  ;;  %v2040_v47 = vld [vmem:[%s3317_s2 + $0x4] sm:$0x3] }
 0x552   :  { %2143 = vrcp.f32 %v546_v48  ;;  %v558_v59 = vand.u32 2147483648, %v546_v48  ;;  %v556_v61 = vand.u32 2147483647, %v546_v48  ;;  %vm552_vm2 = vweird.f32 %v546_v48 }
 0x553   :  { %vm511_vm10 = vcmp.gt.f32.partialorder %v2040_v47, 0.0 }
 0x554   :  { %v559_v2 = vor.u32 1.1754944e-38, %v558_v59  ;;  %vm557_vm5 = vcmp.eq.f32.partialorder %v556_v61, 8.507059e+37  ;;  %v2041_v59 = vld [vmem:[%s3317_s2 + $0xa] sm:$0x3] }
 0x555   :  { %vm514_vm11 = vcmp.gt.f32.partialorder %v2041_v59, 0.0 }
 0x557   :  { %v2142_v50 = vpop.eup %2141 }
 0x558   :  { %v2144_v51 = vpop.eup %2143  ;;  %v611_v56 = vadd.f32 1.0, %v2142_v50  ;;  %v2704_v50 = vsel %vm499_vm12, %v2638_v1, %v2635_v62  ;;  %v2719_v62 = vsel %vm506_vm13, %v2652_v18, %v2649_v35 }
 0x559   :  { %v548_v57 = vmul.f32 %v2144_v51, %v546_v48  ;;  %vm553_vm1 = vweird.f32 %v2144_v51  ;;  %v645_v48 = vsel %vm511_vm10, 1, %v2310_v9 }
 0x55a   :  { %2145 = vrcp.f32 %v611_v56  ;;  %vm554_vm3 = vmor %vm552_vm2, %vm553_vm1  ;;  %v623_v28 = vand.u32 2147483648, %v611_v56  ;;  %v621_v34 = vand.u32 2147483647, %v611_v56  ;;  %vm617_vm7 = vweird.f32 %v611_v56 }
 0x55b   :  { %v549_v58 = vsub.f32 1.0, %v548_v57  ;;  %2147 = vtanh.f32 %v540_v38 }
 0x55c   :  { %2149 = vtanh.f32 %v605_v5  ;;  %v624_v46 = vor.u32 1.1754944e-38, %v623_v28  ;;  %vm622_vm9 = vcmp.eq.f32.partialorder %v621_v34, 8.507059e+37 }
 0x55d   :  { %v550_v60 = vmul.f32 %v2144_v51, %v549_v58 }
 0x55f   :  { %v551_v63 = vadd.f32 %v2144_v51, %v550_v60  ;;  %v652_v60 = vsel %vm514_vm11, 1, %v2310_v9 }
 0x560   :  { %v2146_v0 = vpop.eup %2145 }
 0x561   :  { %v555_v3 = vsel %vm554_vm3, %v2144_v51, %v551_v63  ;;  %v613_v4 = vmul.f32 %v2146_v0, %v611_v56  ;;  %v2148_v7 = vpop.eup %2147  ;;  %vm618_vm6 = vweird.f32 %v2146_v0 }
 0x562   :  { %v560_v12 = vsel %vm557_vm5, %v559_v2, %v555_v3  ;;  %vm619_vm8 = vmor %vm617_vm7, %vm618_vm6  ;;  %v2150_v37 = vpop.eup %2149 }
 0x563   :  { %v562_v19 = vsel %vm2535_vm4, %v2148_v7, %v560_v12  ;;  %v614_v26 = vsub.f32 1.0, %v613_v4 }
 0x564   :  { %565 = vrot.lane.b32.xlu0 %v562_v19, %s2309_s5  ;;  %v563_v51 = vmul.f32 %v562_v19, %v2704_v50 }
 0x565   :  { %v615_v33 = vmul.f32 %v2146_v0, %v614_v26 }
 0x567   :  { %v616_v36 = vadd.f32 %v2146_v0, %v615_v33 }
 0x569   :  { %v620_v49 = vsel %vm619_vm8, %v2146_v0, %v616_v36 }
 0x56a   :  { %v625_v38 = vsel %vm622_vm9, %v624_v46, %v620_v49 }
 0x56b   :  { %v627_v40 = vsel %vm2535_vm4, %v2150_v37, %v625_v38 }
 0x56c   :  { %630 = vrot.lane.b32.xlu1 %v627_v40, %s2309_s5  ;;  %v628_v1 = vmul.f32 %v627_v40, %v2719_v62 }
 0x5d6   :  { %v566_v41 = vpop.permute.xlu0 %565 }
 0x5d7   :  { %v568_v42 = vmul.f32 %v566_v41, %v562_v19 }
 0x5d9   :  { %570 = vrot.lane.b32.xlu2 %v568_v42, %s2311_s17 }
 0x5de   :  { %v631_v5 = vpop.permute.xlu1 %630 }
 0x5df   :  { %v633_v44 = vmul.f32 %v631_v5, %v627_v40 }
 0x5e1   :  { %635 = vrot.lane.b32.xlu0 %v633_v44, %s2311_s17 }
 0x5e9   :  { %647 = vperm.xlu0 %2101, %v645_v48  }
 0x633   :  { %v571_v56 = vpop.permute.xlu2 %570 }
 0x634   :  { %v2707_v57 = vadd.f32 %v571_v56, %v563_v51 }
 0x636   :  { %2151 = vtanh.f32 %v2707_v57 }
 0x63c   :  { %v2152_v58 = vpop.eup %2151 }
 0x63d   :  { %576 = vrot.lane.b32.xlu1 %v2152_v58, %s2309_s5 }
 0x645   :  { %654 = vperm.xlu1 %2102, %v652_v60  }
 0x653   :  { %v636_v61 = vpop.permute.xlu0 %635 }
 0x654   :  { %v2722_v63 = vadd.f32 %v636_v61, %v628_v1 }
 0x656   :  { %2153 = vtanh.f32 %v2722_v63 }
 0x65b   :  { %v2726_v2 = vpop.permute.xlu0 %647 }
 0x65c   :  { %v2154_v0 = vpop.eup %2153  ;;  %vm649_vm1 = vcmp.eq.s32.totalorder %v2726_v2, 1 }
 0x65d   :  { %641 = vrot.lane.b32.xlu2 %v2154_v0, %s2309_s5 }
 0x6af   :  { %v577_v3 = vpop.permute.xlu1 %576 }
 0x6b0   :  { %v579_v4 = vmul.f32 %v577_v3, %v562_v19 }
 0x6b2   :  { %v2732_v35 = vsel %vm649_vm1, %v579_v4, %v2662_v39 }
 0x6b3   :  { %666 = vrot.lane.b32.xlu2 %v2732_v35, %s2311_s17 }
 0x6b7   :  { %v2736_v18 = vpop.permute.xlu1 %654  ;;  %v642_v7 = vpop.permute.xlu2 %641 }
 0x6b8   :  { %vm656_vm2 = vcmp.eq.s32.totalorder %v2736_v18, 1  ;;  %v644_v12 = vmul.f32 %v642_v7, %v627_v40 }
 0x6ba   :  { %v2742_v19 = vsel %vm656_vm2, %v644_v12, %v2672_v22  ;;  %v668_v22 = vrot.slane %v2527_v31, 6 }
 0x6bb   :  { %731 = vrot.lane.b32.xlu0 %v2742_v19, %s2311_s17 }
 0x70d   :  { %v667_v26 = vpop.permute.xlu2 %666 }
 0x70e   :  { %2048 = vmatmul.msk.f32.vlgmr.msrb.gmra.mxu2 %vm219_vm0, %v667_v26 }
 0x70f   :  { %1228 = vmatpush.msrb.mxu2 %v2411_v6 }
 0x711   :  { %1229 = vmatpush.msrb.mxu2 %v2422_v8 }
 0x713   :  { %1230 = vmatpush.msrb.mxu2 %v2436_v11 }
 0x715   :  { %1231 = vmatpush.msrb.mxu2 %v2451_v14 }
 0x72d   :  { %v732_v39 = vpop.permute.xlu0 %731 }
 0x72e   :  { %2050 = vmatmul.msk.f32.vlgmr.msrb.gmra.mxu3 %vm219_vm0, %v732_v39  ;;  %v2046_v39 = vld [vmem:[%s3317_s2 + $0x6] sm:$0x3] }
 0x72f   :  { %1291 = vmatpush.msrb.mxu3 %v2431_v10 }
 0x731   :  { %1292 = vmatpush.msrb.mxu3 %v2446_v13 }
 0x733   :  { %1293 = vmatpush.msrb.mxu3 %v2466_v16 }
 0x735   :  { %1294 = vmatpush.msrb.mxu3 %v2476_v17 }
 0x791   :  { %v689_v6 = vpop.f32.mrf.mxu2 }
 0x792   :  { %v690_v28 = vadd.f32 %v689_v6, %v668_v22  ;;  %v2774_v6 = vsel %vm649_vm1, %v2707_v57, %v2704_v50  ;;  %v2047_v50 = vld [vmem:[%s3317_s2 + $0x8] sm:$0x3]  ;;  %s2312_s2 = smov 96  }
 0x794   :  { %v2049_v8 = vmul.f32 -1.442695, %v690_v28 }
 0x796   :  { %2155 = vpow2.f32 %v2049_v8 }
 0x79c   :  { %v2156_v11 = vpop.eup %2155 }
 0x79d   :  { %v696_v33 = vadd.f32 1.0, %v2156_v11 }
 0x79f   :  { %2157 = vrcp.f32 %v696_v33  ;;  %v708_v10 = vand.u32 2147483648, %v696_v33  ;;  %v706_v13 = vand.u32 2147483647, %v696_v33  ;;  %vm702_vm5 = vweird.f32 %v696_v33 }
 0x7a0   :  { %2159 = vtanh.f32 %v690_v28 }
 0x7a1   :  { %v709_v17 = vor.u32 1.1754944e-38, %v708_v10  ;;  %vm707_vm7 = vcmp.eq.f32.partialorder %v706_v13, 8.507059e+37 }
 0x7a5   :  { %v2158_v14 = vpop.eup %2157 }
 0x7a6   :  { %v698_v34 = vmul.f32 %v2158_v14, %v696_v33  ;;  %vm703_vm3 = vweird.f32 %v2158_v14  ;;  %v2160_v49 = vpop.eup %2159  ;;  %v2784_v33 = vsel %vm656_vm2, %v2722_v63, %v2719_v62 }
 0x7a7   :  { %vm704_vm6 = vmor %vm702_vm5, %vm703_vm3  ;;  %vm661_vm3 = vcmp.gt.f32.partialorder %v2046_v39, 0.0  ;;  %vm664_vm5 = vcmp.gt.f32.partialorder %v2047_v50, 0.0 }
 0x7a8   :  { %v699_v36 = vsub.f32 1.0, %v698_v34  ;;  %v793_v22 = vsel %vm661_vm3, 1, %v2310_v9  ;;  %v800_v57 = vsel %vm664_vm5, 1, %v2310_v9 }
 0x7aa   :  { %v700_v46 = vmul.f32 %v2158_v14, %v699_v36 }
 0x7ac   :  { %v701_v16 = vadd.f32 %v2158_v14, %v700_v46 }
 0x7ae   :  { %v705_v31 = vsel %vm704_vm6, %v2158_v14, %v701_v16 }
 0x7af   :  { %v710_v37 = vsel %vm707_vm7, %v709_v17, %v705_v31 }
 0x7b0   :  { %v712_v38 = vsel %vm2535_vm4, %v2160_v49, %v710_v37 }
 0x7b1   :  { %715 = vrot.lane.b32.xlu1 %v712_v38, %s2309_s5  ;;  %v752_v40 = vpop.f32.mrf.mxu3  ;;  %v713_v28 = vmul.f32 %v712_v38, %v2774_v6 }
 0x7b2   :  { %v753_v41 = vadd.f32 %v752_v40, %v2524_v30 }
 0x7b4   :  { %v2051_v42 = vmul.f32 -1.442695, %v753_v41 }
 0x7b6   :  { %2161 = vpow2.f32 %v2051_v42 }
 0x7bc   :  { %v2162_v5 = vpop.eup %2161 }
 0x7bd   :  { %v759_v44 = vadd.f32 1.0, %v2162_v5 }
 0x7bf   :  { %2163 = vrcp.f32 %v759_v44  ;;  %v771_v56 = vand.u32 2147483648, %v759_v44  ;;  %v769_v59 = vand.u32 2147483647, %v759_v44  ;;  %vm765_vm9 = vweird.f32 %v759_v44 }
 0x7c0   :  { %2165 = vtanh.f32 %v753_v41 }
 0x7c1   :  { %v772_v1 = vor.u32 1.1754944e-38, %v771_v56  ;;  %vm770_vm11 = vcmp.eq.f32.partialorder %v769_v59, 8.507059e+37 }
 0x7c5   :  { %v2164_v47 = vpop.eup %2163 }
 0x7c6   :  { %v761_v48 = vmul.f32 %v2164_v47, %v759_v44  ;;  %vm766_vm8 = vweird.f32 %v2164_v47  ;;  %v2166_v30 = vpop.eup %2165 }
 0x7c7   :  { %vm767_vm10 = vmor %vm765_vm9, %vm766_vm8 }
 0x7c8   :  { %v762_v51 = vsub.f32 1.0, %v761_v48 }
 0x7ca   :  { %v763_v58 = vmul.f32 %v2164_v47, %v762_v51 }
 0x7cc   :  { %v764_v60 = vadd.f32 %v2164_v47, %v763_v58 }
 0x7ce   :  { %v768_v61 = vsel %vm767_vm10, %v2164_v47, %v764_v60 }
 0x7cf   :  { %v773_v0 = vsel %vm770_vm11, %v772_v1, %v768_v61  ;;  %v874_v61 = vrot.slane %v2507_v23, 6 }
 0x7d0   :  { %v775_v3 = vsel %vm2535_vm4, %v2166_v30, %v773_v0 }
 0x7d1   :  { %778 = vrot.lane.b32.xlu2 %v775_v3, %s2309_s5  ;;  %v776_v14 = vmul.f32 %v775_v3, %v2784_v33 }
 0x823   :  { %v716_v4 = vpop.permute.xlu1 %715 }
 0x824   :  { %v718_v7 = vmul.f32 %v716_v4, %v712_v38 }
 0x826   :  { %720 = vrot.lane.b32.xlu0 %v718_v7, %s2311_s17 }
 0x82b   :  { %v779_v12 = vpop.permute.xlu2 %778 }
 0x82c   :  { %v781_v26 = vmul.f32 %v779_v12, %v775_v3 }
 0x82e   :  { %783 = vrot.lane.b32.xlu1 %v781_v26, %s2311_s17 }
 0x836   :  { %795 = vperm.xlu1 %2102, %v793_v22  }
 0x898   :  { %v721_v8 = vpop.permute.xlu0 %720 }
 0x899   :  { %v2777_v11 = vadd.f32 %v721_v8, %v713_v28 }
 0x89b   :  { %2167 = vtanh.f32 %v2777_v11 }
 0x8a0   :  { %v784_v34 = vpop.permute.xlu1 %783 }
 0x8a1   :  { %v2168_v36 = vpop.eup %2167  ;;  %v2787_v10 = vadd.f32 %v784_v34, %v776_v14 }
 0x8a2   :  { %726 = vrot.lane.b32.xlu2 %v2168_v36, %s2309_s5 }
 0x8a3   :  { %2169 = vtanh.f32 %v2787_v10 }
 0x8a8   :  { %v2796_v62 = vpop.permute.xlu1 %795 }
 0x8a9   :  { %v2170_v46 = vpop.eup %2169  ;;  %vm797_vm6 = vcmp.eq.s32.totalorder %v2796_v62, 1 }
 0x8aa   :  { %789 = vrot.lane.b32.xlu0 %v2170_v46, %s2309_s5  ;;  %802 = vperm.xlu2 %2103, %v800_v57  }
 0x8fc   :  { %v727_v63 = vpop.permute.xlu2 %726 }
 0x8fd   :  { %v729_v13 = vmul.f32 %v727_v63, %v712_v38  ;;  %v2820_v38 = vadd.f32 %v2522_v29, %v2612_v52 }
 0x8ff   :  { %v2802_v16 = vsel %vm797_vm6, %v729_v13, %v2732_v35 }
 0x900   :  { %808 = vrot.lane.b32.xlu0 %v2802_v16, %s2311_s17 }
 0x904   :  { %v2806_v17 = vpop.permute.xlu2 %802 }
 0x905   :  { %vm804_vm7 = vcmp.eq.s32.totalorder %v2806_v17, 1 }
 0x91c   :  { %v790_v9 = vpop.permute.xlu0 %789 }
 0x91d   :  { %v792_v31 = vmul.f32 %v790_v9, %v775_v3 }
 0x91f   :  { %v2812_v49 = vsel %vm804_vm7, %v792_v31, %v2742_v19 }
 0x920   :  { %871 = vrot.lane.b32.xlu1 %v2812_v49, %s2311_s17 }
 0x972   :  { %v809_v37 = vpop.permute.xlu0 %808 }
 0x973   :  { %2052 = vmatmul.msk.f32.vlgmr.msrb.gmra.mxu0 %vm219_vm0, %v809_v37 }
 0x974   :  { %1367 = vmatpush.msrb.mxu0 %v3003_v15 }
 0x992   :  { %v872_v35 = vpop.permute.xlu1 %871 }
 0x993   :  { %2054 = vmatmul.msk.f32.vlgmr.msra.gmra.mxu1 %vm219_vm0, %v872_v35  ;;  %v2836_v35 = vsel %vm797_vm6, %v2777_v11, %v2774_v6 }
 0x9f0   :  { %v829_v40 = vpop.f32.mrf.mxu0 }
 0x9f1   :  { %v830_v41 = vadd.f32 %v829_v40, %v2820_v38 }
 0x9f3   :  { %v2053_v42 = vmul.f32 -1.442695, %v830_v41 }
 0x9f5   :  { %2171 = vpow2.f32 %v2053_v42 }
 0x9fb   :  { %v2172_v19 = vpop.eup %2171 }
 0x9fc   :  { %v836_v5 = vadd.f32 1.0, %v2172_v19 }
 0x9fe   :  { %2173 = vrcp.f32 %v836_v5  ;;  %v848_v51 = vand.u32 2147483648, %v836_v5  ;;  %v846_v58 = vand.u32 2147483647, %v836_v5  ;;  %vm842_vm9 = vweird.f32 %v836_v5 }
 0x9ff   :  { %2175 = vtanh.f32 %v830_v41 }
 0xa00   :  { %v849_v29 = vor.u32 1.1754944e-38, %v848_v51  ;;  %vm847_vm11 = vcmp.eq.f32.partialorder %v846_v58, 8.507059e+37 }
 0xa04   :  { %v2174_v44 = vpop.eup %2173 }
 0xa05   :  { %v838_v47 = vmul.f32 %v2174_v44, %v836_v5  ;;  %vm843_vm8 = vweird.f32 %v2174_v44  ;;  %v2176_v60 = vpop.eup %2175  ;;  %v2847_v5 = vsel %vm804_vm7, %v2787_v10, %v2784_v33 }
 0xa06   :  { %vm844_vm10 = vmor %vm842_vm9, %vm843_vm8 }
 0xa07   :  { %v839_v48 = vsub.f32 1.0, %v838_v47 }
 0xa09   :  { %v840_v56 = vmul.f32 %v2174_v44, %v839_v48 }
 0xa0b   :  { %v841_v59 = vadd.f32 %v2174_v44, %v840_v56 }
 0xa0d   :  { %v845_v52 = vsel %vm844_vm10, %v2174_v44, %v841_v59 }
 0xa0e   :  { %v850_v1 = vsel %vm847_vm11, %v849_v29, %v845_v52 }
 0xa0f   :  { %v852_v30 = vsel %vm2535_vm4, %v2176_v60, %v850_v1 }
 0xa10   :  { %v895_v0 = vpop.f32.mrf.mxu1  ;;  %855 = vrot.lane.b32.xlu2 %v852_v30, %s2309_s5  ;;  %v853_v40 = vmul.f32 %v852_v30, %v2836_v35 }
 0xa11   :  { %v896_v3 = vadd.f32 %v895_v0, %v874_v61 }
 0xa13   :  { %v2055_v4 = vmul.f32 -1.442695, %v896_v3 }
 0xa15   :  { %2177 = vpow2.f32 %v2055_v4 }
 0xa1b   :  { %v2178_v7 = vpop.eup %2177 }
 0xa1c   :  { %v902_v12 = vadd.f32 1.0, %v2178_v7 }
 0xa1e   :  { %2179 = vrcp.f32 %v902_v12  ;;  %v914_v28 = vand.u32 2147483648, %v902_v12  ;;  %v912_v14 = vand.u32 2147483647, %v902_v12  ;;  %vm908_vm5 = vweird.f32 %v902_v12 }
 0xa1f   :  { %2181 = vtanh.f32 %v896_v3 }
 0xa20   :  { %v915_v36 = vor.u32 1.1754944e-38, %v914_v28  ;;  %vm913_vm9 = vcmp.eq.f32.partialorder %v912_v14, 8.507059e+37 }
 0xa24   :  { %v2180_v26 = vpop.eup %2179 }
 0xa25   :  { %v904_v39 = vmul.f32 %v2180_v26, %v902_v12  ;;  %vm909_vm3 = vweird.f32 %v2180_v26  ;;  %v2182_v57 = vpop.eup %2181 }
 0xa26   :  { %vm910_vm8 = vmor %vm908_vm5, %vm909_vm3 }
 0xa27   :  { %v905_v22 = vsub.f32 1.0, %v904_v39 }
 0xa29   :  { %v906_v8 = vmul.f32 %v2180_v26, %v905_v22 }
 0xa2b   :  { %v907_v34 = vadd.f32 %v2180_v26, %v906_v8 }
 0xa2d   :  { %v911_v50 = vsel %vm910_vm8, %v2180_v26, %v907_v34  ;;  %v1009_v34 = vrot.slane %v2507_v23, 4 }
 0xa2e   :  { %v916_v46 = vsel %vm913_vm9, %v915_v36, %v911_v50 }
 0xa2f   :  { %v918_v63 = vsel %vm2535_vm4, %v2182_v57, %v916_v46 }
 0xa30   :  { %921 = vrot.lane.b32.xlu0 %v918_v63, %s2309_s5  ;;  %v919_v44 = vmul.f32 %v918_v63, %v2847_v5 }
 0xa6a   :  { %v856_v13 = vpop.permute.xlu2 %855 }
 0xa6b   :  { %v858_v9 = vmul.f32 %v856_v13, %v852_v30 }
 0xa6d   :  { %860 = vrot.lane.b32.xlu1 %v858_v9, %s2311_s17 }
 0xaa2   :  { %v922_v31 = vpop.permute.xlu0 %921 }
 0xaa3   :  { %v924_v37 = vmul.f32 %v922_v31, %v918_v63 }
 0xaa5   :  { %926 = vrot.lane.b32.xlu2 %v924_v37, %s2311_s17 }
 0xadf   :  { %v861_v41 = vpop.permute.xlu1 %860 }
 0xae0   :  { %v2839_v42 = vadd.f32 %v861_v41, %v853_v40 }
 0xae2   :  { %2183 = vtanh.f32 %v2839_v42 }
 0xae8   :  { %v2184_v19 = vpop.eup %2183 }
 0xae9   :  { %866 = vrot.lane.b32.xlu0 %v2184_v19, %s2309_s5 }
 0xaff   :  { %v927_v6 = vpop.permute.xlu2 %926 }
 0xb00   :  { %v2850_v11 = vadd.f32 %v927_v6, %v919_v44 }
 0xb02   :  { %2185 = vtanh.f32 %v2850_v11 }
 0xb08   :  { %v2186_v47 = vpop.eup %2185 }
 0xb09   :  { %932 = vrot.lane.b32.xlu1 %v2186_v47, %s2309_s5 }
 0xb5b   :  { %v867_v48 = vpop.permute.xlu0 %866 }
 0xb5c   :  { %v869_v51 = vmul.f32 %v867_v48, %v852_v30 }
 0xb5e   :  { %v2857_v56 = vsel %vm804_vm7, %v869_v51, %v2802_v16  ;;  %v944_v16 = vrot.slane %v2820_v38, 2 }
 0xb5f   :  { %941 = vrot.lane.b32.xlu2 %v2857_v56, %s2311_s17 }
 0xb7b   :  { %v933_v33 = vpop.permute.xlu1 %932 }
 0xb7c   :  { %v935_v10 = vmul.f32 %v933_v33, %v918_v63 }
 0xb7e   :  { %v2864_v58 = vsel %vm797_vm6, %v935_v10, %v2812_v49 }
 0xb7f   :  { %1007 = vrot.lane.b32.xlu0 %v2864_v58, %s2311_s17 }
 0xbb9   :  { %v942_v59 = vpop.permute.xlu2 %941 }
 0xbba   :  { %2056 = vmatmul.msk.f32.vlgmr.msra.gmra.mxu2 %vm219_vm0, %v942_v59 }
 0xbbb   :  { %1480 = vmatpush.msra.mxu2 %v3003_v15 }
 0xbf1   :  { %v1008_v29 = vpop.permute.xlu0 %1007 }
 0xbf2   :  { %2058 = vmatmul.msk.f32.vlgmr.msra.gmra.mxu3 %vm219_vm0, %v1008_v29 }
 0xc3d   :  { %v965_v52 = vpop.f32.mrf.mxu2 }
 0xc3e   :  { %v966_v60 = vadd.f32 %v965_v52, %v944_v16  ;;  %v2884_v16 = vsel %vm804_vm7, %v2839_v42, %v2836_v35 }
 0xc40   :  { %v2057_v1 = vmul.f32 -1.442695, %v966_v60 }
 0xc42   :  { %2187 = vpow2.f32 %v2057_v1 }
 0xc48   :  { %v2188_v61 = vpop.eup %2187 }
 0xc49   :  { %v972_v30 = vadd.f32 1.0, %v2188_v61 }
 0xc4b   :  { %2189 = vrcp.f32 %v972_v30  ;;  %v984_v4 = vand.u32 2147483648, %v972_v30  ;;  %v982_v12 = vand.u32 2147483647, %v972_v30  ;;  %vm978_vm11 = vweird.f32 %v972_v30 }
 0xc4c   :  { %2191 = vtanh.f32 %v966_v60 }
 0xc4d   :  { %v985_v39 = vor.u32 1.1754944e-38, %v984_v4  ;;  %vm983_vm5 = vcmp.eq.f32.partialorder %v982_v12, 8.507059e+37 }
 0xc51   :  { %v2190_v49 = vpop.eup %2189 }
 0xc52   :  { %v974_v0 = vmul.f32 %v2190_v49, %v972_v30  ;;  %vm979_vm10 = vweird.f32 %v2190_v49  ;;  %v2192_v28 = vpop.eup %2191  ;;  %v2895_v30 = vsel %vm797_vm6, %v2850_v11, %v2847_v5 }
 0xc53   :  { %vm980_vm3 = vmor %vm978_vm11, %vm979_vm10 }
 0xc54   :  { %v975_v3 = vsub.f32 1.0, %v974_v0 }
 0xc56   :  { %v976_v7 = vmul.f32 %v2190_v49, %v975_v3 }
 0xc58   :  { %v977_v26 = vadd.f32 %v2190_v49, %v976_v7 }
 0xc5a   :  { %v981_v22 = vsel %vm980_vm3, %v2190_v49, %v977_v26 }
 0xc5b   :  { %v986_v8 = vsel %vm983_vm5, %v985_v39, %v981_v22 }
 0xc5c   :  { %v988_v14 = vsel %vm2535_vm4, %v2192_v28, %v986_v8 }
 0xc5d   :  { %991 = vrot.lane.b32.xlu1 %v988_v14, %s2309_s5  ;;  %v989_v52 = vmul.f32 %v988_v14, %v2884_v16 }
 0xc75   :  { %v1030_v36 = vpop.f32.mrf.mxu3 }
 0xc76   :  { %v1031_v50 = vadd.f32 %v1030_v36, %v1009_v34 }
 0xc78   :  { %v2059_v57 = vmul.f32 -1.442695, %v1031_v50 }
 0xc7a   :  { %2193 = vpow2.f32 %v2059_v57 }
 0xc80   :  { %v2194_v46 = vpop.eup %2193 }
 0xc81   :  { %v1037_v63 = vadd.f32 1.0, %v2194_v46 }
 0xc83   :  { %2195 = vrcp.f32 %v1037_v63  ;;  %v1049_v37 = vand.u32 2147483648, %v1037_v63  ;;  %v1047_v41 = vand.u32 2147483647, %v1037_v63  ;;  %vm1043_vm9 = vweird.f32 %v1037_v63 }
 0xc84   :  { %2197 = vtanh.f32 %v1031_v50 }
 0xc85   :  { %v1050_v44 = vor.u32 1.1754944e-38, %v1049_v37  ;;  %vm1048_vm11 = vcmp.eq.f32.partialorder %v1047_v41, 8.507059e+37 }
 0xc89   :  { %v2196_v13 = vpop.eup %2195 }
 0xc8a   :  { %v1039_v9 = vmul.f32 %v2196_v13, %v1037_v63  ;;  %vm1044_vm8 = vweird.f32 %v2196_v13  ;;  %v2198_v47 = vpop.eup %2197 }
 0xc8b   :  { %vm1045_vm10 = vmor %vm1043_vm9, %vm1044_vm8 }
 0xc8c   :  { %v1040_v31 = vsub.f32 1.0, %v1039_v9 }
 0xc8e   :  { %v1041_v40 = vmul.f32 %v2196_v13, %v1040_v31 }
 0xc90   :  { %v1042_v19 = vadd.f32 %v2196_v13, %v1041_v40  ;;  %v1143_v40 = vrot.slane %v2507_v23, 2 }
 0xc92   :  { %v1046_v6 = vsel %vm1045_vm10, %v2196_v13, %v1042_v19 }
 0xc93   :  { %v1051_v48 = vsel %vm1048_vm11, %v1050_v44, %v1046_v6 }
 0xc94   :  { %v1053_v51 = vsel %vm2535_vm4, %v2198_v47, %v1051_v48 }
 0xc95   :  { %1056 = vrot.lane.b32.xlu2 %v1053_v51, %s2309_s5  ;;  %v1054_v17 = vmul.f32 %v1053_v51, %v2895_v30 }
 0xccf   :  { %v992_v33 = vpop.permute.xlu1 %991 }
 0xcd0   :  { %v994_v10 = vmul.f32 %v992_v33, %v988_v14 }
 0xcd2   :  { %996 = vrot.lane.b32.xlu0 %v994_v10, %s2311_s17 }
 0xcef   :  { %v1057_v59 = vpop.permute.xlu2 %1056 }
 0xcf0   :  { %v1059_v29 = vmul.f32 %v1057_v59, %v1053_v51 }
 0xcf2   :  { %1061 = vrot.lane.b32.xlu1 %v1059_v29, %s2311_s17 }
 0xd44   :  { %v997_v60 = vpop.permute.xlu0 %996 }
 0xd45   :  { %v2887_v1 = vadd.f32 %v997_v60, %v989_v52 }
 0xd47   :  { %2199 = vtanh.f32 %v2887_v1 }
 0xd4d   :  { %v2200_v61 = vpop.eup %2199 }
 0xd4e   :  { %1002 = vrot.lane.b32.xlu2 %v2200_v61, %s2309_s5 }
 0xd64   :  { %v1062_v35 = vpop.permute.xlu1 %1061 }
 0xd65   :  { %v2898_v42 = vadd.f32 %v1062_v35, %v1054_v17 }
 0xd67   :  { %2201 = vtanh.f32 %v2898_v42 }
 0xd6d   :  { %v2202_v49 = vpop.eup %2201 }
 0xd6e   :  { %1067 = vrot.lane.b32.xlu0 %v2202_v49, %s2309_s5 }
 0xda8   :  { %v1003_v0 = vpop.permute.xlu2 %1002 }
 0xda9   :  { %v1005_v3 = vmul.f32 %v1003_v0, %v988_v14 }
 0xdab   :  { %v2905_v4 = vsel %vm656_vm2, %v1005_v3, %v2857_v56  ;;  %v1078_v56 = vrot.slane %v2820_v38, 4 }
 0xdac   :  { %1076 = vrot.lane.b32.xlu1 %v2905_v4, %s2311_s17 }
 0xde0   :  { %v1068_v62 = vpop.permute.xlu0 %1067 }
 0xde1   :  { %v1070_v5 = vmul.f32 %v1068_v62, %v1053_v51 }
 0xde3   :  { %v2912_v11 = vsel %vm649_vm1, %v1070_v5, %v2864_v58 }
 0xde4   :  { %1141 = vrot.lane.b32.xlu2 %v2912_v11, %s2311_s17 }
 0xe1e   :  { %v1077_v7 = vpop.permute.xlu1 %1076 }
 0xe1f   :  { %2060 = vmatmul.msk.f32.vlgmr.msra.gmra.mxu0 %vm219_vm0, %v1077_v7  ;;  %v2932_v7 = vsel %vm656_vm2, %v2887_v1, %v2884_v16 }
 0xe3e   :  { %v1142_v12 = vpop.permute.xlu2 %1141 }
 0xe3f   :  { %2062 = vmatmul.msk.f32.vlgmr.msrb.gmra.mxu1 %vm219_vm0, %v1142_v12 }
 0xe9c   :  { %v1099_v26 = vpop.f32.mrf.mxu0 }
 0xe9d   :  { %v1100_v39 = vadd.f32 %v1099_v26, %v1078_v56 }
 0xe9f   :  { %v2061_v22 = vmul.f32 -1.442695, %v1100_v39 }
 0xea1   :  { %2203 = vpow2.f32 %v2061_v22  ;;  %v2943_v22 = vsel %vm649_vm1, %v2898_v42, %v2895_v30 }
 0xea7   :  { %v2204_v28 = vpop.eup %2203 }
 0xea8   :  { %v1106_v8 = vadd.f32 1.0, %v2204_v28 }
 0xeaa   :  { %2205 = vrcp.f32 %v1106_v8  ;;  %v1118_v36 = vand.u32 2147483648, %v1106_v8  ;;  %v1116_v57 = vand.u32 2147483647, %v1106_v8  ;;  %vm1112_vm7 = vweird.f32 %v1106_v8 }
 0xeab   :  { %2207 = vtanh.f32 %v1100_v39 }
 0xeac   :  { %v1119_v63 = vor.u32 1.1754944e-38, %v1118_v36  ;;  %vm1117_vm5 = vcmp.eq.f32.partialorder %v1116_v57, 8.507059e+37 }
 0xeb0   :  { %v2206_v58 = vpop.eup %2205 }
 0xeb1   :  { %v1108_v14 = vmul.f32 %v2206_v58, %v1106_v8  ;;  %vm1113_vm6 = vweird.f32 %v2206_v58  ;;  %v2208_v9 = vpop.eup %2207 }
 0xeb2   :  { %vm1114_vm3 = vmor %vm1112_vm7, %vm1113_vm6 }
 0xeb3   :  { %v1109_v34 = vsub.f32 1.0, %v1108_v14 }
 0xeb5   :  { %v1110_v50 = vmul.f32 %v2206_v58, %v1109_v34 }
 0xeb7   :  { %v1111_v46 = vadd.f32 %v2206_v58, %v1110_v50 }
 0xeb9   :  { %v1115_v13 = vsel %vm1114_vm3, %v2206_v58, %v1111_v46 }
 0xeba   :  { %v1120_v31 = vsel %vm1117_vm5, %v1119_v63, %v1115_v13 }
 0xebb   :  { %v1122_v37 = vsel %vm2535_vm4, %v2208_v9, %v1120_v31 }
 0xebc   :  { %1125 = vrot.lane.b32.xlu0 %v1122_v37, %s2309_s5  ;;  %v1164_v41 = vpop.f32.mrf.mxu1  ;;  %v1123_v12 = vmul.f32 %v1122_v37, %v2932_v7 }
 0xebd   :  { %v1165_v19 = vadd.f32 %v1164_v41, %v1143_v40 }
 0xebf   :  { %v2063_v44 = vmul.f32 -1.442695, %v1165_v19 }
 0xec1   :  { %2209 = vpow2.f32 %v2063_v44 }
 0xec7   :  { %v2210_v6 = vpop.eup %2209 }
 0xec8   :  { %v1171_v47 = vadd.f32 1.0, %v2210_v6 }
 0xeca   :  { %2211 = vrcp.f32 %v1171_v47  ;;  %v1183_v10 = vand.u32 2147483648, %v1171_v47  ;;  %v1181_v29 = vand.u32 2147483647, %v1171_v47  ;;  %vm1177_vm9 = vweird.f32 %v1171_v47 }
 0xecb   :  { %2213 = vtanh.f32 %v1165_v19 }
 0xecc   :  { %v1184_v60 = vor.u32 1.1754944e-38, %v1183_v10  ;;  %vm1182_vm11 = vcmp.eq.f32.partialorder %v1181_v29, 8.507059e+37 }
 0xed0   :  { %v2212_v48 = vpop.eup %2211 }
 0xed1   :  { %v1173_v51 = vmul.f32 %v2212_v48, %v1171_v47  ;;  %vm1178_vm8 = vweird.f32 %v2212_v48  ;;  %v2214_v17 = vpop.eup %2213 }
 0xed2   :  { %vm1179_vm10 = vmor %vm1177_vm9, %vm1178_vm8 }
 0xed3   :  { %v1174_v33 = vsub.f32 1.0, %v1173_v51 }
 0xed5   :  { %v1175_v59 = vmul.f32 %v2212_v48, %v1174_v33 }
 0xed7   :  { %v1176_v52 = vadd.f32 %v2212_v48, %v1175_v59 }
 0xed9   :  { %v1180_v61 = vsel %vm1179_vm10, %v2212_v48, %v1176_v52 }
 0xeda   :  { %v1185_v35 = vsel %vm1182_vm11, %v1184_v60, %v1180_v61 }
 0xedb   :  { %v1187_v49 = vsel %vm2535_vm4, %v2214_v17, %v1185_v35 }
 0xedc   :  { %1190 = vrot.lane.b32.xlu1 %v1187_v49, %s2309_s5  ;;  %v1188_v18 = vmul.f32 %v1187_v49, %v2943_v22 }
 0xf2e   :  { %v1126_v0 = vpop.permute.xlu0 %1125 }
 0xf2f   :  { %v1128_v3 = vmul.f32 %v1126_v0, %v1122_v37 }
 0xf31   :  { %1130 = vrot.lane.b32.xlu2 %v1128_v3, %s2311_s17 }
 0xf4e   :  { %v1191_v62 = vpop.permute.xlu1 %1190 }
 0xf4f   :  { %v1193_v5 = vmul.f32 %v1191_v62, %v1187_v49 }
 0xf51   :  { %1195 = vrot.lane.b32.xlu0 %v1193_v5, %s2311_s17 }
 0xf8b   :  { %v1131_v56 = vpop.permute.xlu2 %1130 }
 0xf8c   :  { %v2935_v26 = vadd.f32 %v1131_v56, %v1123_v12 }
 0xf8e   :  { %2215 = vtanh.f32 %v2935_v26 }
 0xf94   :  { %v2216_v39 = vpop.eup %2215 }
 0xf95   :  { %1136 = vrot.lane.b32.xlu1 %v2216_v39, %s2309_s5 }
 0xfc3   :  { %v1196_v16 = vpop.permute.xlu0 %1195 }
 0xfc4   :  { %v2946_v1 = vadd.f32 %v1196_v16, %v1188_v18 }
 0xfc6   :  { %2217 = vtanh.f32 %v2946_v1 }
 0xfcc   :  { %v2218_v28 = vpop.eup %2217 }
 0xfcd   :  { %1201 = vrot.lane.b32.xlu2 %v2218_v28, %s2309_s5  ;;  %v1206_v28 = vsel %vm506_vm13, %v2935_v26, %v2932_v7 }
0x1007   :  { %v1137_v8 = vpop.permute.xlu1 %1136 }
0x1008   :  { %v1139_v58 = vmul.f32 %v1137_v8, %v1122_v37 }
0x100a   :  { %v2953_v14 = vsel %vm506_vm13, %v1139_v58, %v2905_v4  ;;  %v1212_v4 = vrot.slane %v2820_v38, 6 }
0x100b   :  { %1210 = vrot.lane.b32.xlu0 %v2953_v14, %s2311_s17 }
0x1027   :  { %v1202_v2 = vpop.permute.xlu2 %1201 }
0x1028   :  { %v1204_v30 = vmul.f32 %v1202_v2, %v1187_v49 }
0x102a   :  { %v2960_v42 = vsel %vm499_vm12, %v1204_v30, %v2912_v11  ;;  %v1208_v30 = vsel %vm499_vm12, %v2946_v1, %v2943_v22 }
0x102b   :  { %1275 = vrot.lane.b32.xlu1 %v2960_v42, %s2311_s17 }
0x107d   :  { %v1211_v34 = vpop.permute.xlu0 %1210 }
0x107e   :  { %2064 = vmatmul.msk.f32.vlgmr.msrb.gmra.mxu2 %vm219_vm0, %v1211_v34 }
0x109d   :  { %v1276_v36 = vpop.permute.xlu1 %1275 }
0x109e   :  { %2066 = vmatmul.msk.f32.vlgmr.msrb.gmra.mxu3 %vm219_vm0, %v1276_v36 }
0x1101   :  { %v1233_v50 = vpop.f32.mrf.mxu2 }
0x1102   :  { %v1234_v57 = vadd.f32 %v1233_v50, %v1212_v4 }
0x1104   :  { %v2065_v46 = vmul.f32 -1.442695, %v1234_v57 }
0x1106   :  { %2219 = vpow2.f32 %v2065_v46 }
0x110c   :  { %v2220_v63 = vpop.eup %2219 }
0x110d   :  { %v1240_v13 = vadd.f32 1.0, %v2220_v63 }
0x110f   :  { %2221 = vrcp.f32 %v1240_v13  ;;  %v1252_v37 = vand.u32 2147483648, %v1240_v13  ;;  %v1250_v41 = vand.u32 2147483647, %v1240_v13  ;;  %vm1246_vm2 = vweird.f32 %v1240_v13 }
0x1110   :  { %2223 = vtanh.f32 %v1234_v57 }
0x1111   :  { %v1253_v44 = vor.u32 1.1754944e-38, %v1252_v37  ;;  %vm1251_vm7 = vcmp.eq.f32.partialorder %v1250_v41, 8.507059e+37  ;;  %v3044_v37 = vld [vmem:[%s3318_s10 + $0x48] sm:$0xff]  ;;  %v3058_v41 = vld [vmem:[%s3318_s10 + $0x38] sm:$0xff] }
0x1115   :  { %v2222_v11 = vpop.eup %2221 }
0x1116   :  { %v1242_v9 = vmul.f32 %v2222_v11, %v1240_v13  ;;  %vm1247_vm1 = vweird.f32 %v2222_v11  ;;  %v2224_v6 = vpop.eup %2223 }
0x1117   :  { %vm1248_vm6 = vmor %vm1246_vm2, %vm1247_vm1 }
0x1118   :  { %v1243_v31 = vsub.f32 1.0, %v1242_v9  ;;  %v3030_v9 = vld [vmem:[%s3318_s10 + $0x58] sm:$0xff] }
0x111a   :  { %v1244_v40 = vmul.f32 %v2222_v11, %v1243_v31  ;;  %v3039_v31 = vld [vmem:[%s3318_s10 + $0x40] sm:$0xff] }
0x111c   :  { %v1245_v19 = vadd.f32 %v2222_v11, %v1244_v40  ;;  %v3053_v40 = vld [vmem:[%s3318_s10 + $0x30] sm:$0xff] }
0x111e   :  { %v1249_v38 = vsel %vm1248_vm6, %v2222_v11, %v1245_v19  ;;  %v3025_v11 = vld [vmem:[%s3318_s10 + $0x50] sm:$0xff]  ;;  %v3067_v19 = vld [vmem:[%s3318_s10 + $0x20] sm:$0xff]  ;;  %vm1462_vm6 = vcmask 517120  }
0x111f   :  { %v1254_v47 = vsel %vm1251_vm7, %v1253_v44, %v1249_v38  ;;  %v3072_v44 = vld [vmem:[%s3318_s10 + $0x28] sm:$0xff]  ;;  %v3081_v38 = vld [vmem:[%s3318_s10 + $0x10] sm:$0xff] }
0x1120   :  { %v1256_v48 = vsel %vm2535_vm4, %v2224_v6, %v1254_v47  ;;  %v3086_v6 = vld [vmem:[%s3318_s10 + $0x18] sm:$0xff]  ;;  %v3101_v47 = vld [vmem:[%s3318_s10] sm:$0xff] }
0x1121   :  { %v1296_v51 = vpop.f32.mrf.mxu3  ;;  %1259 = vrot.lane.b32.xlu2 %v1256_v48, %s2309_s5  ;;  %v1257_v8 = vmul.f32 %v1256_v48, %v1206_v28 }
0x1122   :  { %v1297_v33 = vadd.f32 %v1296_v51, %v2507_v23 }
0x1124   :  { %v2067_v10 = vmul.f32 -1.442695, %v1297_v33 }
0x1126   :  { %2225 = vpow2.f32 %v2067_v10 }
0x112c   :  { %v2226_v59 = vpop.eup %2225 }
0x112d   :  { %v1303_v29 = vadd.f32 1.0, %v2226_v59  ;;  %v3166_v59 = vld [vmem:[%s3316_s11] sm:$0x3] }
0x112f   :  { %2227 = vrcp.f32 %v1303_v29  ;;  %v1315_v17 = vand.u32 2147483648, %v1303_v29  ;;  %v1313_v49 = vand.u32 2147483647, %v1303_v29  ;;  %vm1309_vm5 = vweird.f32 %v1303_v29 }
0x1130   :  { %2229 = vtanh.f32 %v1297_v33 }
0x1131   :  { %v1316_v3 = vor.u32 1.1754944e-38, %v1315_v17  ;;  %vm1314_vm9 = vcmp.eq.f32.partialorder %v1313_v49, 8.507059e+37 }
0x1135   :  { %v2228_v52 = vpop.eup %2227 }
0x1136   :  { %v1305_v60 = vmul.f32 %v2228_v52, %v1303_v29  ;;  %vm1310_vm3 = vweird.f32 %v2228_v52  ;;  %v2230_v23 = vpop.eup %2229  ;;  %v122_v29 = vperm.slane %v3166_v59, 0 }
0x1137   :  { %vm1311_vm8 = vmor %vm1309_vm5, %vm1310_vm3 }
0x1138   :  { %v1306_v61 = vsub.f32 1.0, %v1305_v60  ;;  %v3177_v60 = vadd.f32 %v2614_v53, %v122_v29 }
0x113a   :  { %v1307_v35 = vmul.f32 %v2228_v52, %v1306_v61 }
0x113c   :  { %v1308_v0 = vadd.f32 %v2228_v52, %v1307_v35 }
0x113e   :  { %v1312_v62 = vsel %vm1311_vm8, %v2228_v52, %v1308_v0  ;;  %v3172_v52 = vadd.f32 %v2505_v21, %v123_v25 }
0x113f   :  { %v1317_v5 = vsel %vm1314_vm9, %v1316_v3, %v1312_v62 }
0x1140   :  { %v1319_v12 = vsel %vm2535_vm4, %v2230_v23, %v1317_v5  ;;  %vm1355_vm4 = vcmask 523264  }
0x1141   :  { %1322 = vrot.lane.b32.xlu0 %v1319_v12, %s2309_s5  ;;  %v1320_v34 = vmul.f32 %v1319_v12, %v1208_v30 }
0x117b   :  { %v1260_v56 = vpop.permute.xlu2 %1259 }
0x117c   :  { %v1262_v39 = vmul.f32 %v1260_v56, %v1256_v48 }
0x117e   :  { %1264 = vrot.lane.b32.xlu1 %v1262_v39, %s2311_s17 }
0x11b3   :  { %v1323_v18 = vpop.permute.xlu0 %1322 }
0x11b4   :  { %v1325_v16 = vmul.f32 %v1323_v18, %v1319_v12  ;;  %v3182_v18 = vadd.s32 128, %v2531_v45 }
0x11b6   :  { %1327 = vrot.lane.b32.xlu2 %v1325_v16, %s2311_s17  ;;  %vm211_vm10 = vcmp.lt.s32.totalorder %v3182_v18, 192 }
0x11f0   :  { %v1265_v58 = vpop.permute.xlu1 %1264 }
0x11f1   :  { %v1267_v2 = vadd.f32 %v1265_v58, %v1257_v8 }
0x11f3   :  { %2231 = vtanh.f32 %v1267_v2  ;;  %v1338_v32 = vsel %vm355_vm15, %v1267_v2, %v1206_v28 }
0x11f9   :  { %v2232_v54 = vpop.eup %2231 }
0x11fa   :  { %1270 = vrot.lane.b32.xlu0 %v2232_v54, %s2309_s5 }
0x1210   :  { %v1328_v36 = vpop.permute.xlu2 %1327 }
0x1211   :  { %v1330_v4 = vadd.f32 %v1328_v36, %v1320_v34 }
0x1213   :  { %2233 = vtanh.f32 %v1330_v4  ;;  %v1340_v63 = vsel %vm348_vm14, %v1330_v4, %v1208_v30 }
0x1219   :  { %v2234_v50 = vpop.eup %2233 }
0x121a   :  { %1333 = vrot.lane.b32.xlu1 %v2234_v50, %s2309_s5 }
0x1222   :  { %1351 = vrot.lane.b32.xlu1 %v1338_v32, %s2312_s2 }
0x126c   :  { %v1271_v7 = vpop.permute.xlu0 %1270 }
0x126d   :  { %v1273_v26 = vmul.f32 %v1271_v7, %v1256_v48  ;;  %v3106_v48 = vld [vmem:[%s3318_s10 + $0x8] sm:$0xff] }
0x126f   :  { %v1337_v57 = vsel %vm355_vm15, %v1273_v26, %v2953_v14  ;;  %v3008_v14 = vld [vmem:[%s3318_s10 + $0x78] sm:$0xff] }
0x1270   :  { %1342 = vrot.lane.b32.xlu2 %v1337_v57, %s2311_s17  ;;  %1387 = vmatpush.msra.mxu1 %v3008_v14 }
0x1271   :  { %1500 = vmatpush.msra.mxu3 %v3008_v14 }
0x1272   :  { %1388 = vmatpush.msra.mxu1 %v3020_v43 }
0x1273   :  { %1501 = vmatpush.msra.mxu3 %v3020_v43 }
0x1274   :  { %1389 = vmatpush.msra.mxu1 %v3030_v9 }
0x1275   :  { %1502 = vmatpush.msra.mxu3 %v3030_v9 }
0x1276   :  { %1390 = vmatpush.msra.mxu1 %v3044_v37 }
0x1277   :  { %1503 = vmatpush.msra.mxu3 %v3044_v37 }
0x1278   :  { %1391 = vmatpush.msra.mxu1 %v3058_v41 }
0x1279   :  { %1504 = vmatpush.msra.mxu3 %v3058_v41 }
0x127a   :  { %1392 = vmatpush.msra.mxu1 %v3072_v44 }
0x127b   :  { %1505 = vmatpush.msra.mxu3 %v3072_v44 }
0x127c   :  { %1393 = vmatpush.msra.mxu1 %v3086_v6 }
0x127d   :  { %1506 = vmatpush.msra.mxu3 %v3086_v6 }
0x127e   :  { %1394 = vmatpush.msra.mxu1 %v3106_v48 }
0x127f   :  { %1507 = vmatpush.msra.mxu3 %v3106_v48 }
0x1280   :  { %1602 = vmatpush.msrb.mxu1 %v3008_v14 }
0x1281   :  { %1704 = vmatpush.msrb.mxu3 %v3008_v14 }
0x1282   :  { %1603 = vmatpush.msrb.mxu1 %v3020_v43 }
0x1283   :  { %1705 = vmatpush.msrb.mxu3 %v3020_v43 }
0x1284   :  { %1604 = vmatpush.msrb.mxu1 %v3030_v9 }
0x1285   :  { %1706 = vmatpush.msrb.mxu3 %v3030_v9 }
0x1286   :  { %1605 = vmatpush.msrb.mxu1 %v3044_v37 }
0x1287   :  { %1707 = vmatpush.msrb.mxu3 %v3044_v37 }
0x1288   :  { %1606 = vmatpush.msrb.mxu1 %v3058_v41 }
0x1289   :  { %1708 = vmatpush.msrb.mxu3 %v3058_v41 }
0x128a   :  { %1607 = vmatpush.msrb.mxu1 %v3072_v44 }
0x128b   :  { %1709 = vmatpush.msrb.mxu3 %v3072_v44 }
0x128c   :  { %v1334_v20 = vpop.permute.xlu1 %1333  ;;  %1608 = vmatpush.msrb.mxu1 %v3086_v6 }
0x128d   :  { %v1336_v22 = vmul.f32 %v1334_v20, %v1319_v12  ;;  %1710 = vmatpush.msrb.mxu3 %v3086_v6 }
0x128e   :  { %1609 = vmatpush.msrb.mxu1 %v3106_v48 }
0x128f   :  { %v1339_v1 = vsel %vm348_vm14, %v1336_v22, %v2960_v42  ;;  %v3013_v42 = vld [vmem:[%s3318_s10 + $0x60] sm:$0xff]  ;;  %1711 = vmatpush.msrb.mxu3 %v3106_v48 }
0x1290   :  { %1346 = vrot.lane.b32.xlu0 %v1339_v1, %s2309_s5  ;;  %1368 = vmatpush.msrb.mxu0 %v3013_v42 }
0x1291   :  { %1481 = vmatpush.msra.mxu2 %v3013_v42 }
0x1292   :  { %1369 = vmatpush.msrb.mxu0 %v3025_v11 }
0x1293   :  { %1482 = vmatpush.msra.mxu2 %v3025_v11 }
0x1294   :  { %v1352_v46 = vpop.permute.xlu1 %1351  ;;  %1370 = vmatpush.msrb.mxu0 %v3039_v31 }
0x1295   :  { %v1354_v13 = vsel %vm219_vm0, %v1352_v46, %v1340_v63  ;;  %1483 = vmatpush.msra.mxu2 %v3039_v31 }
0x1296   :  { %1446 = vrot.lane.b32.xlu2 %v1354_v13, %s2309_s5  ;;  %1371 = vmatpush.msrb.mxu0 %v3053_v40 }
0x1297   :  { %1484 = vmatpush.msra.mxu2 %v3053_v40 }
0x1298   :  { %1372 = vmatpush.msrb.mxu0 %v3067_v19 }
0x1299   :  { %1485 = vmatpush.msra.mxu2 %v3067_v19 }
0x129a   :  { %1373 = vmatpush.msrb.mxu0 %v3081_v38 }
0x129b   :  { %1486 = vmatpush.msra.mxu2 %v3081_v38 }
0x129c   :  { %1374 = vmatpush.msrb.mxu0 %v3101_v47 }
0x129d   :  { %1487 = vmatpush.msra.mxu2 %v3101_v47 }
0x129e   :  { %1582 = vmatpush.msra.mxu0 %v3003_v15 }
0x129f   :  { %1684 = vmatpush.msrb.mxu2 %v3003_v15 }
0x12a0   :  { %1583 = vmatpush.msra.mxu0 %v3013_v42 }
0x12a1   :  { %1685 = vmatpush.msrb.mxu2 %v3013_v42 }
0x12a2   :  { %1584 = vmatpush.msra.mxu0 %v3025_v11 }
0x12a3   :  { %1686 = vmatpush.msrb.mxu2 %v3025_v11 }
0x12a4   :  { %1585 = vmatpush.msra.mxu0 %v3039_v31 }
0x12a5   :  { %1687 = vmatpush.msrb.mxu2 %v3039_v31 }
0x12a6   :  { %1586 = vmatpush.msra.mxu0 %v3053_v40 }
0x12a7   :  { %1688 = vmatpush.msrb.mxu2 %v3053_v40 }
0x12a8   :  { %1587 = vmatpush.msra.mxu0 %v3067_v19 }
0x12a9   :  { %1689 = vmatpush.msrb.mxu2 %v3067_v19 }
0x12aa   :  { %1588 = vmatpush.msra.mxu0 %v3081_v38 }
0x12ab   :  { %1690 = vmatpush.msrb.mxu2 %v3081_v38 }
0x12ac   :  { %1589 = vmatpush.msra.mxu0 %v3101_v47 }
0x12ad   :  { %1691 = vmatpush.msrb.mxu2 %v3101_v47 }
0x12ca   :  { %v1343_v51 = vpop.permute.xlu2 %1342 }
0x12f0   :  { %v1447_v22 = vpop.permute.xlu2 %1446 }
0x1302   :  { %v1347_v33 = vpop.permute.xlu0 %1346 }
0x1303   :  { %v1349_v10 = vsel %vm219_vm0, %v1343_v51, %v1347_v33 }
0x1304   :  { %2068 = vmatmul.msk.f32.vlgmr.msrb.gmra.mxu0 %vm1355_vm4, %v1349_v10  ;;  %2069 = vmatmul.msk.f32.vlgmr.msra.gmra.mxu1 %vm1355_vm4, %v1349_v10 }
0x1305   :  { %1782 = vmatpush.msrb.mxu0 %v3003_v15  ;;  %1802 = vmatpush.msra.mxu1 %v3008_v14 }
0x1307   :  { %1783 = vmatpush.msrb.mxu0 %v3013_v42  ;;  %1803 = vmatpush.msra.mxu1 %v3020_v43 }
0x1309   :  { %1784 = vmatpush.msrb.mxu0 %v3025_v11  ;;  %1804 = vmatpush.msra.mxu1 %v3030_v9 }
0x130b   :  { %1785 = vmatpush.msrb.mxu0 %v3039_v31  ;;  %1805 = vmatpush.msra.mxu1 %v3044_v37 }
0x130d   :  { %1786 = vmatpush.msrb.mxu0 %v3053_v40  ;;  %1806 = vmatpush.msra.mxu1 %v3058_v41 }
0x130f   :  { %1787 = vmatpush.msrb.mxu0 %v3067_v19  ;;  %1807 = vmatpush.msra.mxu1 %v3072_v44 }
0x1311   :  { %1788 = vmatpush.msrb.mxu0 %v3081_v38  ;;  %1808 = vmatpush.msra.mxu1 %v3086_v6 }
0x1313   :  { %1789 = vmatpush.msrb.mxu0 %v3101_v47  ;;  %1809 = vmatpush.msra.mxu1 %v3106_v48 }
0x1381   :  { %v1376_v61 = vpop.f32.mrf.mxu0  ;;  %v1396_v17 = vpop.f32.mrf.mxu1 }
0x1382   :  { %v1377_v35 = vadd.f32 %v1376_v61, %v3177_v60  ;;  %v1397_v49 = vadd.f32 %v1396_v17, %v3172_v52 }
0x1384   :  { %v2070_v0 = vmul.f32 -1.442695, %v1377_v35  ;;  %v2071_v3 = vmul.f32 -1.442695, %v1397_v49 }
0x1386   :  { %2235 = vpow2.f32 %v2070_v0 }
0x1387   :  { %2237 = vpow2.f32 %v2071_v3 }
0x138c   :  { %v2236_v62 = vpop.eup %2235 }
0x138d   :  { %v2238_v24 = vpop.eup %2237  ;;  %v1407_v23 = vadd.f32 1.0, %v2236_v62 }
0x138e   :  { %v1408_v21 = vadd.f32 1.0, %v2238_v24 }
0x138f   :  { %2239 = vrcp.f32 %v1407_v23  ;;  %v1420_v16 = vand.u32 2147483648, %v1407_v23  ;;  %v1418_v8 = vand.u32 2147483647, %v1407_v23  ;;  %vm1414_vm0 = vweird.f32 %v1407_v23 }
0x1390   :  { %2241 = vrcp.f32 %v1408_v21  ;;  %v1435_v58 = vand.u32 2147483648, %v1408_v21  ;;  %v1433_v54 = vand.u32 2147483647, %v1408_v21  ;;  %vm1429_vm13 = vweird.f32 %v1408_v21 }
0x1391   :  { %2243 = vtanh.f32 %v1397_v49  ;;  %v1421_v34 = vor.u32 1.1754944e-38, %v1420_v16  ;;  %vm1419_vm11 = vcmp.eq.f32.partialorder %v1418_v8, 8.507059e+37 }
0x1392   :  { %v1436_v45 = vor.u32 1.1754944e-38, %v1435_v58  ;;  %vm1434_vm2 = vcmp.eq.f32.partialorder %v1433_v54, 8.507059e+37 }
0x1395   :  { %v2240_v25 = vpop.eup %2239 }
0x1396   :  { %v2242_v5 = vpop.eup %2241  ;;  %v1410_v53 = vmul.f32 %v2240_v25, %v1407_v23  ;;  %vm1415_vm14 = vweird.f32 %v2240_v25 }
0x1397   :  { %v1425_v12 = vmul.f32 %v2242_v5, %v1408_v21  ;;  %vm1430_vm15 = vweird.f32 %v2242_v5  ;;  %vm1416_vm12 = vmor %vm1414_vm0, %vm1415_vm14  ;;  %v2244_v50 = vpop.eup %2243 }
0x1398   :  { %v1411_v56 = vsub.f32 1.0, %v1410_v53  ;;  %vm1431_vm1 = vmor %vm1429_vm13, %vm1430_vm15 }
0x1399   :  { %v1426_v39 = vsub.f32 1.0, %v1425_v12 }
0x139a   :  { %v1412_v28 = vmul.f32 %v2240_v25, %v1411_v56 }
0x139b   :  { %v1427_v2 = vmul.f32 %v2242_v5, %v1426_v39 }
0x139c   :  { %v1413_v30 = vadd.f32 %v2240_v25, %v1412_v28 }
0x139d   :  { %v1428_v36 = vadd.f32 %v2242_v5, %v1427_v2 }
0x139e   :  { %v1417_v4 = vsel %vm1416_vm12, %v2240_v25, %v1413_v30 }
0x139f   :  { %v1422_v32 = vsel %vm1419_vm11, %v1421_v34, %v1417_v4  ;;  %v1432_v7 = vsel %vm1431_vm1, %v2242_v5, %v1428_v36  ;;  %v1568_v36 = vrot.slane %v3177_v60, 4  ;;  %v1569_v4 = vrot.slane %v3172_v52, 4 }
0x13a0   :  { %v1437_v26 = vsel %vm1434_vm2, %v1436_v45, %v1432_v7  ;;  %v1449_v1 = vmul.f32 %v1447_v22, %v1422_v32 }
0x13a1   :  { %v1444_v57 = vsel %vm211_vm10, %v2244_v50, %v1437_v26 }
0x13a2   :  { %v1450_v20 = vmul.f32 %v1444_v57, %v1422_v32 }
0x13a4   :  { %1452 = vrot.lane.b32.xlu0 %v1450_v20, %s2309_s5 }
0x1416   :  { %v1453_v46 = vpop.permute.xlu0 %1452 }
0x1417   :  { %v3188_v63 = vadd.f32 %v1453_v46, %v1449_v1 }
0x1419   :  { %2245 = vtanh.f32 %v3188_v63 }
0x141f   :  { %v2246_v13 = vpop.eup %2245 }
0x1420   :  { %v1457_v51 = vmul.f32 %v2246_v13, %v1444_v57 }
0x1422   :  { %1459 = vrot.lane.b32.xlu1 %v1457_v51, %s2309_s5 }
0x1494   :  { %v1460_v33 = vpop.permute.xlu1 %1459 }
0x1495   :  { %1463 = vst.msk [vmem:[#allocation2] sm:$0x3] %vm1462_vm6, %v1460_v33  ;;  %2072 = vmatmul.msk.f32.vlgmr.msra.gmra.mxu2 %vm1355_vm4, %v1460_v33  ;;  %2073 = vmatmul.msk.f32.vlgmr.msra.gmra.mxu3 %vm1355_vm4, %v1460_v33 }
0x1496   :  { %1886 = vmatpush.msra.mxu2 %v3003_v15  ;;  %1906 = vmatpush.msra.mxu3 %v3008_v14  ;;  %v1466_v15 = vrot.slane %v3177_v60, 2  ;;  %v1467_v14 = vrot.slane %v3172_v52, 2 }
0x1498   :  { %1887 = vmatpush.msra.mxu2 %v3013_v42  ;;  %1907 = vmatpush.msra.mxu3 %v3020_v43 }
0x149a   :  { %1888 = vmatpush.msra.mxu2 %v3025_v11  ;;  %1908 = vmatpush.msra.mxu3 %v3030_v9 }
0x149c   :  { %1889 = vmatpush.msra.mxu2 %v3039_v31  ;;  %1909 = vmatpush.msra.mxu3 %v3044_v37 }
0x149e   :  { %1890 = vmatpush.msra.mxu2 %v3053_v40  ;;  %1910 = vmatpush.msra.mxu3 %v3058_v41 }
0x14a0   :  { %1891 = vmatpush.msra.mxu2 %v3067_v19  ;;  %1911 = vmatpush.msra.mxu3 %v3072_v44 }
0x14a2   :  { %1892 = vmatpush.msra.mxu2 %v3081_v38  ;;  %1912 = vmatpush.msra.mxu3 %v3086_v6 }
0x14a4   :  { %1893 = vmatpush.msra.mxu2 %v3101_v47  ;;  %1913 = vmatpush.msra.mxu3 %v3106_v48 }
0x1518   :  { %v1489_v42 = vpop.f32.mrf.mxu2  ;;  %v1509_v43 = vpop.f32.mrf.mxu3 }
0x1519   :  { %v1490_v11 = vadd.f32 %v1489_v42, %v1466_v15  ;;  %v1510_v9 = vadd.f32 %v1509_v43, %v1467_v14 }
0x151b   :  { %v2074_v31 = vmul.f32 -1.442695, %v1490_v11  ;;  %v2075_v37 = vmul.f32 -1.442695, %v1510_v9 }
0x151d   :  { %2247 = vpow2.f32 %v2074_v31 }
0x151e   :  { %2249 = vpow2.f32 %v2075_v37 }
0x1523   :  { %v2248_v40 = vpop.eup %2247 }
0x1524   :  { %v2250_v41 = vpop.eup %2249  ;;  %v1520_v19 = vadd.f32 1.0, %v2248_v40 }
0x1525   :  { %v1521_v44 = vadd.f32 1.0, %v2250_v41 }
0x1526   :  { %2251 = vrcp.f32 %v1520_v19  ;;  %v1533_v17 = vand.u32 2147483648, %v1520_v19  ;;  %v1531_v49 = vand.u32 2147483647, %v1520_v19  ;;  %vm1527_vm5 = vweird.f32 %v1520_v19 }
0x1527   :  { %2253 = vrcp.f32 %v1521_v44  ;;  %v1548_v0 = vand.u32 2147483648, %v1521_v44  ;;  %v1546_v62 = vand.u32 2147483647, %v1521_v44  ;;  %vm1542_vm9 = vweird.f32 %v1521_v44 }
0x1528   :  { %2255 = vtanh.f32 %v1510_v9  ;;  %v1534_v23 = vor.u32 1.1754944e-38, %v1533_v17  ;;  %vm1532_vm14 = vcmp.eq.f32.partialorder %v1531_v49, 8.507059e+37 }
0x1529   :  { %v1549_v5 = vor.u32 1.1754944e-38, %v1548_v0  ;;  %vm1547_vm0 = vcmp.eq.f32.partialorder %v1546_v62, 8.507059e+37 }
0x152c   :  { %v2252_v38 = vpop.eup %2251 }
0x152d   :  { %v2254_v6 = vpop.eup %2253  ;;  %v1523_v47 = vmul.f32 %v2252_v38, %v1520_v19  ;;  %vm1528_vm7 = vweird.f32 %v2252_v38 }
0x152e   :  { %v1538_v48 = vmul.f32 %v2254_v6, %v1521_v44  ;;  %vm1543_vm3 = vweird.f32 %v2254_v6  ;;  %vm1529_vm8 = vmor %vm1527_vm5, %vm1528_vm7  ;;  %v2256_v53 = vpop.eup %2255 }
0x152f   :  { %v1524_v10 = vsub.f32 1.0, %v1523_v47  ;;  %vm1544_vm15 = vmor %vm1542_vm9, %vm1543_vm3 }
0x1530   :  { %v1539_v61 = vsub.f32 1.0, %v1538_v48 }
0x1531   :  { %v1525_v35 = vmul.f32 %v2252_v38, %v1524_v10 }
0x1532   :  { %v1540_v3 = vmul.f32 %v2254_v6, %v1539_v61 }
0x1533   :  { %v1526_v24 = vadd.f32 %v2252_v38, %v1525_v35 }
0x1534   :  { %v1541_v21 = vadd.f32 %v2254_v6, %v1540_v3 }
0x1535   :  { %v1530_v25 = vsel %vm1529_vm8, %v2252_v38, %v1526_v24 }
0x1536   :  { %v1535_v12 = vsel %vm1532_vm14, %v1534_v23, %v1530_v25  ;;  %v1545_v56 = vsel %vm1544_vm15, %v2254_v6, %v1541_v21  ;;  %v1670_v23 = vrot.slane %v3177_v60, 6  ;;  %v1671_v21 = vrot.slane %v3172_v52, 6 }
0x1537   :  { %v1550_v39 = vsel %vm1547_vm0, %v1549_v5, %v1545_v56  ;;  %v1554_v8 = vmul.f32 %v1535_v12, %v3188_v63 }
0x1538   :  { %v1553_v16 = vsel %vm211_vm10, %v2256_v53, %v1550_v39 }
0x1539   :  { %v1555_v28 = vmul.f32 %v1553_v16, %v1535_v12 }
0x153b   :  { %1557 = vrot.lane.b32.xlu2 %v1555_v28, %s2309_s5 }
0x1595   :  { %v1558_v58 = vpop.permute.xlu2 %1557 }
0x1596   :  { %v1560_v2 = vadd.f32 %v1558_v58, %v1554_v8 }
0x1598   :  { %2257 = vtanh.f32 %v1560_v2 }
0x159e   :  { %v2258_v54 = vpop.eup %2257 }
0x159f   :  { %v1562_v30 = vmul.f32 %v2258_v54, %v1553_v16 }
0x15a1   :  { %1564 = vrot.lane.b32.xlu0 %v1562_v30, %s2309_s5 }
0x1613   :  { %v1565_v34 = vpop.permute.xlu0 %1564 }
0x1614   :  { %1567 = vst.msk [vmem:[#allocation2 + $0x2] sm:$0x3] %vm1462_vm6, %v1565_v34  ;;  %2076 = vmatmul.msk.f32.vlgmr.msra.gmra.mxu0 %vm1355_vm4, %v1565_v34  ;;  %2077 = vmatmul.msk.f32.vlgmr.msrb.gmra.mxu1 %vm1355_vm4, %v1565_v34 }
0x1691   :  { %v1591_v45 = vpop.f32.mrf.mxu0  ;;  %v1611_v50 = vpop.f32.mrf.mxu1 }
0x1692   :  { %v1592_v32 = vadd.f32 %v1591_v45, %v1568_v36  ;;  %v1612_v7 = vadd.f32 %v1611_v50, %v1569_v4 }
0x1694   :  { %v2078_v26 = vmul.f32 -1.442695, %v1592_v32  ;;  %v2079_v57 = vmul.f32 -1.442695, %v1612_v7 }
0x1696   :  { %2259 = vpow2.f32 %v2078_v26 }
0x1697   :  { %2261 = vpow2.f32 %v2079_v57 }
0x169c   :  { %v2260_v20 = vpop.eup %2259 }
0x169d   :  { %v2262_v22 = vpop.eup %2261  ;;  %v1622_v1 = vadd.f32 1.0, %v2260_v20 }
0x169e   :  { %v1623_v46 = vadd.f32 1.0, %v2262_v22 }
0x169f   :  { %2263 = vrcp.f32 %v1622_v1  ;;  %v1635_v42 = vand.u32 2147483648, %v1622_v1  ;;  %v1633_v11 = vand.u32 2147483647, %v1622_v1  ;;  %vm1629_vm11 = vweird.f32 %v1622_v1 }
0x16a0   :  { %2265 = vrcp.f32 %v1623_v46  ;;  %v1650_v9 = vand.u32 2147483648, %v1623_v46  ;;  %v1648_v37 = vand.u32 2147483647, %v1623_v46  ;;  %vm1644_vm2 = vweird.f32 %v1623_v46 }
0x16a1   :  { %2267 = vtanh.f32 %v1612_v7  ;;  %v1636_v41 = vor.u32 1.1754944e-38, %v1635_v42  ;;  %vm1634_vm7 = vcmp.eq.f32.partialorder %v1633_v11, 8.507059e+37  ;;  %v1982_v42 = vld [vmem:[%s3319_s12 + $0x30] sm:$0xff]  ;;  %v1980_v11 = vld [vmem:[%s3319_s12 + $0x20] sm:$0xff] }
0x16a2   :  { %v1651_v38 = vor.u32 1.1754944e-38, %v1650_v9  ;;  %vm1649_vm5 = vcmp.eq.f32.partialorder %v1648_v37, 8.507059e+37 }
0x16a5   :  { %v2264_v63 = vpop.eup %2263 }
0x16a6   :  { %v2266_v13 = vpop.eup %2265  ;;  %v1625_v51 = vmul.f32 %v2264_v63, %v1622_v1  ;;  %vm1630_vm12 = vweird.f32 %v2264_v63 }
0x16a7   :  { %v1640_v33 = vmul.f32 %v2266_v13, %v1623_v46  ;;  %vm1645_vm13 = vweird.f32 %v2266_v13  ;;  %vm1631_vm1 = vmor %vm1629_vm11, %vm1630_vm12  ;;  %v2268_v6 = vpop.eup %2267 }
0x16a8   :  { %v1626_v15 = vsub.f32 1.0, %v1625_v51  ;;  %vm1646_vm3 = vmor %vm1644_vm2, %vm1645_vm13 }
0x16a9   :  { %v1641_v14 = vsub.f32 1.0, %v1640_v33 }
0x16aa   :  { %v1627_v43 = vmul.f32 %v2264_v63, %v1626_v15 }
0x16ab   :  { %v1642_v31 = vmul.f32 %v2266_v13, %v1641_v14  ;;  %v1983_v14 = vld [vmem:[%s3319_s12 + $0x38] sm:$0xff] }
0x16ac   :  { %v1628_v40 = vadd.f32 %v2264_v63, %v1627_v43  ;;  %2002 = vmatpush.msra.mxu0 %v1983_v14  ;;  %v1981_v43 = vld [vmem:[%s3319_s12 + $0x28] sm:$0xff] }
0x16ad   :  { %v1643_v19 = vadd.f32 %v2266_v13, %v1642_v31 }
0x16ae   :  { %v1632_v44 = vsel %vm1631_vm1, %v2264_v63, %v1628_v40  ;;  %2003 = vmatpush.msra.mxu0 %v1982_v42 }
0x16af   :  { %v1637_v47 = vsel %vm1634_vm7, %v1636_v41, %v1632_v44  ;;  %v1647_v48 = vsel %vm1646_vm3, %v2266_v13, %v1643_v19  ;;  %v1979_v19 = vld [vmem:[%s3319_s12 + $0x18] sm:$0xff]  ;;  %v1978_v44 = vld [vmem:[%s3319_s12 + $0x10] sm:$0xff] }
0x16b0   :  { %v1652_v10 = vsel %vm1649_vm5, %v1651_v38, %v1647_v48  ;;  %v1656_v35 = vmul.f32 %v1637_v47, %v1560_v2  ;;  %2004 = vmatpush.msra.mxu0 %v1981_v43  ;;  %v1977_v38 = vld [vmem:[%s3319_s12 + $0x8] sm:$0xff] }
0x16b1   :  { %v1655_v61 = vsel %vm211_vm10, %v2268_v6, %v1652_v10  ;;  %v1976_v6 = vld [vmem:[%s3319_s12] sm:$0xff]  ;;  %v3274_v10 = vadd.f32 %v2616_v55, %v122_v29 }
0x16b2   :  { %v1657_v17 = vmul.f32 %v1655_v61, %v1637_v47  ;;  %2005 = vmatpush.msra.mxu0 %v1980_v11 }
0x16b4   :  { %1659 = vrot.lane.b32.xlu1 %v1657_v17, %s2309_s5  ;;  %2006 = vmatpush.msra.mxu0 %v1979_v19 }
0x16b6   :  { %2007 = vmatpush.msra.mxu0 %v1978_v44 }
0x16b8   :  { %2008 = vmatpush.msra.mxu0 %v1977_v38 }
0x16ba   :  { %2009 = vmatpush.msra.mxu0 %v1976_v6 }
0x1726   :  { %v1660_v49 = vpop.permute.xlu1 %1659 }
0x1727   :  { %v3226_v0 = vadd.f32 %v1660_v49, %v1656_v35 }
0x1729   :  { %2269 = vtanh.f32 %v3226_v0 }
0x172f   :  { %v2270_v3 = vpop.eup %2269 }
0x1730   :  { %v1664_v62 = vmul.f32 %v2270_v3, %v1655_v61 }
0x1732   :  { %1666 = vrot.lane.b32.xlu2 %v1664_v62, %s2309_s5  ;;  %v3281_v62 = vld [vmem:[%s3320_s13] ss:$0 sm:$0xff] }
0x178c   :  { %v1667_v24 = vpop.permute.xlu2 %1666 }
0x178d   :  { %1669 = vst.msk [vmem:[#allocation2 + $0x4] sm:$0x3] %vm1462_vm6, %v1667_v24  ;;  %2080 = vmatmul.msk.f32.vlgmr.msrb.gmra.mxu2 %vm1355_vm4, %v1667_v24  ;;  %2081 = vmatmul.msk.f32.vlgmr.msrb.gmra.mxu3 %vm1355_vm4, %v1667_v24 }
0x1810   :  { %v1693_v25 = vpop.f32.mrf.mxu2  ;;  %v1713_v5 = vpop.f32.mrf.mxu3 }
0x1811   :  { %v1694_v53 = vadd.f32 %v1693_v25, %v1670_v23  ;;  %v1714_v12 = vadd.f32 %v1713_v5, %v1671_v21 }
0x1813   :  { %v2082_v56 = vmul.f32 -1.442695, %v1694_v53  ;;  %v2083_v39 = vmul.f32 -1.442695, %v1714_v12 }
0x1815   :  { %2271 = vpow2.f32 %v2082_v56 }
0x1816   :  { %2273 = vpow2.f32 %v2083_v39 }
0x181b   :  { %v2272_v16 = vpop.eup %2271 }
0x181c   :  { %v2274_v28 = vpop.eup %2273  ;;  %v1724_v8 = vadd.f32 1.0, %v2272_v16 }
0x181d   :  { %v1725_v58 = vadd.f32 1.0, %v2274_v28 }
0x181e   :  { %2275 = vrcp.f32 %v1724_v8  ;;  %v1737_v36 = vand.u32 2147483648, %v1724_v8  ;;  %v1735_v45 = vand.u32 2147483647, %v1724_v8  ;;  %vm1731_vm14 = vweird.f32 %v1724_v8 }
0x181f   :  { %2277 = vrcp.f32 %v1725_v58  ;;  %v1752_v50 = vand.u32 2147483648, %v1725_v58  ;;  %v1750_v7 = vand.u32 2147483647, %v1725_v58  ;;  %vm1746_vm0 = vweird.f32 %v1725_v58 }
0x1820   :  { %2279 = vtanh.f32 %v1714_v12  ;;  %v1738_v57 = vor.u32 1.1754944e-38, %v1737_v36  ;;  %vm1736_vm12 = vcmp.eq.f32.partialorder %v1735_v45, 8.507059e+37 }
0x1821   :  { %v1753_v1 = vor.u32 1.1754944e-38, %v1752_v50  ;;  %vm1751_vm11 = vcmp.eq.f32.partialorder %v1750_v7, 8.507059e+37 }
0x1824   :  { %v2276_v2 = vpop.eup %2275 }
0x1825   :  { %v2278_v54 = vpop.eup %2277  ;;  %v1727_v30 = vmul.f32 %v2276_v2, %v1724_v8  ;;  %vm1732_vm8 = vweird.f32 %v2276_v2 }
0x1826   :  { %v1742_v60 = vmul.f32 %v2278_v54, %v1725_v58  ;;  %vm1747_vm9 = vweird.f32 %v2278_v54  ;;  %vm1733_vm15 = vmor %vm1731_vm14, %vm1732_vm8  ;;  %v2280_v46 = vpop.eup %2279 }
0x1827   :  { %v1728_v34 = vsub.f32 1.0, %v1727_v30  ;;  %vm1748_vm13 = vmor %vm1746_vm0, %vm1747_vm9 }
0x1828   :  { %v1743_v52 = vsub.f32 1.0, %v1742_v60 }
0x1829   :  { %v1729_v4 = vmul.f32 %v2276_v2, %v1728_v34 }
0x182a   :  { %v1744_v32 = vmul.f32 %v2278_v54, %v1743_v52 }
0x182b   :  { %v1730_v26 = vadd.f32 %v2276_v2, %v1729_v4 }
0x182c   :  { %v1745_v20 = vadd.f32 %v2278_v54, %v1744_v32 }
0x182d   :  { %v1734_v22 = vsel %vm1733_vm15, %v2276_v2, %v1730_v26 }
0x182e   :  { %v1739_v63 = vsel %vm1736_vm12, %v1738_v57, %v1734_v22  ;;  %v1749_v13 = vsel %vm1748_vm13, %v2278_v54, %v1745_v20 }
0x182f   :  { %v1754_v51 = vsel %vm1751_vm11, %v1753_v1, %v1749_v13  ;;  %v1758_v9 = vmul.f32 %v1739_v63, %v3226_v0  ;;  %v1872_v13 = vrot.slane %v3274_v10, 2 }
0x1830   :  { %v1757_v33 = vsel %vm211_vm10, %v2280_v46, %v1754_v51  ;;  %v1873_v51 = vrot.slane %v2517_v27, 2 }
0x1831   :  { %v1759_v15 = vmul.f32 %v1757_v33, %v1739_v63 }
0x1833   :  { %1761 = vrot.lane.b32.xlu0 %v1759_v15, %s2309_s5 }
0x18a5   :  { %v1762_v31 = vpop.permute.xlu0 %1761 }
0x18a6   :  { %v3251_v37 = vadd.f32 %v1762_v31, %v1758_v9 }
0x18a8   :  { %2281 = vtanh.f32 %v3251_v37 }
0x18ae   :  { %v2282_v40 = vpop.eup %2281 }
0x18af   :  { %v1766_v41 = vmul.f32 %v2282_v40, %v1757_v33 }
0x18b1   :  { %1768 = vrot.lane.b32.xlu1 %v1766_v41, %s2309_s5 }
0x1923   :  { %v1769_v47 = vpop.permute.xlu1 %1768 }
0x1924   :  { %1771 = vst.msk [vmem:[#allocation2 + $0x6] sm:$0x3] %vm1462_vm6, %v1769_v47  ;;  %2084 = vmatmul.msk.f32.vlgmr.msrb.gmra.mxu0 %vm1355_vm4, %v1769_v47  ;;  %2085 = vmatmul.msk.f32.vlgmr.msra.gmra.mxu1 %vm1355_vm4, %v1769_v47 }
0x192b   :  { %v1974_v48 = vld [vmem:[#allocation2] sm:$0xff] }
0x192c   :  { %2092 = vmatmul.msk.f32.vlgmr.msra.gmra.mxu0 %vm1355_vm4, %v1974_v48 }
0x19a1   :  { %v1791_v61 = vpop.f32.mrf.mxu0  ;;  %v1811_v17 = vpop.f32.mrf.mxu1 }
0x19a2   :  { %v1792_v35 = vadd.f32 %v1791_v61, %v3274_v10  ;;  %v1812_v49 = vadd.f32 %v1811_v17, %v2517_v27 }
0x19a4   :  { %v2086_v0 = vmul.f32 -1.442695, %v1792_v35  ;;  %v2087_v3 = vmul.f32 -1.442695, %v1812_v49 }
0x19a6   :  { %2283 = vpow2.f32 %v2086_v0 }
0x19a7   :  { %2285 = vpow2.f32 %v2087_v3 }
0x19a9   :  { %v2011_v24 = vpop.f32.mrf.mxu0 }
0x19aa   :  { %v2012_v59 = vadd.f32 %v3281_v62, %v2011_v24 }
0x19ac   :  { %v2284_v55 = vpop.eup %2283  ;;  %2017 = vst [vmem:[%s3321_s14] sm:$0xff] %v2012_v59 }
0x19ad   :  { %v2286_v29 = vpop.eup %2285  ;;  %v1822_v23 = vadd.f32 1.0, %v2284_v55 }
0x19ae   :  { %v1823_v21 = vadd.f32 1.0, %v2286_v29 }
0x19af   :  { %2287 = vrcp.f32 %v1822_v23  ;;  %v1835_v16 = vand.u32 2147483648, %v1822_v23  ;;  %v1833_v8 = vand.u32 2147483647, %v1822_v23  ;;  %vm1829_vm7 = vweird.f32 %v1822_v23 }
0x19b0   :  { %2289 = vrcp.f32 %v1823_v21  ;;  %v1850_v58 = vand.u32 2147483648, %v1823_v21  ;;  %v1848_v54 = vand.u32 2147483647, %v1823_v21  ;;  %vm1844_vm5 = vweird.f32 %v1823_v21 }
0x19b1   :  { %2291 = vtanh.f32 %v1812_v49  ;;  %v1836_v60 = vor.u32 1.1754944e-38, %v1835_v16  ;;  %vm1834_vm8 = vcmp.eq.f32.partialorder %v1833_v8, 8.507059e+37 }
0x19b2   :  { %v1851_v36 = vor.u32 1.1754944e-38, %v1850_v58  ;;  %vm1849_vm14 = vcmp.eq.f32.partialorder %v1848_v54, 8.507059e+37 }
0x19b5   :  { %v2288_v25 = vpop.eup %2287 }
0x19b6   :  { %v2290_v5 = vpop.eup %2289  ;;  %v1825_v53 = vmul.f32 %v2288_v25, %v1822_v23  ;;  %vm1830_vm1 = vweird.f32 %v2288_v25 }
0x19b7   :  { %v1840_v12 = vmul.f32 %v2290_v5, %v1823_v21  ;;  %vm1845_vm2 = vweird.f32 %v2290_v5  ;;  %vm1831_vm3 = vmor %vm1829_vm7, %vm1830_vm1  ;;  %v2292_v4 = vpop.eup %2291 }
0x19b8   :  { %v1826_v56 = vsub.f32 1.0, %v1825_v53  ;;  %vm1846_vm9 = vmor %vm1844_vm5, %vm1845_vm2 }
0x19b9   :  { %v1841_v39 = vsub.f32 1.0, %v1840_v12 }
0x19ba   :  { %v1827_v28 = vmul.f32 %v2288_v25, %v1826_v56 }
0x19bb   :  { %v1842_v2 = vmul.f32 %v2290_v5, %v1841_v39 }
0x19bc   :  { %v1828_v30 = vadd.f32 %v2288_v25, %v1827_v28 }
0x19bd   :  { %v1843_v34 = vadd.f32 %v2290_v5, %v1842_v2 }
0x19be   :  { %v1832_v52 = vsel %vm1831_vm3, %v2288_v25, %v1828_v30 }
0x19bf   :  { %v1837_v45 = vsel %vm1834_vm8, %v1836_v60, %v1832_v52  ;;  %v1847_v50 = vsel %vm1846_vm9, %v2290_v5, %v1843_v34 }
0x19c0   :  { %v1852_v32 = vsel %vm1849_vm14, %v1851_v36, %v1847_v50  ;;  %v1856_v57 = vmul.f32 %v1837_v45, %v3251_v37 }
0x19c1   :  { %v1855_v7 = vsel %vm211_vm10, %v2292_v4, %v1852_v32 }
0x19c2   :  { %v1857_v26 = vmul.f32 %v1855_v7, %v1837_v45 }
0x19c4   :  { %1859 = vrot.lane.b32.xlu2 %v1857_v26, %s2309_s5 }
0x1a1e   :  { %v1860_v20 = vpop.permute.xlu2 %1859 }
0x1a1f   :  { %v1862_v22 = vadd.f32 %v1860_v20, %v1856_v57 }
0x1a21   :  { %2293 = vtanh.f32 %v1862_v22 }
0x1a27   :  { %v2294_v1 = vpop.eup %2293 }
0x1a28   :  { %v1864_v46 = vmul.f32 %v2294_v1, %v1855_v7 }
0x1a2a   :  { %1866 = vrot.lane.b32.xlu0 %v1864_v46, %s2309_s5 }
0x1a9c   :  { %v1867_v63 = vpop.permute.xlu0 %1866 }
0x1a9d   :  { %1869 = vst.msk [vmem:[#allocation2 + $0x8] sm:$0x3] %vm1462_vm6, %v1867_v63  ;;  %2088 = vmatmul.msk.f32.vlgmr.msra.gmra.mxu2 %vm1355_vm4, %v1867_v63  ;;  %2089 = vmatmul.msk.f32.vlgmr.msra.gmra.mxu3 %vm1355_vm4, %v1867_v63 }
0x1b20   :  { %v1895_v33 = vpop.f32.mrf.mxu2  ;;  %v1915_v15 = vpop.f32.mrf.mxu3 }
0x1b21   :  { %v1896_v14 = vadd.f32 %v1895_v33, %v1872_v13  ;;  %v1916_v42 = vadd.f32 %v1915_v15, %v1873_v51 }
0x1b23   :  { %v2090_v43 = vmul.f32 -1.442695, %v1896_v14  ;;  %v2091_v11 = vmul.f32 -1.442695, %v1916_v42 }
0x1b25   :  { %2295 = vpow2.f32 %v2090_v43 }
0x1b26   :  { %2297 = vpow2.f32 %v2091_v11 }
0x1b2b   :  { %v2296_v9 = vpop.eup %2295 }
0x1b2c   :  { %v2298_v31 = vpop.eup %2297  ;;  %v1926_v37 = vadd.f32 1.0, %v2296_v9 }
0x1b2d   :  { %v1927_v40 = vadd.f32 1.0, %v2298_v31 }
0x1b2e   :  { %2299 = vrcp.f32 %v1926_v37  ;;  %v1939_v47 = vand.u32 2147483648, %v1926_v37  ;;  %v1937_v10 = vand.u32 2147483647, %v1926_v37  ;;  %vm1933_vm12 = vweird.f32 %v1926_v37 }
0x1b2f   :  { %2301 = vrcp.f32 %v1927_v40  ;;  %v1954_v61 = vand.u32 2147483648, %v1927_v40  ;;  %v1952_v35 = vand.u32 2147483647, %v1927_v40  ;;  %vm1948_vm11 = vweird.f32 %v1927_v40 }
0x1b30   :  { %2303 = vtanh.f32 %v1916_v42  ;;  %v1940_v0 = vor.u32 1.1754944e-38, %v1939_v47  ;;  %vm1938_vm1 = vcmp.eq.f32.partialorder %v1937_v10, 8.507059e+37 }
0x1b31   :  { %v1955_v59 = vor.u32 1.1754944e-38, %v1954_v61  ;;  %vm1953_vm7 = vcmp.eq.f32.partialorder %v1952_v35, 8.507059e+37 }
0x1b34   :  { %v2300_v41 = vpop.eup %2299 }
0x1b35   :  { %v2302_v19 = vpop.eup %2301  ;;  %v1929_v44 = vmul.f32 %v2300_v41, %v1926_v37  ;;  %vm1934_vm15 = vweird.f32 %v2300_v41 }
0x1b36   :  { %v1944_v38 = vmul.f32 %v2302_v19, %v1927_v40  ;;  %vm1949_vm0 = vweird.f32 %v2302_v19  ;;  %vm1935_vm13 = vmor %vm1933_vm12, %vm1934_vm15  ;;  %v2304_v55 = vpop.eup %2303 }
0x1b37   :  { %v1930_v6 = vsub.f32 1.0, %v1929_v44  ;;  %vm1950_vm2 = vmor %vm1948_vm11, %vm1949_vm0 }
0x1b38   :  { %v1945_v27 = vsub.f32 1.0, %v1944_v38 }
0x1b39   :  { %v1931_v48 = vmul.f32 %v2300_v41, %v1930_v6 }
0x1b3a   :  { %v1946_v17 = vmul.f32 %v2302_v19, %v1945_v27 }
0x1b3b   :  { %v1932_v49 = vadd.f32 %v2300_v41, %v1931_v48 }
0x1b3c   :  { %v1947_v3 = vadd.f32 %v2302_v19, %v1946_v17 }
0x1b3d   :  { %v1936_v24 = vsel %vm1935_vm13, %v2300_v41, %v1932_v49 }
0x1b3e   :  { %v1941_v29 = vsel %vm1938_vm1, %v1940_v0, %v1936_v24  ;;  %v1951_v23 = vsel %vm1950_vm2, %v2302_v19, %v1947_v3 }
0x1b3f   :  { %v1956_v21 = vsel %vm1953_vm7, %v1955_v59, %v1951_v23  ;;  %v1960_v53 = vmul.f32 %v1941_v29, %v1862_v22 }
0x1b40   :  { %v1959_v25 = vsel %vm211_vm10, %v2304_v55, %v1956_v21 }
0x1b41   :  { %v1961_v5 = vmul.f32 %v1959_v25, %v1941_v29 }
0x1b43   :  { %1963 = vrot.lane.b32.xlu1 %v1961_v5, %s2309_s5 }
0x1bb5   :  { %v1964_v12 = vpop.permute.xlu1 %1963 }
0x1bb6   :  { %v1966_v56 = vadd.f32 %v1964_v12, %v1960_v53 }
0x1bb8   :  { %2305 = vtanh.f32 %v1966_v56 }
0x1bbe   :  { %v2306_v39 = vpop.eup %2305 }
0x1bbf   :  { %v1968_v16 = vmul.f32 %v2306_v39, %v1959_v25 }
0x1bc1   :  { %1970 = vrot.lane.b32.xlu2 %v1968_v16, %s2309_s5 }
0x1c1b   :  { %v1971_v28 = vpop.permute.xlu2 %1970 }
0x1c1c   :  { %1973 = vst.msk [vmem:[#allocation2 + $0xa] sm:$0x3] %vm1462_vm6, %v1971_v28 }
0x1c23   :  { %v1975_v8 = vld [vmem:[#allocation2 + $0x8] sm:$0xf] }
0x1c24   :  { %2093 = vmatmul.msk.f32.gmra.mxu0 %vm1355_vm4, %v1975_v8 }
0x1ca1   :  { %v2014_v58 = vpop.f32.mrf.mxu0 }
0x1ca2   :  { %v2015_v18 = vadd.f32 %v3281_v62, %v2014_v58 }
0x1ca4   :  { %2018 = vst [vmem:[%s3321_s14 + $0x8] sm:$0xf] %v2015_v18 }

</bundles_post_ra>
